<compile_context>
chip_gen: v5e
topology: v5e:2x2
jax: 0.10.0
libtpu: 0.0.40
codegen_flags: <defaults>
</compile_context>

<pallas_src>
import jax
import jax.numpy as jnp
from jax.experimental import pallas as pl
from jax.experimental.pallas import tpu as pltpu

HIDDEN = 768        # BERT hidden size (pooler + fc1 in_features)
FC1_OUT = 512
NUM_CLASSES = 5
PAD_CLASSES = 128   # lane-dense padded class dim -> full unmasked stores
NEG_FILL = -1e30    # padded-class bias: exp(NEG_FILL - m) == 0.0 in f32
TM_MAX = 512        # max batch tile rows (amortizes grid-step overhead)


def _round_up(x, m):
    return (x + m - 1) // m * m


def bert_head_kernel(pooled_ref, wp_ref, bp_ref, w1_ref, b1_ref,
                     w2_ref, b2_ref, out_ref):
    # pooled_ref: (tm, 768) f32    wp_ref: (768, 768) bf16   bp_ref: (1, 768) f32
    # w1_ref:     (768, 512) bf16  b1_ref: (1, 512) f32
    # w2_ref:     (512, 128) bf16 (cols >= 5 are zero)
    # b2_ref:     (1, 128) f32    (cols >= 5 are NEG_FILL)
    # out_ref:    (tm, 128) f32   (lane-dense; caller slices [:, :5])
    x = pooled_ref[...].astype(jnp.bfloat16)

    # Fused BERT pooler: tanh(pooled @ Wp + bp).  MXU matmul with f32
    # accumulation; tanh on bf16 input (EUP bf16 on v6e/v7x) whose bf16
    # output feeds fc1 directly.
    pre = jnp.dot(x, wp_ref[...], preferred_element_type=jnp.float32) + bp_ref[...]
    cls = jnp.tanh(pre.astype(jnp.bfloat16))

    # fc1 + ReLU (bf16 operands, f32 accumulate).
    h = jnp.dot(cls, w1_ref[...],
                preferred_element_type=jnp.float32) + b1_ref[...]
    h = jnp.maximum(h, 0.0)

    # Dropout(p=0.1) is the identity at inference time.

    # fc2, padded to 128 classes.
    logits = jnp.dot(h.astype(jnp.bfloat16), w2_ref[...],
                     preferred_element_type=jnp.float32) + b2_ref[...]

    # Numerically stable LogSoftmax over classes.  Padded lanes hold
    # NEG_FILL so exp(z) underflows to exactly 0 there and does not pollute
    # the normalizer.
    m = jnp.max(logits, axis=1, keepdims=True)
    z = logits - m
    lse = jnp.log(jnp.sum(jnp.exp(z), axis=1, keepdims=True))
    out_ref[...] = z - lse


def prepare_head_params(wp, bp, w1, b1, w2, b2):
    """One-time weight preparation (bf16 cast + class-dim padding).

    Do this once and reuse the result across calls so the ~4 MiB of weight
    casts are not re-done on every forward pass."""
    wp_b = wp.astype(jnp.bfloat16)
    w1_b = w1.astype(jnp.bfloat16)
    w2_p = jnp.zeros((FC1_OUT, PAD_CLASSES), jnp.bfloat16).at[:, :NUM_CLASSES].set(
        w2.astype(jnp.bfloat16))
    bp_2d = bp.reshape(1, HIDDEN).astype(jnp.float32)
    b1_2d = b1.reshape(1, FC1_OUT).astype(jnp.float32)
    b2_p = jnp.full((1, PAD_CLASSES), NEG_FILL, jnp.float32).at[
        0, :NUM_CLASSES].set(b2.astype(jnp.float32))
    return wp_b, bp_2d, w1_b, b1_2d, w2_p, b2_p


def _pick_tile(B, tm_max):
    """Batch-adaptive tile: small batches use a short tile (multiple of 8);
    large batches get >=2 (preferably even) grid steps for v7x megacore."""
    rows = _round_up(max(B, 1), 8)
    if rows <= 256:
        return rows, 1, rows
    n = max(2, pl.cdiv(rows, tm_max))
    n = n + (n % 2)                      # even step count -> both v7x cores busy
    tm = _round_up(pl.cdiv(rows, n), 128)
    n = pl.cdiv(rows, tm)
    return tm, n, n * tm


def bert_arch_forward(pooled, params, *, tm_max=TM_MAX):
    """Pooler + classification head of BERT_Arch as one Pallas kernel.

    pooled: (B, 768) f32 pre-pooler (masked-mean) representation.
    params: output of prepare_head_params().
    Returns (B, 5) f32 log-probabilities.
    """
    wp_b, bp_2d, w1_b, b1_2d, w2_p, b2_p = params
    B = pooled.shape[0]
    tm, n_tiles, B_pad = _pick_tile(B, tm_max)

    # Only pad the batch dim when needed; no wrapper-side cast pass.
    if B_pad != B:
        pooled_p = jnp.zeros((B_pad, HIDDEN), pooled.dtype).at[:B].set(pooled)
    else:
        pooled_p = pooled

    cost = pl.CostEstimate(
        flops=2 * B_pad * (HIDDEN * HIDDEN + HIDDEN * FC1_OUT
                           + FC1_OUT * PAD_CLASSES),
        transcendentals=B_pad * (HIDDEN + PAD_CLASSES + 1),
        bytes_accessed=(pooled_p.size * 4 + wp_b.size * 2 + w1_b.size * 2
                        + w2_p.size * 2
                        + (HIDDEN + FC1_OUT + PAD_CLASSES) * 4
                        + B_pad * PAD_CLASSES * 4),
    )

    out = pl.pallas_call(
        bert_head_kernel,
        out_shape=jax.ShapeDtypeStruct((B_pad, PAD_CLASSES), jnp.float32),
        grid=(n_tiles,),
        in_specs=[
            pl.BlockSpec((tm, HIDDEN), lambda i: (i, 0)),            # pooled tile
            pl.BlockSpec((HIDDEN, HIDDEN), lambda i: (0, 0)),        # wp (resident)
            pl.BlockSpec((1, HIDDEN), lambda i: (0, 0)),             # bp
            pl.BlockSpec((HIDDEN, FC1_OUT), lambda i: (0, 0)),       # w1 (resident)
            pl.BlockSpec((1, FC1_OUT), lambda i: (0, 0)),            # b1
            pl.BlockSpec((FC1_OUT, PAD_CLASSES), lambda i: (0, 0)),  # w2 (resident)
            pl.BlockSpec((1, PAD_CLASSES), lambda i: (0, 0)),        # b2
        ],
        out_specs=pl.BlockSpec((tm, PAD_CLASSES), lambda i: (i, 0)),
        compiler_params=pltpu.CompilerParams(
            dimension_semantics=("parallel",),
            vmem_limit_bytes=32 * 1024 * 1024),   # > v5e 16 MiB scoped default
        cost_estimate=cost,
    )(pooled_p, wp_b, bp_2d, w1_b, b1_2d, w2_p, b2_p)

    return out[:B, :NUM_CLASSES]


def tiny_bert_pool(sent_id, mask, emb_table):
    """Deterministic stand-in for the pretrained BERT body: embedding lookup +
    masked mean pooling.  The tanh pooler is fused into the Pallas kernel."""
    tok = emb_table[sent_id]                                    # (B, S, 768)
    maskf = mask.astype(jnp.float32)[..., None]                 # (B, S, 1)
    return (tok * maskf).sum(axis=1) / jnp.maximum(maskf.sum(axis=1), 1.0)


def reference_forward(pooled, wp, bp, w1, b1, w2, b2):
    cls_hs = jnp.tanh(pooled @ wp + bp)
    h = jnp.maximum(cls_hs @ w1 + b1, 0.0)
    logits = h @ w2 + b2
    return jax.nn.log_softmax(logits, axis=1)


if __name__ == "__main__":
    key = jax.random.PRNGKey(0)
    (k_emb, k_wp, k_bp, k_w1, k_b1,
     k_w2, k_b2, k_ids, k_ids2) = jax.random.split(key, 9)

    batch, seq, vocab = 2, 8, 32

    # Deterministic synthetic parameters.
    emb_table = jax.random.normal(k_emb, (vocab, HIDDEN), jnp.float32) * 0.02
    wp = jax.random.normal(k_wp, (HIDDEN, HIDDEN), jnp.float32) * 0.02
    bp = jax.random.normal(k_bp, (HIDDEN,), jnp.float32) * 0.02
    w1 = jax.random.normal(k_w1, (HIDDEN, FC1_OUT), jnp.float32) * 0.02
    b1 = jax.random.normal(k_b1, (FC1_OUT,), jnp.float32) * 0.02
    w2 = jax.random.normal(k_w2, (FC1_OUT, NUM_CLASSES), jnp.float32) * 0.02
    b2 = jax.random.normal(k_b2, (NUM_CLASSES,), jnp.float32) * 0.02

    # One-time weight prep (bf16 cast + class padding), reused across calls.
    params = prepare_head_params(wp, bp, w1, b1, w2, b2)

    # --- small-batch path (B=2): single short tile, minimal padding ---------
    sent_id = jax.random.randint(k_ids, (batch, seq), 0, vocab)
    mask = jnp.ones((batch, seq), jnp.int32).at[1, -2:].set(0)
    pooled = tiny_bert_pool(sent_id, mask, emb_table)

    out = jax.block_until_ready(bert_arch_forward(pooled, params))
    ref = reference_forward(pooled, wp, bp, w1, b1, w2, b2)
    assert out.shape == (batch, NUM_CLASSES)
    assert jnp.allclose(out, ref, atol=2e-2, rtol=2e-2), (
        float(jnp.max(jnp.abs(out - ref))))

    # --- multi-tile path (B=272 > 256): 2 grid steps, partial-tile padding --
    big_b = 272
    sent_id2 = jax.random.randint(k_ids2, (big_b, seq), 0, vocab)
    mask2 = jnp.ones((big_b, seq), jnp.int32)
    pooled2 = tiny_bert_pool(sent_id2, mask2, emb_table)

    out2 = jax.block_until_ready(bert_arch_forward(pooled2, params))
    ref2 = reference_forward(pooled2, wp, bp, w1, b1, w2, b2)
    assert out2.shape == (big_b, NUM_CLASSES)
    assert jnp.allclose(out2, ref2, atol=2e-2, rtol=2e-2), (
        float(jnp.max(jnp.abs(out2 - ref2))))

    print("KERNEL_OK")
</pallas_src>

<mosaic_0001>
module attributes {stable_mosaic.version = 11 : i64} {
  func.func @bert_head_kernel(%arg0: i32, %arg1: memref<8x768xf32, #tpu.memory_space<vmem>>, %arg2: memref<768x768xbf16, #tpu.memory_space<vmem>>, %arg3: memref<1x768xf32, #tpu.memory_space<vmem>>, %arg4: memref<768x512xbf16, #tpu.memory_space<vmem>>, %arg5: memref<1x512xf32, #tpu.memory_space<vmem>>, %arg6: memref<512x128xbf16, #tpu.memory_space<vmem>>, %arg7: memref<1x128xf32, #tpu.memory_space<vmem>>, %arg8: memref<8x128xf32, #tpu.memory_space<vmem>>) attributes {dimension_semantics = [#tpu.dimension_semantics<parallel>], iteration_bounds = array<i64: 1>, scalar_prefetch = 0 : i64, scratch_operands = 0 : i64, tpu.core_type = #tpu.core_type<tc>, window_params = [{transform_indices = @transform_0, window_bounds = array<i64: 8, 768>}, {pipeline_mode = #tpu.pipeline_mode<synchronous>, transform_indices = @transform_1, window_bounds = array<i64: 768, 768>}, {pipeline_mode = #tpu.pipeline_mode<synchronous>, transform_indices = @transform_2, window_bounds = array<i64: 1, 768>}, {pipeline_mode = #tpu.pipeline_mode<synchronous>, transform_indices = @transform_3, window_bounds = array<i64: 768, 512>}, {pipeline_mode = #tpu.pipeline_mode<synchronous>, transform_indices = @transform_4, window_bounds = array<i64: 1, 512>}, {pipeline_mode = #tpu.pipeline_mode<synchronous>, transform_indices = @transform_5, window_bounds = array<i64: 512, 128>}, {pipeline_mode = #tpu.pipeline_mode<synchronous>, transform_indices = @transform_6, window_bounds = array<i64: 1, 128>}, {transform_indices = @transform_7, window_bounds = array<i64: 8, 128>}]} {
    %c0 = arith.constant 0 : index
    %c0_0 = arith.constant 0 : index
    %0 = vector.load %arg1[%c0, %c0_0] : memref<8x768xf32, #tpu.memory_space<vmem>>, vector<8x768xf32>
    %1 = arith.truncf %0 : vector<8x768xf32> to vector<8x768xbf16>
    %c0_1 = arith.constant 0 : index
    %c0_2 = arith.constant 0 : index
    %2 = vector.load %arg2[%c0_1, %c0_2] : memref<768x768xbf16, #tpu.memory_space<vmem>>, vector<768x768xbf16>
    %cst = arith.constant dense<0.000000e+00> : vector<8x768xf32>
    %3 = tpu.matmul %1, %2, %cst {dimension_numbers = #tpu.dot_dimension_numbers<[1], [0], [0], [1], [0, 0, 1, 1], [], []>} : vector<8x768xbf16>, vector<768x768xbf16>, vector<8x768xf32> -> vector<8x768xf32>
    %c0_3 = arith.constant 0 : index
    %c0_4 = arith.constant 0 : index
    %4 = vector.load %arg3[%c0_3, %c0_4] : memref<1x768xf32, #tpu.memory_space<vmem>>, vector<1x768xf32>
    %5 = vector.broadcast %4 : vector<1x768xf32> to vector<8x768xf32>
    %6 = arith.addf %3, %5 : vector<8x768xf32>
    %7 = arith.truncf %6 : vector<8x768xf32> to vector<8x768xbf16>
    %8 = math.tanh %7 : vector<8x768xbf16>
    %c0_5 = arith.constant 0 : index
    %c0_6 = arith.constant 0 : index
    %9 = vector.load %arg4[%c0_5, %c0_6] : memref<768x512xbf16, #tpu.memory_space<vmem>>, vector<768x512xbf16>
    %cst_7 = arith.constant dense<0.000000e+00> : vector<8x512xf32>
    %10 = tpu.matmul %8, %9, %cst_7 {dimension_numbers = #tpu.dot_dimension_numbers<[1], [0], [0], [1], [0, 0, 1, 1], [], []>} : vector<8x768xbf16>, vector<768x512xbf16>, vector<8x512xf32> -> vector<8x512xf32>
    %c0_8 = arith.constant 0 : index
    %c0_9 = arith.constant 0 : index
    %11 = vector.load %arg5[%c0_8, %c0_9] : memref<1x512xf32, #tpu.memory_space<vmem>>, vector<1x512xf32>
    %12 = vector.broadcast %11 : vector<1x512xf32> to vector<8x512xf32>
    %13 = arith.addf %10, %12 : vector<8x512xf32>
    %cst_10 = arith.constant 0.000000e+00 : f32
    %14 = vector.broadcast %cst_10 : f32 to vector<8x512xf32>
    %15 = arith.maximumf %13, %14 : vector<8x512xf32>
    %16 = arith.truncf %15 : vector<8x512xf32> to vector<8x512xbf16>
    %c0_11 = arith.constant 0 : index
    %c0_12 = arith.constant 0 : index
    %17 = vector.load %arg6[%c0_11, %c0_12] : memref<512x128xbf16, #tpu.memory_space<vmem>>, vector<512x128xbf16>
    %cst_13 = arith.constant dense<0.000000e+00> : vector<8x128xf32>
    %18 = tpu.matmul %16, %17, %cst_13 {dimension_numbers = #tpu.dot_dimension_numbers<[1], [0], [0], [1], [0, 0, 1, 1], [], []>} : vector<8x512xbf16>, vector<512x128xbf16>, vector<8x128xf32> -> vector<8x128xf32>
    %c0_14 = arith.constant 0 : index
    %c0_15 = arith.constant 0 : index
    %19 = vector.load %arg7[%c0_14, %c0_15] : memref<1x128xf32, #tpu.memory_space<vmem>>, vector<1x128xf32>
    %20 = vector.broadcast %19 : vector<1x128xf32> to vector<8x128xf32>
    %21 = arith.addf %18, %20 : vector<8x128xf32>
    %cst_16 = arith.constant dense<0xFF800000> : vector<8xf32>
    %22 = vector.multi_reduction <maximumf>, %21, %cst_16 [1] : vector<8x128xf32> to vector<8xf32>
    %23 = vector.shape_cast %22 : vector<8xf32> to vector<8x1xf32>
    %24 = vector.broadcast %23 : vector<8x1xf32> to vector<8x128xf32>
    %25 = arith.subf %21, %24 : vector<8x128xf32>
    %26 = math.exp %25 : vector<8x128xf32>
    %cst_17 = arith.constant dense<0.000000e+00> : vector<8xf32>
    %27 = vector.multi_reduction <add>, %26, %cst_17 [1] : vector<8x128xf32> to vector<8xf32>
    %28 = vector.shape_cast %27 : vector<8xf32> to vector<8x1xf32>
    %29 = math.log %28 : vector<8x1xf32>
    %30 = vector.broadcast %29 : vector<8x1xf32> to vector<8x128xf32>
    %31 = arith.subf %25, %30 : vector<8x128xf32>
    %c0_18 = arith.constant 0 : index
    %c0_19 = arith.constant 0 : index
    %32 = vector.load %arg8[%c0_18, %c0_19] : memref<8x128xf32, #tpu.memory_space<vmem>>, vector<8x128xf32>
    tpu.vector_store %arg8[%c0_18, %c0_19], %31 {strides = array<i32>} : memref<8x128xf32, #tpu.memory_space<vmem>>, vector<8x128xf32>,
    return
  }
  func.func @transform_0(%arg0: i32) -> (i32, i32) {
    %c0_i32 = arith.constant 0 : i32
    %c0_i32_0 = arith.constant 0 : i32
    return %arg0, %c0_i32 : i32, i32
  }
  func.func @transform_1(%arg0: i32) -> (i32, i32) {
    %c0_i32 = arith.constant 0 : i32
    %c0_i32_0 = arith.constant 0 : i32
    %c0_i32_1 = arith.constant 0 : i32
    return %c0_i32, %c0_i32_0 : i32, i32
  }
  func.func @transform_2(%arg0: i32) -> (i32, i32) {
    %c0_i32 = arith.constant 0 : i32
    %c0_i32_0 = arith.constant 0 : i32
    %c0_i32_1 = arith.constant 0 : i32
    return %c0_i32, %c0_i32_0 : i32, i32
  }
  func.func @transform_3(%arg0: i32) -> (i32, i32) {
    %c0_i32 = arith.constant 0 : i32
    %c0_i32_0 = arith.constant 0 : i32
    %c0_i32_1 = arith.constant 0 : i32
    return %c0_i32, %c0_i32_0 : i32, i32
  }
  func.func @transform_4(%arg0: i32) -> (i32, i32) {
    %c0_i32 = arith.constant 0 : i32
    %c0_i32_0 = arith.constant 0 : i32
    %c0_i32_1 = arith.constant 0 : i32
    return %c0_i32, %c0_i32_0 : i32, i32
  }
  func.func @transform_5(%arg0: i32) -> (i32, i32) {
    %c0_i32 = arith.constant 0 : i32
    %c0_i32_0 = arith.constant 0 : i32
    %c0_i32_1 = arith.constant 0 : i32
    return %c0_i32, %c0_i32_0 : i32, i32
  }
  func.func @transform_6(%arg0: i32) -> (i32, i32) {
    %c0_i32 = arith.constant 0 : i32
    %c0_i32_0 = arith.constant 0 : i32
    %c0_i32_1 = arith.constant 0 : i32
    return %c0_i32, %c0_i32_0 : i32, i32
  }
  func.func @transform_7(%arg0: i32) -> (i32, i32) {
    %c0_i32 = arith.constant 0 : i32
    %c0_i32_0 = arith.constant 0 : i32
    return %arg0, %c0_i32 : i32, i32
  }
}

</mosaic_0001>

<bundles_post_ra>
// kernel: tpu_custom_call.1
= control target key start
LH: loop header
LB: loop body
LE: loop exit
PB: predicated region body
PF: predicated region fallthrough
CT: control target
= control target key end

     0   :  { %12 = vsyncpa [#allocation3], 0  ;;  %s7244_s0 = inlined_call_operand.hbm [shape: f32[8,768], index: 0, kind: input, shape index: {}]   ;;  %s7245_s1 = inlined_call_operand.hbm [shape: bf16[768,768], index: 1, kind: input, shape index: {}]   ;;  %s7246_s2 = inlined_call_operand.hbm [shape: f32[1,768], index: 2, kind: input, shape index: {}]   ;;  %s7247_s3 = inlined_call_operand.hbm [shape: bf16[768,512], index: 3, kind: input, shape index: {}]   ;;  %s7248_s4 = inlined_call_operand.hbm [shape: f32[1,512], index: 4, kind: input, shape index: {}]   ;;  %s7249_s5 = inlined_call_operand.hbm [shape: bf16[512,128], index: 5, kind: input, shape index: {}]   ;;  %s7250_s6 = inlined_call_operand.hbm [shape: f32[1,128], index: 6, kind: input, shape index: {}]   ;;  %s7251_s7 = inlined_call_operand.hbm [shape: f32[8,128], index: 7, kind: output, shape index: {}]  }
   0x1   :  { %13 = vsyncpa [#allocation6], 0 }
   0x2   :  { %14 = vsyncpa [#allocation9], 0 }
   0x3   :  { %15 = vsyncpa [#allocation12], 0  ;;  %s32_s26 = sshll.u32 %s7245_s1, 4  ;;  %s33_s26 = int_to_ptr.hbm [resolvable:$true] %s32_s26 }
   0x4   :  { %16 = vsyncpa [#allocation4], 0  ;;  %s6993_s27 = smov [#allocation5]   ;;  %s56_s8 = sshll.u32 %s7247_s3, 4  ;;  %s57_s8 = int_to_ptr.hbm [resolvable:$true] %s56_s8 }
   0x5   :  { %s34_s28 = sshll.u32 %s6993_s27, 4  ;;  %s6994_s9 = smov 384   ;;  %s35_s28 = int_to_ptr.vmem [resolvable:$true] %s34_s28 }
   0x6   :  { %s6995_s10 = smov 24   ;;  %s6996_s11 = smov [#allocation8]  }
   0x7   :  { %40 = dma.hbm_to_vmem [thread:$0]  %s33_s26, 36864, %s35_s28, [#allocation6], %s6994_s9, %s6994_s9, %s6995_s10  }
   0x8   :  { %s58_s12 = sshll.u32 %s6996_s11, 4  ;;  %s6997_s13 = smov 256   ;;  %s59_s12 = int_to_ptr.vmem [resolvable:$true] %s58_s12 }
   0x9   :  { %s6998_s14 = smov 16   ;;  %s80_s16 = sshll.u32 %s7249_s5, 4  ;;  %s81_s16 = int_to_ptr.hbm [resolvable:$true] %s80_s16 }
   0xa   :  { %64 = dma.hbm_to_vmem [thread:$0]  %s57_s8, 24576, %s59_s12, [#allocation9], %s6997_s13, %s6997_s13, %s6998_s14  }
   0xb   :  { %s6999_s17 = smov [#allocation11]   ;;  %s22_s20 = sshll.u32 %s7244_s0, 4  ;;  %s23_s20 = int_to_ptr.hbm [resolvable:$true] %s22_s20 }
   0xc   :  { %s82_s18 = sshll.u32 %s6999_s17, 4  ;;  %s7000_s21 = smov 64   ;;  %s83_s18 = int_to_ptr.vmem [resolvable:$true] %s82_s18 }
   0xd   :  { %s7001_s22 = smov 4   ;;  %s7002_s23 = smov [#allocation2]  }
   0xe   :  { %88 = dma.hbm_to_vmem [thread:$0]  %s81_s16, 4096, %s83_s18, [#allocation12], %s7000_s21, %s7000_s21, %s7001_s22  }
   0xf   :  { %s24_s24 = sshll.u32 %s7002_s23, 4  ;;  %s46_s27 = sshll.u32 %s7246_s2, 4  ;;  %s25_s24 = int_to_ptr.vmem [resolvable:$true] %s24_s24  ;;  %s47_s27 = int_to_ptr.hbm [resolvable:$true] %s46_s27 }
  0x10   :  { %27 = dma.hbm_to_vmem [thread:$0]  %s23_s20, 768, %s25_s24, [#allocation3]  }
  0x11   :  { %s70_s29 = sshll.u32 %s7248_s4, 4  ;;  %s7003_s30 = smov [#allocation7]   ;;  %s71_s29 = int_to_ptr.hbm [resolvable:$true] %s70_s29 }
  0x12   :  { %s48_s8 = sshll.u32 %s7003_s30, 4  ;;  %s7004_s0 = smov [#allocation10]   ;;  %s49_s8 = int_to_ptr.vmem [resolvable:$true] %s48_s8 }
  0x13   :  { %51 = dma.hbm_to_vmem [thread:$0]  %s47_s27, 96, %s49_s8, [#allocation6]  }
  0x14   :  { %s72_s9 = sshll.u32 %s7004_s0, 4  ;;  %s94_s12 = sshll.u32 %s7250_s6, 4  ;;  %s73_s9 = int_to_ptr.vmem [resolvable:$true] %s72_s9  ;;  %s95_s12 = int_to_ptr.hbm [resolvable:$true] %s94_s12 }
  0x15   :  { %75 = dma.hbm_to_vmem [thread:$0]  %s71_s29, 64, %s73_s9, [#allocation9]  }
  0x16   :  { %s7005_s2 = smov [#allocation13]  }
  0x17   :  { %s96_s13 = sshll.u32 %s7005_s2, 4  ;;  %s97_s13 = int_to_ptr.vmem [resolvable:$true] %s96_s13 }
  0x18   :  { %99 = dma.hbm_to_vmem [thread:$0]  %s95_s12, 16, %s97_s13, [#allocation12]  }
  0x19   :  { %6983 = dma.done.wait [#allocation3], 768  }
  0x1a   :  { %6984 = vsyncadd [#allocation3], 4294966528 }
  0x1b   :  { %6985 = dma.done.wait [#allocation6], 36960  }
  0x1c   :  { %6986 = vsyncadd [#allocation6], 4294930336 }
  0x1d   :  { %6987 = dma.done.wait [#allocation9], 24640  }
  0x1e   :  { %6988 = vsyncadd [#allocation9], 4294942656 }
  0x1f   :  { %6989 = dma.done.wait [#allocation12], 4112  }
  0x20   :  { %6990 = vsyncadd [#allocation12], 4294963184  ;;  %v4369_v0 = vld [vmem:[#allocation5 + $0x150] sm:$0xf]  ;;  %v6292_v1 = vld [vmem:[#allocation5 + $0x164] sm:$0xf0] }
  0x21   :  { %v4561_v2 = vld [vmem:[#allocation5 + $0x2d0] sm:$0xf]  ;;  %v4370_v3 = vor.u32 %v6292_v1, %v4369_v0  ;;  %v6340_v4 = vld [vmem:[#allocation5 + $0x2e4] sm:$0xf0]  ;;  %v4345_v11 = vld [vmem:[#allocation5 + $0x120] sm:$0xf] }
  0x22   :  { %v4753_v5 = vld [vmem:[#allocation5 + $0x450] sm:$0xf]  ;;  %v6388_v6 = vld [vmem:[#allocation5 + $0x464] sm:$0xf0]  ;;  %v4562_v7 = vor.u32 %v6340_v4, %v4561_v2  ;;  %v6286_v13 = vld [vmem:[#allocation5 + $0x134] sm:$0xf0] }
  0x23   :  { %v4754_v8 = vor.u32 %v6388_v6, %v4753_v5  ;;  %v4945_v9 = vld [vmem:[#allocation5 + $0x5d0] sm:$0xf]  ;;  %v6436_v10 = vld [vmem:[#allocation5 + $0x5e4] sm:$0xf0]  ;;  %1882 = vmatpush.bf16.msra.mxu0 %v4370_v3  ;;  %v4537_v14 = vld [vmem:[#allocation5 + $0x2a0] sm:$0xf]  ;;  %v4346_v16 = vor.u32 %v6286_v13, %v4345_v11 }
  0x24   :  { %v4946_v12 = vor.u32 %v6436_v10, %v4945_v9  ;;  %v6334_v15 = vld [vmem:[#allocation5 + $0x2b4] sm:$0xf0]  ;;  %1895 = vmatpush.bf16.msra.mxu1 %v4562_v7  ;;  %v4729_v18 = vld [vmem:[#allocation5 + $0x420] sm:$0xf]  ;;  %v4321_v23 = vld [vmem:[#allocation5 + $0xf0] sm:$0xf] }
  0x25   :  { %1908 = vmatpush.bf16.msra.mxu2 %v4754_v8  ;;  %v4538_v17 = vor.u32 %v6334_v15, %v4537_v14  ;;  %v6382_v19 = vld [vmem:[#allocation5 + $0x434] sm:$0xf0]  ;;  %v4921_v20 = vld [vmem:[#allocation5 + $0x5a0] sm:$0xf]  ;;  %v6280_v24 = vld [vmem:[#allocation5 + $0x104] sm:$0xf0] }
  0x26   :  { %1921 = vmatpush.bf16.msra.mxu3 %v4946_v12  ;;  %v4730_v21 = vor.u32 %v6382_v19, %v4729_v18  ;;  %v6430_v22 = vld [vmem:[#allocation5 + $0x5b4] sm:$0xf0]  ;;  %v4513_v26 = vld [vmem:[#allocation5 + $0x270] sm:$0xf]  ;;  %v6328_v27 = vld [vmem:[#allocation5 + $0x284] sm:$0xf0]  ;;  %v4322_v29 = vor.u32 %v6280_v24, %v4321_v23 }
  0x27   :  { %v4922_v25 = vor.u32 %v6430_v22, %v4921_v20  ;;  %v4705_v28 = vld [vmem:[#allocation5 + $0x3f0] sm:$0xf]  ;;  %1883 = vmatpush.bf16.msra.mxu0 %v4346_v16  ;;  %v6376_v30 = vld [vmem:[#allocation5 + $0x404] sm:$0xf0]  ;;  %v4514_v33 = vor.u32 %v6328_v27, %v4513_v26  ;;  %v4297_v35 = vld [vmem:[#allocation5 + $0xc0] sm:$0xf] }
  0x28   :  { %v4897_v31 = vld [vmem:[#allocation5 + $0x570] sm:$0xf]  ;;  %v6424_v32 = vld [vmem:[#allocation5 + $0x584] sm:$0xf0]  ;;  %1896 = vmatpush.bf16.msra.mxu1 %v4538_v17  ;;  %v4706_v34 = vor.u32 %v6376_v30, %v4705_v28  ;;  %v6274_v36 = vld [vmem:[#allocation5 + $0xd4] sm:$0xf0] }
  0x29   :  { %1909 = vmatpush.bf16.msra.mxu2 %v4730_v21  ;;  %v4489_v37 = vld [vmem:[#allocation5 + $0x240] sm:$0xf]  ;;  %v4898_v38 = vor.u32 %v6424_v32, %v4897_v31  ;;  %v6322_v39 = vld [vmem:[#allocation5 + $0x254] sm:$0xf0]  ;;  %v4298_v44 = vor.u32 %v6274_v36, %v4297_v35  ;;  %v4273_v47 = vld [vmem:[#allocation5 + $0x90] sm:$0xf] }
  0x2a   :  { %1922 = vmatpush.bf16.msra.mxu3 %v4922_v25  ;;  %v4681_v40 = vld [vmem:[#allocation5 + $0x3c0] sm:$0xf]  ;;  %v6370_v41 = vld [vmem:[#allocation5 + $0x3d4] sm:$0xf0]  ;;  %v4490_v45 = vor.u32 %v6322_v39, %v4489_v37  ;;  %v6268_v48 = vld [vmem:[#allocation5 + $0xa4] sm:$0xf0] }
  0x2b   :  { %v4873_v42 = vld [vmem:[#allocation5 + $0x540] sm:$0xf]  ;;  %v6418_v43 = vld [vmem:[#allocation5 + $0x554] sm:$0xf0]  ;;  %1884 = vmatpush.bf16.msra.mxu0 %v4322_v29  ;;  %v4682_v46 = vor.u32 %v6370_v41, %v4681_v40  ;;  %v4465_v49 = vld [vmem:[#allocation5 + $0x210] sm:$0xf]  ;;  %v4274_v56 = vor.u32 %v6268_v48, %v4273_v47 }
  0x2c   :  { %1897 = vmatpush.bf16.msra.mxu1 %v4514_v33  ;;  %v4874_v50 = vor.u32 %v6418_v43, %v4873_v42  ;;  %v6316_v51 = vld [vmem:[#allocation5 + $0x224] sm:$0xf0]  ;;  %v4657_v52 = vld [vmem:[#allocation5 + $0x390] sm:$0xf]  ;;  %v4249_v59 = vld [vmem:[#allocation5 + $0x60] sm:$0xf] }
  0x2d   :  { %1910 = vmatpush.bf16.msra.mxu2 %v4706_v34  ;;  %v6364_v53 = vld [vmem:[#allocation5 + $0x3a4] sm:$0xf0]  ;;  %v4849_v54 = vld [vmem:[#allocation5 + $0x510] sm:$0xf]  ;;  %v4466_v57 = vor.u32 %v6316_v51, %v4465_v49  ;;  %v6262_v60 = vld [vmem:[#allocation5 + $0x74] sm:$0xf0] }
  0x2e   :  { %1923 = vmatpush.bf16.msra.mxu3 %v4898_v38  ;;  %v6412_v55 = vld [vmem:[#allocation5 + $0x524] sm:$0xf0]  ;;  %v4658_v58 = vor.u32 %v6364_v53, %v4657_v52  ;;  %v4441_v61 = vld [vmem:[#allocation5 + $0x1e0] sm:$0xf]  ;;  %v6310_v63 = vld [vmem:[#allocation5 + $0x1f4] sm:$0xf0]  ;;  %v4250_v4 = vor.u32 %v6262_v60, %v4249_v59 }
  0x2f   :  { %1885 = vmatpush.bf16.msra.mxu0 %v4298_v44  ;;  %v4850_v62 = vor.u32 %v6412_v55, %v4849_v54  ;;  %v4633_v0 = vld [vmem:[#allocation5 + $0x360] sm:$0xf]  ;;  %v6358_v1 = vld [vmem:[#allocation5 + $0x374] sm:$0xf0]  ;;  %v4442_v5 = vor.u32 %v6310_v63, %v4441_v61  ;;  %v4225_v7 = vld [vmem:[#allocation5 + $0x30] sm:$0xf] }
  0x30   :  { %1898 = vmatpush.bf16.msra.mxu1 %v4490_v45  ;;  %v4825_v2 = vld [vmem:[#allocation5 + $0x4e0] sm:$0xf]  ;;  %v6406_v3 = vld [vmem:[#allocation5 + $0x4f4] sm:$0xf0]  ;;  %v4634_v6 = vor.u32 %v6358_v1, %v4633_v0  ;;  %v6256_v8 = vld [vmem:[#allocation5 + $0x44] sm:$0xf0] }
  0x31   :  { %1911 = vmatpush.bf16.msra.mxu2 %v4682_v46  ;;  %v4417_v9 = vld [vmem:[#allocation5 + $0x1b0] sm:$0xf]  ;;  %v4826_v10 = vor.u32 %v6406_v3, %v4825_v2  ;;  %v6304_v11 = vld [vmem:[#allocation5 + $0x1c4] sm:$0xf0]  ;;  %v4226_v16 = vor.u32 %v6256_v8, %v4225_v7  ;;  %v4201_v17 = vld [vmem:[#allocation5] sm:$0xf] }
  0x32   :  { %1924 = vmatpush.bf16.msra.mxu3 %v4874_v50  ;;  %v4609_v12 = vld [vmem:[#allocation5 + $0x330] sm:$0xf]  ;;  %v6352_v13 = vld [vmem:[#allocation5 + $0x344] sm:$0xf0]  ;;  %v6250_v18 = vld [vmem:[#allocation5 + $0x14] sm:$0xf0]  ;;  %v4418_v19 = vor.u32 %v6304_v11, %v4417_v9 }
  0x33   :  { %1886 = vmatpush.bf16.msra.mxu0 %v4274_v56  ;;  %v4801_v14 = vld [vmem:[#allocation5 + $0x4b0] sm:$0xf]  ;;  %v6400_v15 = vld [vmem:[#allocation5 + $0x4c4] sm:$0xf0]  ;;  %v4610_v20 = vor.u32 %v6352_v13, %v4609_v12  ;;  %v4393_v21 = vld [vmem:[#allocation5 + $0x180] sm:$0xf]  ;;  %v4202_v31 = vor.u32 %v6250_v18, %v4201_v17 }
  0x34   :  { %1899 = vmatpush.bf16.msra.mxu1 %v4466_v57  ;;  %v6298_v22 = vld [vmem:[#allocation5 + $0x194] sm:$0xf0]  ;;  %v4585_v23 = vld [vmem:[#allocation5 + $0x300] sm:$0xf]  ;;  %v4802_v24 = vor.u32 %v6400_v15, %v4801_v14  ;;  %v5137_v28 = vld [vmem:[#allocation5 + $0x750] sm:$0xf] }
  0x35   :  { %1912 = vmatpush.bf16.msra.mxu2 %v4658_v58  ;;  %v6346_v25 = vld [vmem:[#allocation5 + $0x314] sm:$0xf0]  ;;  %v4777_v26 = vld [vmem:[#allocation5 + $0x480] sm:$0xf]  ;;  %v6484_v29 = vld [vmem:[#allocation5 + $0x764] sm:$0xf0]  ;;  %v4394_v35 = vor.u32 %v6298_v22, %v4393_v21 }
  0x36   :  { %1925 = vmatpush.bf16.msra.mxu3 %v4850_v62  ;;  %v6394_v27 = vld [vmem:[#allocation5 + $0x494] sm:$0xf0]  ;;  %v5329_v30 = vld [vmem:[#allocation5 + $0x8d0] sm:$0xf]  ;;  %v6532_v32 = vld [vmem:[#allocation5 + $0x8e4] sm:$0xf0]  ;;  %v4586_v36 = vor.u32 %v6346_v25, %v4585_v23  ;;  %v5138_v40 = vor.u32 %v6484_v29, %v5137_v28 }
  0x37   :  { %1887 = vmatpush.bf16.msra.mxu0 %v4250_v4  ;;  %v6289_v33 = vld [vmem:[#allocation5 + $0x154] sm:$0xf]  ;;  %v4371_v34 = vld [vmem:[#allocation5 + $0x168] sm:$0xf0]  ;;  %v4778_v39 = vor.u32 %v6394_v27, %v4777_v26  ;;  %v5330_v41 = vor.u32 %v6532_v32, %v5329_v30  ;;  %v5113_v43 = vld [vmem:[#allocation5 + $0x720] sm:$0xf] }
  0x38   :  { %1900 = vmatpush.bf16.msra.mxu1 %v4442_v5  ;;  %v6337_v37 = vld [vmem:[#allocation5 + $0x2d4] sm:$0xf]  ;;  %v4563_v38 = vld [vmem:[#allocation5 + $0x2e8] sm:$0xf0]  ;;  %v4374_v42 = vor.u32 %v6289_v33, %v4371_v34  ;;  %v6478_v44 = vld [vmem:[#allocation5 + $0x734] sm:$0xf0] }
  0x39   :  { %1913 = vmatpush.bf16.msra.mxu2 %v4634_v6  ;;  %v5305_v45 = vld [vmem:[#allocation5 + $0x8a0] sm:$0xf]  ;;  %v4566_v46 = vor.u32 %v6337_v37, %v4563_v38  ;;  %v6526_v47 = vld [vmem:[#allocation5 + $0x8b4] sm:$0xf0]  ;;  %v6283_v48 = vld [vmem:[#allocation5 + $0x124] sm:$0xf]  ;;  %v5114_v52 = vor.u32 %v6478_v44, %v5113_v43 }
  0x3a   :  { %1926 = vmatpush.bf16.msra.mxu3 %v4826_v10  ;;  %v4347_v49 = vld [vmem:[#allocation5 + $0x138] sm:$0xf0]  ;;  %v6331_v50 = vld [vmem:[#allocation5 + $0x2a4] sm:$0xf]  ;;  %v5089_v53 = vld [vmem:[#allocation5 + $0x6f0] sm:$0xf]  ;;  %v5306_v54 = vor.u32 %v6526_v47, %v5305_v45 }
  0x3b   :  { %1888 = vmatpush.bf16.msra.mxu0 %v4226_v16  ;;  %v4539_v51 = vld [vmem:[#allocation5 + $0x2b8] sm:$0xf0]  ;;  %v4350_v55 = vor.u32 %v6283_v48, %v4347_v49  ;;  %v6472_v56 = vld [vmem:[#allocation5 + $0x704] sm:$0xf0]  ;;  %v5281_v57 = vld [vmem:[#allocation5 + $0x870] sm:$0xf] }
  0x3c   :  { %1901 = vmatpush.bf16.msra.mxu1 %v4418_v19  ;;  %v6520_v58 = vld [vmem:[#allocation5 + $0x884] sm:$0xf0]  ;;  %v4542_v59 = vor.u32 %v6331_v50, %v4539_v51  ;;  %v6277_v60 = vld [vmem:[#allocation5 + $0xf4] sm:$0xf]  ;;  %v4323_v61 = vld [vmem:[#allocation5 + $0x108] sm:$0xf0]  ;;  %v5090_v0 = vor.u32 %v6472_v56, %v5089_v53 }
  0x3d   :  { %1914 = vmatpush.bf16.msra.mxu2 %v4610_v20  ;;  %v6325_v62 = vld [vmem:[#allocation5 + $0x274] sm:$0xf]  ;;  %v4515_v63 = vld [vmem:[#allocation5 + $0x288] sm:$0xf0]  ;;  %v5282_v1 = vor.u32 %v6520_v58, %v5281_v57  ;;  %v5065_v2 = vld [vmem:[#allocation5 + $0x6c0] sm:$0xf]  ;;  %v4326_v5 = vor.u32 %v6277_v60, %v4323_v61 }
  0x3e   :  { %1927 = vmatpush.bf16.msra.mxu3 %v4802_v24  ;;  %v130_v3 = vld [vmem:[#allocation2 + $0x10] sm:$0xff]  ;;  %v128_v4 = vld [vmem:[#allocation2] sm:$0xff]  ;;  %v6466_v6 = vld [vmem:[#allocation5 + $0x6d4] sm:$0xf0]  ;;  %v4518_v11 = vor.u32 %v6325_v62, %v4515_v63  ;;  %s7006_s4 = smov [#allocation14]   ;;  %s4186_s15 = sshll.u32 %s7251_s7, 4  ;;  %s4187_s15 = int_to_ptr.hbm [resolvable:$true] %s4186_s15 }
  0x3f   :  { %1889 = vmatpush.bf16.msra.mxu0 %v4202_v31  ;;  %v5257_v7 = vld [vmem:[#allocation5 + $0x840] sm:$0xf]  ;;  %v7068_v8 = vpack.c.bf16 %v130_v3, %v130_v3  ;;  %v7070_v9 = vpack.c.bf16 %v128_v4, %v128_v4  ;;  %v131_v10 = vld [vmem:[#allocation2 + $0x18] sm:$0xff]  ;;  %v6514_v12 = vld [vmem:[#allocation5 + $0x854] sm:$0xf0]  ;;  %v5066_v18 = vor.u32 %v6466_v6, %v5065_v2  ;;  %s4184_s6 = sshll.u32 %s7006_s4, 4  ;;  %s4185_s6 = int_to_ptr.vmem [resolvable:$true] %s4184_s6 }
  0x40   :  { %1902 = vmatpush.bf16.msra.mxu1 %v4394_v35  ;;  %v6271_v13 = vld [vmem:[#allocation5 + $0xc4] sm:$0xf]  ;;  %v4299_v14 = vld [vmem:[#allocation5 + $0xd8] sm:$0xf0]  ;;  %v7072_v15 = vpack.c.bf16 %v131_v10, %v131_v10  ;;  %v5258_v20 = vor.u32 %v6514_v12, %v5257_v7  ;;  %v5041_v22 = vld [vmem:[#allocation5 + $0x690] sm:$0xf] }
  0x41   :  { %1915 = vmatpush.bf16.msra.mxu2 %v4586_v36  ;;  %v6319_v16 = vld [vmem:[#allocation5 + $0x244] sm:$0xf]  ;;  %v4491_v17 = vld [vmem:[#allocation5 + $0x258] sm:$0xf0]  ;;  %v4302_v21 = vor.u32 %v6271_v13, %v4299_v14  ;;  %v6460_v23 = vld [vmem:[#allocation5 + $0x6a4] sm:$0xf0] }
  0x42   :  { %1928 = vmatpush.bf16.msra.mxu3 %v4778_v39  ;;  %1890 = vmatmul.bf16.vlgmr.msra.gmra.mxu0 %v7070_v9  ;;  %v129_v19 = vld [vmem:[#allocation2 + $0x8] sm:$0xff]  ;;  %v5233_v24 = vld [vmem:[#allocation5 + $0x810] sm:$0xf]  ;;  %v4494_v26 = vor.u32 %v6319_v16, %v4491_v17  ;;  %v6508_v27 = vld [vmem:[#allocation5 + $0x824] sm:$0xf0]  ;;  %v5042_v32 = vor.u32 %v6460_v23, %v5041_v22 }
  0x43   :  { %1934 = vmatpush.bf16.msrb.mxu0 %v5138_v40  ;;  %v7077_v25 = vpack.c.bf16 %v129_v19, %v129_v19  ;;  %v6265_v28 = vld [vmem:[#allocation5 + $0x94] sm:$0xf]  ;;  %v4275_v29 = vld [vmem:[#allocation5 + $0xa8] sm:$0xf0]  ;;  %v5234_v33 = vor.u32 %v6508_v27, %v5233_v24  ;;  %v5017_v35 = vld [vmem:[#allocation5 + $0x660] sm:$0xf] }
  0x44   :  { %1947 = vmatpush.bf16.msrb.mxu1 %v5330_v41  ;;  %1916 = vmatmul.bf16.vlgmr.msra.gmra.mxu2 %v7068_v8  ;;  %v6313_v30 = vld [vmem:[#allocation5 + $0x214] sm:$0xf]  ;;  %v4467_v31 = vld [vmem:[#allocation5 + $0x228] sm:$0xf0]  ;;  %v4278_v34 = vor.u32 %v6265_v28, %v4275_v29  ;;  %v6454_v36 = vld [vmem:[#allocation5 + $0x674] sm:$0xf0] }
  0x45   :  { %1960 = vmatpush.bf16.msrb.mxu2 %v4374_v42  ;;  %1929 = vmatmul.bf16.vlgmr.msra.gmra.mxu3 %v7072_v15  ;;  %v5209_v37 = vld [vmem:[#allocation5 + $0x7e0] sm:$0xf]  ;;  %v4470_v38 = vor.u32 %v6313_v30, %v4467_v31  ;;  %v6502_v39 = vld [vmem:[#allocation5 + $0x7f4] sm:$0xf0]  ;;  %v6259_v40 = vld [vmem:[#allocation5 + $0x64] sm:$0xf]  ;;  %v5018_v44 = vor.u32 %v6454_v36, %v5017_v35 }
  0x46   :  { %1973 = vmatpush.bf16.msrb.mxu3 %v4566_v46  ;;  %1903 = vmatmul.bf16.vlgmr.msra.gmra.mxu1 %v7077_v25  ;;  %v4251_v41 = vld [vmem:[#allocation5 + $0x78] sm:$0xf0]  ;;  %v6307_v42 = vld [vmem:[#allocation5 + $0x1e4] sm:$0xf]  ;;  %v5210_v45 = vor.u32 %v6502_v39, %v5209_v37  ;;  %v4993_v47 = vld [vmem:[#allocation5 + $0x630] sm:$0xf] }
  0x47   :  { %1935 = vmatpush.bf16.msrb.mxu0 %v5114_v52  ;;  %v4443_v43 = vld [vmem:[#allocation5 + $0x1f8] sm:$0xf0]  ;;  %v4254_v46 = vor.u32 %v6259_v40, %v4251_v41  ;;  %v6448_v48 = vld [vmem:[#allocation5 + $0x644] sm:$0xf0]  ;;  %v5185_v49 = vld [vmem:[#allocation5 + $0x7b0] sm:$0xf] }
  0x48   :  { %1948 = vmatpush.bf16.msrb.mxu1 %v5306_v54  ;;  %v4446_v50 = vor.u32 %v6307_v42, %v4443_v43  ;;  %v6496_v51 = vld [vmem:[#allocation5 + $0x7c4] sm:$0xf0]  ;;  %v6253_v52 = vld [vmem:[#allocation5 + $0x34] sm:$0xf]  ;;  %v4227_v53 = vld [vmem:[#allocation5 + $0x48] sm:$0xf0]  ;;  %v4994_v56 = vor.u32 %v6448_v48, %v4993_v47 }
  0x49   :  { %1961 = vmatpush.bf16.msrb.mxu2 %v4350_v55  ;;  %v6301_v54 = vld [vmem:[#allocation5 + $0x1b4] sm:$0xf]  ;;  %v4419_v55 = vld [vmem:[#allocation5 + $0x1c8] sm:$0xf0]  ;;  %v4969_v57 = vld [vmem:[#allocation5 + $0x600] sm:$0xf]  ;;  %v4230_v60 = vor.u32 %v6253_v52, %v4227_v53 }
  0x4a   :  { %1974 = vmatpush.bf16.msrb.mxu3 %v4542_v59  ;;  %v6442_v58 = vld [vmem:[#allocation5 + $0x614] sm:$0xf0]  ;;  %v5186_v59 = vor.u32 %v6496_v51, %v5185_v49  ;;  %v5161_v61 = vld [vmem:[#allocation5 + $0x780] sm:$0xf]  ;;  %v6247_v63 = vld [vmem:[#allocation5 + $0x4] sm:$0xf] }
  0x4b   :  { %1936 = vmatpush.bf16.msrb.mxu0 %v5090_v0  ;;  %v6490_v62 = vld [vmem:[#allocation5 + $0x794] sm:$0xf0]  ;;  %v4422_v0 = vor.u32 %v6301_v54, %v4419_v55  ;;  %v6295_v2 = vld [vmem:[#allocation5 + $0x184] sm:$0xf]  ;;  %v4395_v3 = vld [vmem:[#allocation5 + $0x198] sm:$0xf0]  ;;  %v4970_v7 = vor.u32 %v6442_v58, %v4969_v57 }
  0x4c   :  { %1949 = vmatpush.bf16.msrb.mxu1 %v5282_v1  ;;  %v4203_v1 = vld [vmem:[#allocation5 + $0x18] sm:$0xf0]  ;;  %v6385_v4 = vld [vmem:[#allocation5 + $0x454] sm:$0xf]  ;;  %v4947_v10 = vld [vmem:[#allocation5 + $0x5e8] sm:$0xf0]  ;;  %v5162_v13 = vor.u32 %v6490_v62, %v5161_v61  ;;  %v4398_v19 = vor.u32 %v6295_v2, %v4395_v3 }
  0x4d   :  { %1962 = vmatpush.bf16.msrb.mxu2 %v4326_v5  ;;  %v4755_v5 = vld [vmem:[#allocation5 + $0x468] sm:$0xf0]  ;;  %v6433_v6 = vld [vmem:[#allocation5 + $0x5d4] sm:$0xf]  ;;  %v4206_v14 = vor.u32 %v6247_v63, %v4203_v1  ;;  %v6379_v24 = vld [vmem:[#allocation5 + $0x424] sm:$0xf] }
  0x4e   :  { %1975 = vmatpush.bf16.msrb.mxu3 %v4518_v11  ;;  %v6481_v11 = vld [vmem:[#allocation5 + $0x754] sm:$0xf]  ;;  %v5139_v12 = vld [vmem:[#allocation5 + $0x768] sm:$0xf0]  ;;  %v4950_v22 = vor.u32 %v6433_v6, %v4947_v10  ;;  %v6427_v27 = vld [vmem:[#allocation5 + $0x5a4] sm:$0xf] }
  0x4f   :  { %1937 = vmatpush.bf16.msrb.mxu0 %v5066_v18  ;;  %v6529_v16 = vld [vmem:[#allocation5 + $0x8d4] sm:$0xf]  ;;  %v5331_v17 = vld [vmem:[#allocation5 + $0x8e8] sm:$0xf0]  ;;  %v5142_v23 = vor.u32 %v6481_v11, %v5139_v12  ;;  %v4923_v29 = vld [vmem:[#allocation5 + $0x5b8] sm:$0xf0] }
  0x50   :  { %1950 = vmatpush.bf16.msrb.mxu1 %v5258_v20  ;;  %v132_v18 = vld [vmem:[#allocation2 + $0x20] sm:$0xff]  ;;  %v4758_v20 = vor.u32 %v6385_v4, %v4755_v5  ;;  %v5334_v28 = vor.u32 %v6529_v16, %v5331_v17  ;;  %v6475_v30 = vld [vmem:[#allocation5 + $0x724] sm:$0xf]  ;;  %v5115_v31 = vld [vmem:[#allocation5 + $0x738] sm:$0xf0]  ;;  %v4926_v37 = vor.u32 %v6427_v27, %v4923_v29 }
  0x51   :  { %1963 = vmatpush.bf16.msrb.mxu2 %v4302_v21  ;;  %v133_v21 = vld [vmem:[#allocation2 + $0x28] sm:$0xff]  ;;  %v6373_v39 = vld [vmem:[#allocation5 + $0x3f4] sm:$0xf]  ;;  %v4707_v40 = vld [vmem:[#allocation5 + $0x408] sm:$0xf0] }
  0x52   :  { %1976 = vmatpush.bf16.msrb.mxu3 %v4494_v26  ;;  %v4731_v26 = vld [vmem:[#allocation5 + $0x438] sm:$0xf0]  ;;  %v7082_v35 = vpack.c.bf16 %v133_v21, %v133_v21  ;;  %v6421_v41 = vld [vmem:[#allocation5 + $0x574] sm:$0xf]  ;;  %v4899_v43 = vld [vmem:[#allocation5 + $0x588] sm:$0xf0]  ;;  %v4710_v48 = vor.u32 %v6373_v39, %v4707_v40 }
  0x53   :  { %1938 = vmatpush.bf16.msrb.mxu0 %v5042_v32  ;;  %v7080_v32 = vpack.c.bf16 %v132_v18, %v132_v18  ;;  %v4734_v36 = vor.u32 %v6379_v24, %v4731_v26  ;;  %v5283_v47 = vld [vmem:[#allocation5 + $0x888] sm:$0xf0]  ;;  %v4902_v49 = vor.u32 %v6421_v41, %v4899_v43  ;;  %v6367_v51 = vld [vmem:[#allocation5 + $0x3c4] sm:$0xf]  ;;  %v4683_v52 = vld [vmem:[#allocation5 + $0x3d8] sm:$0xf0] }
  0x54   :  { %1951 = vmatpush.bf16.msrb.mxu1 %v5234_v33  ;;  %v6523_v33 = vld [vmem:[#allocation5 + $0x8a4] sm:$0xf]  ;;  %v4875_v55 = vld [vmem:[#allocation5 + $0x558] sm:$0xf0]  ;;  %v6361_v63 = vld [vmem:[#allocation5 + $0x394] sm:$0xf] }
  0x55   :  { %1964 = vmatpush.bf16.msrb.mxu2 %v4278_v34  ;;  %v5307_v34 = vld [vmem:[#allocation5 + $0x8b8] sm:$0xf0]  ;;  %v6415_v53 = vld [vmem:[#allocation5 + $0x544] sm:$0xf]  ;;  %v6409_v1 = vld [vmem:[#allocation5 + $0x514] sm:$0xf] }
  0x56   :  { %1977 = vmatpush.bf16.msrb.mxu3 %v4470_v38  ;;  %v5118_v38 = vor.u32 %v6475_v30, %v5115_v31  ;;  %v5310_v42 = vor.u32 %v6523_v33, %v5307_v34  ;;  %v5067_v57 = vld [vmem:[#allocation5 + $0x6d8] sm:$0xf0]  ;;  %v6511_v58 = vld [vmem:[#allocation5 + $0x844] sm:$0xf]  ;;  %v4878_v61 = vor.u32 %v6415_v53, %v4875_v55  ;;  %v4851_v3 = vld [vmem:[#allocation5 + $0x528] sm:$0xf0] }
  0x57   :  { %1939 = vmatpush.bf16.msrb.mxu0 %v5018_v44  ;;  %v6469_v44 = vld [vmem:[#allocation5 + $0x6f4] sm:$0xf]  ;;  %v5043_v5 = vld [vmem:[#allocation5 + $0x6a8] sm:$0xf0]  ;;  %v4854_v11 = vor.u32 %v6409_v1, %v4851_v3  ;;  %v6403_v16 = vld [vmem:[#allocation5 + $0x4e4] sm:$0xf] }
  0x58   :  { %1952 = vmatpush.bf16.msrb.mxu1 %v5210_v45  ;;  %v5091_v45 = vld [vmem:[#allocation5 + $0x708] sm:$0xf0]  ;;  %v6457_v4 = vld [vmem:[#allocation5 + $0x694] sm:$0xf]  ;;  %v4827_v18 = vld [vmem:[#allocation5 + $0x4f8] sm:$0xf0] }
  0x59   :  { %1965 = vmatpush.bf16.msrb.mxu2 %v4254_v46  ;;  %v6517_v46 = vld [vmem:[#allocation5 + $0x874] sm:$0xf]  ;;  %v5046_v12 = vor.u32 %v6457_v4, %v5043_v5  ;;  %v6499_v21 = vld [vmem:[#allocation5 + $0x7e4] sm:$0xf]  ;;  %v4830_v24 = vor.u32 %v6403_v16, %v4827_v18  ;;  %v4803_v31 = vld [vmem:[#allocation5 + $0x4c8] sm:$0xf0] }
  0x5a   :  { %1978 = vmatpush.bf16.msrb.mxu3 %v4446_v50  ;;  %v5094_v50 = vor.u32 %v6469_v44, %v5091_v45  ;;  %v5286_v54 = vor.u32 %v6517_v46, %v5283_v47  ;;  %v6505_v6 = vld [vmem:[#allocation5 + $0x814] sm:$0xf]  ;;  %v4995_v34 = vld [vmem:[#allocation5 + $0x648] sm:$0xf0]  ;;  %v6343_v39 = vld [vmem:[#allocation5 + $0x304] sm:$0xf] }
  0x5b   :  { %1940 = vmatpush.bf16.msrb.mxu0 %v4994_v56  ;;  %v6463_v56 = vld [vmem:[#allocation5 + $0x6c4] sm:$0xf]  ;;  %v6349_v27 = vld [vmem:[#allocation5 + $0x334] sm:$0xf]  ;;  %v4587_v40 = vld [vmem:[#allocation5 + $0x318] sm:$0xf0] }
  0x5c   :  { %1953 = vmatpush.bf16.msrb.mxu1 %v5186_v59  ;;  %v5259_v59 = vld [vmem:[#allocation5 + $0x858] sm:$0xf0]  ;;  %v5070_v62 = vor.u32 %v6463_v56, %v5067_v57  ;;  %v6397_v29 = vld [vmem:[#allocation5 + $0x4b4] sm:$0xf]  ;;  %v6391_v43 = vld [vmem:[#allocation5 + $0x484] sm:$0xf]  ;;  %v4590_v53 = vor.u32 %v6343_v39, %v4587_v40 }
  0x5d   :  { %1966 = vmatpush.bf16.msrb.mxu2 %v4230_v60  ;;  %v4686_v60 = vor.u32 %v6367_v51, %v4683_v52  ;;  %v5262_v2 = vor.u32 %v6511_v58, %v5259_v59  ;;  %v6445_v33 = vld [vmem:[#allocation5 + $0x634] sm:$0xf]  ;;  %v4806_v41 = vor.u32 %v6397_v29, %v4803_v31  ;;  %v4779_v44 = vld [vmem:[#allocation5 + $0x498] sm:$0xf0]  ;;  %v6439_v45 = vld [vmem:[#allocation5 + $0x604] sm:$0xf] }
  0x5e   :  { %1979 = vmatpush.bf16.msrb.mxu3 %v4422_v0  ;;  %v4659_v0 = vld [vmem:[#allocation5 + $0x3a8] sm:$0xf0]  ;;  %v4971_v47 = vld [vmem:[#allocation5 + $0x618] sm:$0xf0]  ;;  %v6293_v51 = vld [vmem:[#allocation5 + $0x16c] sm:$0xf0]  ;;  %v4782_v57 = vor.u32 %v6391_v43, %v4779_v44 }
  0x5f   :  { %1941 = vmatpush.bf16.msrb.mxu0 %v4970_v7  ;;  %v5235_v7 = vld [vmem:[#allocation5 + $0x828] sm:$0xf0]  ;;  %v4662_v10 = vor.u32 %v6361_v63, %v4659_v0  ;;  %v4569_v52 = vld [vmem:[#allocation5 + $0x2d8] sm:$0xf]  ;;  %v6389_v56 = vld [vmem:[#allocation5 + $0x46c] sm:$0xf0]  ;;  %v4974_v58 = vor.u32 %v6439_v45, %v4971_v47 }
  0x60   :  { %1954 = vmatpush.bf16.msrb.mxu1 %v5162_v13  ;;  %v6355_v13 = vld [vmem:[#allocation5 + $0x364] sm:$0xf]  ;;  %v5238_v17 = vor.u32 %v6505_v6, %v5235_v7  ;;  %v4761_v55 = vld [vmem:[#allocation5 + $0x458] sm:$0xf]  ;;  %v4353_v1 = vld [vmem:[#allocation5 + $0x128] sm:$0xf] }
  0x61   :  { %1967 = vmatpush.bf16.msrb.mxu2 %v4206_v14  ;;  %v4635_v14 = vld [vmem:[#allocation5 + $0x378] sm:$0xf0]  ;;  %v4953_v59 = vld [vmem:[#allocation5 + $0x5d8] sm:$0xf]  ;;  %v4762_v0 = vor.u32 %v6389_v56, %v4761_v55  ;;  %v4545_v3 = vld [vmem:[#allocation5 + $0x2a8] sm:$0xf] }
  0x62   :  { %1980 = vmatpush.bf16.msrb.mxu3 %v4398_v19  ;;  %1942 = vmatmul.bf16.vlgmr.msrb.gmra.mxu0 %v7080_v32  ;;  %v6451_v19 = vld [vmem:[#allocation5 + $0x664] sm:$0xf]  ;;  %v6335_v5 = vld [vmem:[#allocation5 + $0x2bc] sm:$0xf0]  ;;  %v4737_v6 = vld [vmem:[#allocation5 + $0x428] sm:$0xf] }
  0x63   :  { %1986 = vmatpush.bf16.msra.mxu0 %v4758_v20  ;;  %1955 = vmatmul.bf16.vlgmr.msrb.gmra.mxu1 %v7082_v35  ;;  %v5019_v20 = vld [vmem:[#allocation5 + $0x678] sm:$0xf0]  ;;  %v6383_v7 = vld [vmem:[#allocation5 + $0x43c] sm:$0xf0]  ;;  %v4329_v16 = vld [vmem:[#allocation5 + $0xf8] sm:$0xf] }
  0x64   :  { %1999 = vmatpush.bf16.msra.mxu1 %v4950_v22  ;;  %1968 = vmatmul.bf16.vlgmr.msrb.gmra.mxu2 %v7070_v9  ;;  %v5211_v22 = vld [vmem:[#allocation5 + $0x7f8] sm:$0xf0]  ;;  %v5022_v26 = vor.u32 %v6451_v19, %v5019_v20  ;;  %v4521_v18 = vld [vmem:[#allocation5 + $0x278] sm:$0xf]  ;;  %v6329_v20 = vld [vmem:[#allocation5 + $0x28c] sm:$0xf0] }
  0x65   :  { %2012 = vmatpush.bf16.msra.mxu2 %v5142_v23  ;;  %1981 = vmatmul.bf16.vlgmr.msrb.gmra.mxu3 %v7077_v25  ;;  %v4638_v23 = vor.u32 %v6355_v13, %v4635_v14  ;;  %v5214_v30 = vor.u32 %v6499_v21, %v5211_v22  ;;  %v4546_v13 = vor.u32 %v6335_v5, %v4545_v3  ;;  %v4713_v21 = vld [vmem:[#allocation5 + $0x3f8] sm:$0xf]  ;;  %v6377_v22 = vld [vmem:[#allocation5 + $0x40c] sm:$0xf0]  ;;  %v4305_v29 = vld [vmem:[#allocation5 + $0xc8] sm:$0xf] }
  0x66   :  { %2025 = vmatpush.bf16.msra.mxu3 %v5334_v28  ;;  %v4611_v28 = vld [vmem:[#allocation5 + $0x348] sm:$0xf0]  ;;  %v4738_v14 = vor.u32 %v6383_v7, %v4737_v6  ;;  %v4497_v31 = vld [vmem:[#allocation5 + $0x248] sm:$0xf]  ;;  %v6419_v39 = vld [vmem:[#allocation5 + $0x55c] sm:$0xf0] }
  0x67   :  { %1987 = vmatpush.bf16.msra.mxu0 %v4734_v36  ;;  %v6493_v36 = vld [vmem:[#allocation5 + $0x7b4] sm:$0xf]  ;;  %v4281_v43 = vld [vmem:[#allocation5 + $0x98] sm:$0xf]  ;;  %v6269_v44 = vld [vmem:[#allocation5 + $0xac] sm:$0xf0] }
  0x68   :  { %2000 = vmatpush.bf16.msra.mxu1 %v4926_v37  ;;  %v5187_v37 = vld [vmem:[#allocation5 + $0x7c8] sm:$0xf0]  ;;  %v4473_v45 = vld [vmem:[#allocation5 + $0x218] sm:$0xf]  ;;  %v6317_v47 = vld [vmem:[#allocation5 + $0x22c] sm:$0xf0] }
  0x69   :  { %2013 = vmatpush.bf16.msra.mxu2 %v5118_v38  ;;  %v4614_v38 = vor.u32 %v6349_v27, %v4611_v28  ;;  %v5190_v46 = vor.u32 %v6493_v36, %v5187_v37  ;;  %v4522_v27 = vor.u32 %v6329_v20, %v4521_v18  ;;  %v4714_v28 = vor.u32 %v6377_v22, %v4713_v21  ;;  %v4689_v36 = vld [vmem:[#allocation5 + $0x3c8] sm:$0xf]  ;;  %v6371_v37 = vld [vmem:[#allocation5 + $0x3dc] sm:$0xf0]  ;;  %v4233_v3 = vld [vmem:[#allocation5 + $0x38] sm:$0xf] }
  0x6a   :  { %2026 = vmatpush.bf16.msra.mxu3 %v5310_v42  ;;  %v4998_v42 = vor.u32 %v6445_v33, %v4995_v34  ;;  %v6323_v34 = vld [vmem:[#allocation5 + $0x25c] sm:$0xf0]  ;;  %v4257_v55 = vld [vmem:[#allocation5 + $0x68] sm:$0xf]  ;;  %v4425_v5 = vld [vmem:[#allocation5 + $0x1b8] sm:$0xf] }
  0x6b   :  { %1988 = vmatpush.bf16.msra.mxu0 %v4710_v48  ;;  %v6487_v48 = vld [vmem:[#allocation5 + $0x784] sm:$0xf]  ;;  %v6263_v56 = vld [vmem:[#allocation5 + $0x7c] sm:$0xf0]  ;;  %v6305_v7 = vld [vmem:[#allocation5 + $0x1cc] sm:$0xf0] }
  0x6c   :  { %2001 = vmatpush.bf16.msra.mxu1 %v4902_v49  ;;  %v5163_v49 = vld [vmem:[#allocation5 + $0x798] sm:$0xf0]  ;;  %v4426_v18 = vor.u32 %v6305_v7, %v4425_v5  ;;  %v4401_v20 = vld [vmem:[#allocation5 + $0x188] sm:$0xf]  ;;  %v6299_v21 = vld [vmem:[#allocation5 + $0x19c] sm:$0xf0] }
  0x6d   :  { %2014 = vmatpush.bf16.msra.mxu2 %v5094_v50  ;;  %v4377_v50 = vld [vmem:[#allocation5 + $0x158] sm:$0xf]  ;;  %v4593_v22 = vld [vmem:[#allocation5 + $0x308] sm:$0xf] }
  0x6e   :  { %2027 = vmatpush.bf16.msra.mxu3 %v5286_v54  ;;  %v6341_v54 = vld [vmem:[#allocation5 + $0x2ec] sm:$0xf0]  ;;  %v5073_v5 = vld [vmem:[#allocation5 + $0x6c8] sm:$0xf] }
  0x6f   :  { %1989 = vmatpush.bf16.msra.mxu0 %v4686_v60  ;;  %v6437_v60 = vld [vmem:[#allocation5 + $0x5ec] sm:$0xf0]  ;;  %v4570_v63 = vor.u32 %v6341_v54, %v4569_v52  ;;  %v4282_v52 = vor.u32 %v6269_v44, %v4281_v43  ;;  %v5265_v7 = vld [vmem:[#allocation5 + $0x848] sm:$0xf] }
  0x70   :  { %2002 = vmatpush.bf16.msra.mxu1 %v4878_v61  ;;  %v5166_v61 = vor.u32 %v6487_v48, %v5163_v49  ;;  %v4954_v4 = vor.u32 %v6437_v60, %v4953_v59  ;;  %v4665_v48 = vld [vmem:[#allocation5 + $0x398] sm:$0xf]  ;;  %v6365_v49 = vld [vmem:[#allocation5 + $0x3ac] sm:$0xf0]  ;;  %v6311_v59 = vld [vmem:[#allocation5 + $0x1fc] sm:$0xf0] }
  0x71   :  { %2015 = vmatpush.bf16.msra.mxu2 %v5070_v62  ;;  %v4378_v62 = vor.u32 %v6293_v51, %v4377_v50  ;;  %v4857_v50 = vld [vmem:[#allocation5 + $0x518] sm:$0xf]  ;;  %v6413_v51 = vld [vmem:[#allocation5 + $0x52c] sm:$0xf0]  ;;  %v4666_v54 = vor.u32 %v6365_v49, %v4665_v48  ;;  %v4641_v60 = vld [vmem:[#allocation5 + $0x368] sm:$0xf] }
  0x72   :  { %2028 = vmatpush.bf16.msra.mxu3 %v5262_v2  ;;  %v6287_v2 = vld [vmem:[#allocation5 + $0x13c] sm:$0xf0] }
  0x73   :  { %1990 = vmatpush.bf16.msra.mxu0 %v4662_v10  ;;  %v4929_v10 = vld [vmem:[#allocation5 + $0x5a8] sm:$0xf]  ;;  %v6527_v49 = vld [vmem:[#allocation5 + $0x8bc] sm:$0xf0] }
  0x74   :  { %2003 = vmatpush.bf16.msra.mxu1 %v4854_v11  ;;  %v6431_v11 = vld [vmem:[#allocation5 + $0x5bc] sm:$0xf0] }
  0x75   :  { %2016 = vmatpush.bf16.msra.mxu2 %v5046_v12  ;;  %v4354_v12 = vor.u32 %v6287_v2, %v4353_v1  ;;  %v4930_v19 = vor.u32 %v6431_v11, %v4929_v10  ;;  %v4617_v10 = vld [vmem:[#allocation5 + $0x338] sm:$0xf]  ;;  %v6353_v11 = vld [vmem:[#allocation5 + $0x34c] sm:$0xf0] }
  0x76   :  { %2029 = vmatpush.bf16.msra.mxu3 %v5238_v17  ;;  %v6281_v17 = vld [vmem:[#allocation5 + $0x10c] sm:$0xf0] }
  0x77   :  { %1991 = vmatpush.bf16.msra.mxu0 %v4638_v23  ;;  %v4905_v23 = vld [vmem:[#allocation5 + $0x578] sm:$0xf] }
  0x78   :  { %2004 = vmatpush.bf16.msra.mxu1 %v4830_v24  ;;  %v6425_v24 = vld [vmem:[#allocation5 + $0x58c] sm:$0xf0] }
  0x79   :  { %2017 = vmatpush.bf16.msra.mxu2 %v5022_v26  ;;  %v4330_v26 = vor.u32 %v6281_v17, %v4329_v16  ;;  %v4906_v33 = vor.u32 %v6425_v24, %v4905_v23  ;;  %v4209_v16 = vld [vmem:[#allocation5 + $0x8] sm:$0xf]  ;;  %v6251_v17 = vld [vmem:[#allocation5 + $0x1c] sm:$0xf0] }
  0x7a   :  { %2030 = vmatpush.bf16.msra.mxu3 %v5214_v30  ;;  %v6275_v30 = vld [vmem:[#allocation5 + $0xdc] sm:$0xf0] }
  0x7b   :  { %1992 = vmatpush.bf16.msra.mxu0 %v4614_v38  ;;  %v4881_v38 = vld [vmem:[#allocation5 + $0x548] sm:$0xf]  ;;  %v4306_v40 = vor.u32 %v6275_v30, %v4305_v29  ;;  %v6347_v24 = vld [vmem:[#allocation5 + $0x31c] sm:$0xf0]  ;;  %v6485_v29 = vld [vmem:[#allocation5 + $0x76c] sm:$0xf0] }
  0x7c   :  { %2005 = vmatpush.bf16.msra.mxu1 %v4806_v41  ;;  %v4498_v41 = vor.u32 %v6323_v34, %v4497_v31  ;;  %v5337_v30 = vld [vmem:[#allocation5 + $0x8d8] sm:$0xf]  ;;  %v4210_v31 = vor.u32 %v6251_v17, %v4209_v16  ;;  %v6290_v34 = vld [vmem:[#allocation5 + $0x15c] sm:$0xf]  ;;  %v4499_v16 = vld [vmem:[#allocation5 + $0x260] sm:$0xf0] }
  0x7d   :  { %2018 = vmatpush.bf16.msra.mxu2 %v4998_v42  ;;  %v4690_v42 = vor.u32 %v6371_v37, %v4689_v36  ;;  %v4379_v36 = vld [vmem:[#allocation5 + $0x170] sm:$0xf0]  ;;  %v4402_v37 = vor.u32 %v6299_v21, %v4401_v20  ;;  %v5049_v20 = vld [vmem:[#allocation5 + $0x698] sm:$0xf]  ;;  %v6461_v21 = vld [vmem:[#allocation5 + $0x6ac] sm:$0xf0] }
  0x7e   :  { %2031 = vmatpush.bf16.msra.mxu3 %v5190_v46  ;;  %v4882_v46 = vor.u32 %v6419_v39, %v4881_v38  ;;  %v4594_v38 = vor.u32 %v6347_v24, %v4593_v22  ;;  %v6338_v39 = vld [vmem:[#allocation5 + $0x2dc] sm:$0xf]  ;;  %v4382_v44 = vor.u32 %v6290_v34, %v4379_v36  ;;  %v5241_v22 = vld [vmem:[#allocation5 + $0x818] sm:$0xf]  ;;  %v6509_v24 = vld [vmem:[#allocation5 + $0x82c] sm:$0xf0] }
  0x7f   :  { %1993 = vmatpush.bf16.msra.mxu0 %v4590_v53  ;;  %v4474_v53 = vor.u32 %v6317_v47, %v4473_v45  ;;  %v5121_v45 = vld [vmem:[#allocation5 + $0x728] sm:$0xf]  ;;  %v6455_v36 = vld [vmem:[#allocation5 + $0x67c] sm:$0xf0] }
  0x80   :  { %2006 = vmatpush.bf16.msra.mxu1 %v4782_v57  ;;  %v4449_v57 = vld [vmem:[#allocation5 + $0x1e8] sm:$0xf] }
  0x81   :  { %2019 = vmatpush.bf16.msra.mxu2 %v4974_v58  ;;  %v4858_v58 = vor.u32 %v6413_v51, %v4857_v50  ;;  %v4450_v1 = vor.u32 %v6311_v59, %v4449_v57  ;;  %v5313_v47 = vld [vmem:[#allocation5 + $0x8a8] sm:$0xf]  ;;  %v6284_v50 = vld [vmem:[#allocation5 + $0x12c] sm:$0xf]  ;;  %v4355_v51 = vld [vmem:[#allocation5 + $0x140] sm:$0xf0] }
  0x82   :  { %2032 = vmatpush.bf16.msra.mxu3 %v5166_v61  ;;  %1994 = vmatmul.bf16.vlgmr.msra.gmra.mxu0 %v7068_v8  ;;  %v6359_v61 = vld [vmem:[#allocation5 + $0x37c] sm:$0xf0]  ;;  %v5097_v57 = vld [vmem:[#allocation5 + $0x6f8] sm:$0xf]  ;;  %v5025_v34 = vld [vmem:[#allocation5 + $0x668] sm:$0xf] }
  0x83   :  { %2038 = vmatpush.bf16.msrb.mxu0 %v4378_v62  ;;  %2007 = vmatmul.bf16.vlgmr.msra.gmra.mxu1 %v7072_v15  ;;  %v4833_v62 = vld [vmem:[#allocation5 + $0x4e8] sm:$0xf]  ;;  %v4642_v2 = vor.u32 %v6359_v61, %v4641_v60  ;;  %v5289_v59 = vld [vmem:[#allocation5 + $0x878] sm:$0xf]  ;;  %v6521_v61 = vld [vmem:[#allocation5 + $0x88c] sm:$0xf0] }
  0x84   :  { %2051 = vmatpush.bf16.msrb.mxu1 %v4570_v63  ;;  %2020 = vmatmul.bf16.vlgmr.msra.gmra.mxu2 %v7080_v32  ;;  %v6407_v63 = vld [vmem:[#allocation5 + $0x4fc] sm:$0xf0] }
  0x85   :  { %2064 = vmatpush.bf16.msrb.mxu2 %v4762_v0  ;;  %2033 = vmatmul.bf16.vlgmr.msra.gmra.mxu3 %v7082_v35  ;;  %v4258_v0 = vor.u32 %v6263_v56, %v4257_v55  ;;  %v4834_v6 = vor.u32 %v6407_v63, %v4833_v62  ;;  %v5314_v55 = vor.u32 %v6527_v49, %v5313_v47  ;;  %v6278_v62 = vld [vmem:[#allocation5 + $0xfc] sm:$0xf]  ;;  %v4331_v63 = vld [vmem:[#allocation5 + $0x110] sm:$0xf0]  ;;  %v5001_v47 = vld [vmem:[#allocation5 + $0x638] sm:$0xf] }
  0x86   :  { %2077 = vmatpush.bf16.msrb.mxu3 %v4954_v4  ;;  %v6257_v4 = vld [vmem:[#allocation5 + $0x4c] sm:$0xf0]  ;;  %v4358_v56 = vor.u32 %v6284_v50, %v4355_v51  ;;  %v5193_v49 = vld [vmem:[#allocation5 + $0x7b8] sm:$0xf] }
  0x87   :  { %2039 = vmatpush.bf16.msrb.mxu0 %v4354_v12  ;;  %v4809_v12 = vld [vmem:[#allocation5 + $0x4b8] sm:$0xf]  ;;  %v6497_v51 = vld [vmem:[#allocation5 + $0x7cc] sm:$0xf0] }
  0x88   :  { %2052 = vmatpush.bf16.msrb.mxu1 %v4546_v13  ;;  %v6401_v13 = vld [vmem:[#allocation5 + $0x4cc] sm:$0xf0] }
  0x89   :  { %2065 = vmatpush.bf16.msrb.mxu2 %v4738_v14  ;;  %v4234_v14 = vor.u32 %v6257_v4, %v4233_v3  ;;  %v4810_v23 = vor.u32 %v6401_v13, %v4809_v12  ;;  %v5290_v3 = vor.u32 %v6521_v61, %v5289_v59  ;;  %v4334_v4 = vor.u32 %v6278_v62, %v4331_v63  ;;  %v6272_v12 = vld [vmem:[#allocation5 + $0xcc] sm:$0xf]  ;;  %v4307_v13 = vld [vmem:[#allocation5 + $0xe0] sm:$0xf0]  ;;  %v5169_v61 = vld [vmem:[#allocation5 + $0x788] sm:$0xf] }
  0x8a   :  { %2078 = vmatpush.bf16.msrb.mxu3 %v4930_v19  ;;  %v4618_v19 = vor.u32 %v6353_v11, %v4617_v10  ;;  %v6515_v11 = vld [vmem:[#allocation5 + $0x85c] sm:$0xf0]  ;;  %v5194_v59 = vor.u32 %v6497_v51, %v5193_v49  ;;  %v6248_v63 = vld [vmem:[#allocation5 + $0xc] sm:$0xf] }
  0x8b   :  { %2040 = vmatpush.bf16.msrb.mxu0 %v4330_v26  ;;  %v4785_v26 = vld [vmem:[#allocation5 + $0x488] sm:$0xf]  ;;  %v6491_v62 = vld [vmem:[#allocation5 + $0x79c] sm:$0xf0]  ;;  %v6416_v51 = vld [vmem:[#allocation5 + $0x54c] sm:$0xf] }
  0x8c   :  { %2053 = vmatpush.bf16.msrb.mxu1 %v4522_v27  ;;  %v6395_v27 = vld [vmem:[#allocation5 + $0x49c] sm:$0xf0] }
  0x8d   :  { %2066 = vmatpush.bf16.msrb.mxu2 %v4714_v28  ;;  %v5145_v28 = vld [vmem:[#allocation5 + $0x758] sm:$0xf] }
  0x8e   :  { %2079 = vmatpush.bf16.msrb.mxu3 %v4906_v33  ;;  %v6533_v33 = vld [vmem:[#allocation5 + $0x8ec] sm:$0xf0] }
  0x8f   :  { %2041 = vmatpush.bf16.msrb.mxu0 %v4306_v40  ;;  %v4571_v40 = vld [vmem:[#allocation5 + $0x2f0] sm:$0xf0]  ;;  %v5338_v43 = vor.u32 %v6533_v33, %v5337_v30  ;;  %v5050_v30 = vor.u32 %v6461_v21, %v5049_v20 }
  0x90   :  { %2054 = vmatpush.bf16.msrb.mxu1 %v4498_v41  ;;  %v4786_v41 = vor.u32 %v6395_v27, %v4785_v26  ;;  %v4574_v48 = vor.u32 %v6338_v39, %v4571_v40  ;;  %v6266_v26 = vld [vmem:[#allocation5 + $0x9c] sm:$0xf]  ;;  %v4283_v27 = vld [vmem:[#allocation5 + $0xb0] sm:$0xf0]  ;;  %v6503_v39 = vld [vmem:[#allocation5 + $0x7fc] sm:$0xf0] }
  0x91   :  { %2067 = vmatpush.bf16.msrb.mxu2 %v4690_v42  ;;  %v5146_v42 = vor.u32 %v6485_v29, %v5145_v28  ;;  %v6314_v28 = vld [vmem:[#allocation5 + $0x21c] sm:$0xf]  ;;  %v4475_v29 = vld [vmem:[#allocation5 + $0x230] sm:$0xf0]  ;;  %v4286_v33 = vor.u32 %v6266_v26, %v4283_v27  ;;  %v6260_v40 = vld [vmem:[#allocation5 + $0x6c] sm:$0xf] }
  0x92   :  { %2080 = vmatpush.bf16.msrb.mxu3 %v4882_v46  ;;  %v6479_v46 = vld [vmem:[#allocation5 + $0x73c] sm:$0xf0]  ;;  %v4931_v27 = vld [vmem:[#allocation5 + $0x5c0] sm:$0xf0] }
  0x93   :  { %2042 = vmatpush.bf16.msrb.mxu0 %v4282_v52  ;;  %v6332_v52 = vld [vmem:[#allocation5 + $0x2ac] sm:$0xf] }
  0x94   :  { %2055 = vmatpush.bf16.msrb.mxu1 %v4474_v53  ;;  %v4547_v53 = vld [vmem:[#allocation5 + $0x2c0] sm:$0xf0] }
  0x95   :  { %2068 = vmatpush.bf16.msrb.mxu2 %v4666_v54  ;;  %v5122_v54 = vor.u32 %v6479_v46, %v5121_v45  ;;  %v4550_v60 = vor.u32 %v6332_v52, %v4547_v53  ;;  %v6254_v52 = vld [vmem:[#allocation5 + $0x3c] sm:$0xf]  ;;  %v4235_v53 = vld [vmem:[#allocation5 + $0x50] sm:$0xf0] }
  0x96   :  { %2081 = vmatpush.bf16.msrb.mxu3 %v4858_v58  ;;  %v6473_v58 = vld [vmem:[#allocation5 + $0x70c] sm:$0xf0] }
  0x97   :  { %2043 = vmatpush.bf16.msrb.mxu0 %v4258_v0  ;;  %v6326_v0 = vld [vmem:[#allocation5 + $0x27c] sm:$0xf] }
  0x98   :  { %2056 = vmatpush.bf16.msrb.mxu1 %v4450_v1  ;;  %v4523_v1 = vld [vmem:[#allocation5 + $0x290] sm:$0xf0] }
  0x99   :  { %2069 = vmatpush.bf16.msrb.mxu2 %v4642_v2  ;;  %v5098_v2 = vor.u32 %v6473_v58, %v5097_v57  ;;  %v4526_v10 = vor.u32 %v6326_v0, %v4523_v1  ;;  %v4977_v57 = vld [vmem:[#allocation5 + $0x608] sm:$0xf]  ;;  %v6443_v58 = vld [vmem:[#allocation5 + $0x61c] sm:$0xf0]  ;;  %v4211_v1 = vld [vmem:[#allocation5 + $0x20] sm:$0xf0] }
  0x9a   :  { %2082 = vmatpush.bf16.msrb.mxu3 %v4834_v6  ;;  %v6467_v6 = vld [vmem:[#allocation5 + $0x6dc] sm:$0xf0] }
  0x9b   :  { %2044 = vmatpush.bf16.msrb.mxu0 %v4234_v14  ;;  %v6320_v14 = vld [vmem:[#allocation5 + $0x24c] sm:$0xf]  ;;  %v5074_v17 = vor.u32 %v6467_v6, %v5073_v5  ;;  %v4763_v5 = vld [vmem:[#allocation5 + $0x470] sm:$0xf0]  ;;  %v6434_v6 = vld [vmem:[#allocation5 + $0x5dc] sm:$0xf] }
  0x9c   :  { %2057 = vmatpush.bf16.msrb.mxu1 %v4426_v18  ;;  %v5266_v18 = vor.u32 %v6515_v11, %v5265_v7  ;;  %v4978_v7 = vor.u32 %v6443_v58, %v4977_v57  ;;  %v6482_v11 = vld [vmem:[#allocation5 + $0x75c] sm:$0xf]  ;;  %v6512_v57 = vld [vmem:[#allocation5 + $0x84c] sm:$0xf]  ;;  %v5267_v58 = vld [vmem:[#allocation5 + $0x860] sm:$0xf0] }
  0x9d   :  { %2070 = vmatpush.bf16.msrb.mxu2 %v4618_v19  ;;  %v4310_v19 = vor.u32 %v6272_v12, %v4307_v13  ;;  %v5147_v12 = vld [vmem:[#allocation5 + $0x770] sm:$0xf0]  ;;  %v5170_v13 = vor.u32 %v6491_v62, %v5169_v61 }
  0x9e   :  { %2083 = vmatpush.bf16.msrb.mxu3 %v4810_v23  ;;  %v4502_v23 = vor.u32 %v6320_v14, %v4499_v16  ;;  %v4214_v14 = vor.u32 %v6248_v63, %v4211_v1  ;;  %v6530_v16 = vld [vmem:[#allocation5 + $0x8dc] sm:$0xf]  ;;  %v5150_v21 = vor.u32 %v6482_v11, %v5147_v12  ;;  %v4667_v63 = vld [vmem:[#allocation5 + $0x3b0] sm:$0xf0] }
  0x9f   :  { %2045 = vmatpush.bf16.msrb.mxu0 %v4210_v31  ;;  %v5242_v31 = vor.u32 %v6509_v24, %v5241_v22  ;;  %v6380_v22 = vld [vmem:[#allocation5 + $0x42c] sm:$0xf] }
  0xa0   :  { %2058 = vmatpush.bf16.msrb.mxu1 %v4402_v37  ;;  %v5217_v37 = vld [vmem:[#allocation5 + $0x7e8] sm:$0xf]  ;;  %v6428_v24 = vld [vmem:[#allocation5 + $0x5ac] sm:$0xf] }
  0xa1   :  { %2071 = vmatpush.bf16.msrb.mxu2 %v4594_v38  ;;  %v4478_v38 = vor.u32 %v6314_v28, %v4475_v29  ;;  %v5218_v45 = vor.u32 %v6503_v39, %v5217_v37  ;;  %v6476_v28 = vld [vmem:[#allocation5 + $0x72c] sm:$0xf]  ;;  %v5123_v29 = vld [vmem:[#allocation5 + $0x740] sm:$0xf0]  ;;  %v6374_v37 = vld [vmem:[#allocation5 + $0x3fc] sm:$0xf] }
  0xa2   :  { %2084 = vmatpush.bf16.msrb.mxu3 %v4786_v41  ;;  %2046 = vmatmul.bf16.vlgmr.msrb.gmra.mxu0 %v7070_v9  ;;  %v4259_v41 = vld [vmem:[#allocation5 + $0x80] sm:$0xf0]  ;;  %v6422_v39 = vld [vmem:[#allocation5 + $0x57c] sm:$0xf] }
  0xa3   :  { %2090 = vmatpush.bf16.msra.mxu0 %v5146_v42  ;;  %2059 = vmatmul.bf16.vlgmr.msrb.gmra.mxu1 %v7077_v25  ;;  %v6308_v42 = vld [vmem:[#allocation5 + $0x1ec] sm:$0xf]  ;;  %v4262_v46 = vor.u32 %v6260_v40, %v4259_v41  ;;  %v4907_v41 = vld [vmem:[#allocation5 + $0x590] sm:$0xf0] }
  0xa4   :  { %2103 = vmatpush.bf16.msra.mxu1 %v5338_v43  ;;  %2072 = vmatmul.bf16.vlgmr.msrb.gmra.mxu2 %v7068_v8  ;;  %v4451_v43 = vld [vmem:[#allocation5 + $0x200] sm:$0xf0] }
  0xa5   :  { %2116 = vmatpush.bf16.msra.mxu2 %v4382_v44  ;;  %2085 = vmatmul.bf16.vlgmr.msrb.gmra.mxu3 %v7072_v15  ;;  %v5026_v44 = vor.u32 %v6455_v36, %v5025_v34  ;;  %v4454_v50 = vor.u32 %v6308_v42, %v4451_v43  ;;  %v4934_v34 = vor.u32 %v6428_v24, %v4931_v27  ;;  %v6470_v42 = vld [vmem:[#allocation5 + $0x6fc] sm:$0xf]  ;;  %v5099_v43 = vld [vmem:[#allocation5 + $0x710] sm:$0xf0]  ;;  %v5219_v24 = vld [vmem:[#allocation5 + $0x800] sm:$0xf0] }
  0xa6   :  { %2129 = vmatpush.bf16.msra.mxu3 %v4574_v48  ;;  %v6449_v48 = vld [vmem:[#allocation5 + $0x64c] sm:$0xf0]  ;;  %v5126_v36 = vor.u32 %v6476_v28, %v5123_v29  ;;  %v5102_v49 = vor.u32 %v6470_v42, %v5099_v43  ;;  %v5195_v42 = vld [vmem:[#allocation5 + $0x7d0] sm:$0xf0] }
  0xa7   :  { %2091 = vmatpush.bf16.msra.mxu0 %v5122_v54  ;;  %v6302_v54 = vld [vmem:[#allocation5 + $0x1bc] sm:$0xf] }
  0xa8   :  { %2104 = vmatpush.bf16.msra.mxu1 %v5314_v55  ;;  %v4427_v55 = vld [vmem:[#allocation5 + $0x1d0] sm:$0xf0] }
  0xa9   :  { %2117 = vmatpush.bf16.msra.mxu2 %v4358_v56  ;;  %v5002_v56 = vor.u32 %v6449_v48, %v5001_v47  ;;  %v4430_v0 = vor.u32 %v6302_v54, %v4427_v55  ;;  %v6368_v47 = vld [vmem:[#allocation5 + $0x3cc] sm:$0xf]  ;;  %v4910_v48 = vor.u32 %v6422_v39, %v4907_v41  ;;  %v5075_v55 = vld [vmem:[#allocation5 + $0x6e0] sm:$0xf0]  ;;  %v5003_v39 = vld [vmem:[#allocation5 + $0x650] sm:$0xf0] }
  0xaa   :  { %2130 = vmatpush.bf16.msra.mxu3 %v4550_v60  ;;  %v4238_v60 = vor.u32 %v6254_v52, %v4235_v53  ;;  %v4883_v52 = vld [vmem:[#allocation5 + $0x560] sm:$0xf0]  ;;  %v6464_v54 = vld [vmem:[#allocation5 + $0x6cc] sm:$0xf]  ;;  %v6494_v41 = vld [vmem:[#allocation5 + $0x7bc] sm:$0xf] }
  0xab   :  { %2092 = vmatpush.bf16.msra.mxu0 %v5098_v2  ;;  %v6296_v2 = vld [vmem:[#allocation5 + $0x18c] sm:$0xf]  ;;  %v4886_v61 = vor.u32 %v6416_v51, %v4883_v52  ;;  %v5078_v62 = vor.u32 %v6464_v54, %v5075_v55  ;;  %v4787_v52 = vld [vmem:[#allocation5 + $0x4a0] sm:$0xf0]  ;;  %v5198_v55 = vor.u32 %v6494_v41, %v5195_v42 }
  0xac   :  { %2105 = vmatpush.bf16.msra.mxu1 %v5290_v3  ;;  %v4403_v3 = vld [vmem:[#allocation5 + $0x1a0] sm:$0xf0]  ;;  %v6392_v51 = vld [vmem:[#allocation5 + $0x48c] sm:$0xf] }
  0xad   :  { %2118 = vmatpush.bf16.msra.mxu2 %v4334_v4  ;;  %v6386_v4 = vld [vmem:[#allocation5 + $0x45c] sm:$0xf] }
  0xae   :  { %2131 = vmatpush.bf16.msra.mxu3 %v4526_v10  ;;  %v4955_v10 = vld [vmem:[#allocation5 + $0x5f0] sm:$0xf0] }
  0xaf   :  { %2093 = vmatpush.bf16.msra.mxu0 %v5074_v17  ;;  %v5339_v17 = vld [vmem:[#allocation5 + $0x8f0] sm:$0xf0]  ;;  %v4958_v20 = vor.u32 %v6434_v6, %v4955_v10  ;;  %v6506_v6 = vld [vmem:[#allocation5 + $0x81c] sm:$0xf] }
  0xb0   :  { %2106 = vmatpush.bf16.msra.mxu1 %v5266_v18  ;;  %v4406_v18 = vor.u32 %v6296_v2, %v4403_v3  ;;  %v5342_v26 = vor.u32 %v6530_v16, %v5339_v17  ;;  %v5270_v2 = vor.u32 %v6512_v57, %v5267_v58  ;;  %v4859_v3 = vld [vmem:[#allocation5 + $0x530] sm:$0xf0]  ;;  %v4643_v16 = vld [vmem:[#allocation5 + $0x380] sm:$0xf0]  ;;  %v6404_v17 = vld [vmem:[#allocation5 + $0x4ec] sm:$0xf] }
  0xb1   :  { %2119 = vmatpush.bf16.msra.mxu2 %v4310_v19  ;;  %v4766_v19 = vor.u32 %v6386_v4, %v4763_v5  ;;  %v6458_v4 = vld [vmem:[#allocation5 + $0x69c] sm:$0xf]  ;;  %v5051_v5 = vld [vmem:[#allocation5 + $0x6b0] sm:$0xf0]  ;;  %v4979_v57 = vld [vmem:[#allocation5 + $0x620] sm:$0xf0] }
  0xb2   :  { %2132 = vmatpush.bf16.msra.mxu3 %v4502_v23  ;;  %v4739_v23 = vld [vmem:[#allocation5 + $0x440] sm:$0xf0]  ;;  %v6488_v58 = vld [vmem:[#allocation5 + $0x78c] sm:$0xf] }
  0xb3   :  { %2094 = vmatpush.bf16.msra.mxu0 %v5050_v30  ;;  %v6524_v30 = vld [vmem:[#allocation5 + $0x8ac] sm:$0xf] }
  0xb4   :  { %2107 = vmatpush.bf16.msra.mxu1 %v5242_v31  ;;  %v5315_v31 = vld [vmem:[#allocation5 + $0x8c0] sm:$0xf0] }
  0xb5   :  { %2120 = vmatpush.bf16.msra.mxu2 %v4286_v33  ;;  %v4742_v33 = vor.u32 %v6380_v22, %v4739_v23  ;;  %v5318_v40 = vor.u32 %v6524_v30, %v5315_v31  ;;  %v5027_v22 = vld [vmem:[#allocation5 + $0x680] sm:$0xf0]  ;;  %v6500_v23 = vld [vmem:[#allocation5 + $0x7ec] sm:$0xf]  ;;  %v6350_v30 = vld [vmem:[#allocation5 + $0x33c] sm:$0xf] }
  0xb6   :  { %2133 = vmatpush.bf16.msra.mxu3 %v4478_v38  ;;  %v4715_v38 = vld [vmem:[#allocation5 + $0x410] sm:$0xf0] }
  0xb7   :  { %2095 = vmatpush.bf16.msra.mxu0 %v5026_v44  ;;  %v6518_v44 = vld [vmem:[#allocation5 + $0x87c] sm:$0xf]  ;;  %v4619_v31 = vld [vmem:[#allocation5 + $0x350] sm:$0xf0] }
  0xb8   :  { %2108 = vmatpush.bf16.msra.mxu1 %v5218_v45  ;;  %v5291_v45 = vld [vmem:[#allocation5 + $0x890] sm:$0xf0] }
  0xb9   :  { %2121 = vmatpush.bf16.msra.mxu2 %v4262_v46  ;;  %v4718_v46 = vor.u32 %v6374_v37, %v4715_v38  ;;  %v5294_v53 = vor.u32 %v6518_v44, %v5291_v45  ;;  %v4811_v37 = vld [vmem:[#allocation5 + $0x4d0] sm:$0xf0]  ;;  %v6446_v38 = vld [vmem:[#allocation5 + $0x63c] sm:$0xf]  ;;  %v4622_v45 = vor.u32 %v6350_v30, %v4619_v31  ;;  %v4337_v30 = vld [vmem:[#allocation5 + $0x100] sm:$0xf] }
  0xba   :  { %2134 = vmatpush.bf16.msra.mxu3 %v4454_v50  ;;  %v4691_v50 = vld [vmem:[#allocation5 + $0x3e0] sm:$0xf0]  ;;  %v6282_v31 = vld [vmem:[#allocation5 + $0x114] sm:$0xf0] }
  0xbb   :  { %2096 = vmatpush.bf16.msra.mxu0 %v5002_v56  ;;  %v7100_v56 = vld [vmem:[#allocation7] sm:$0x3f]  ;;  %v4338_v41 = vor.u32 %v6282_v31, %v4337_v30 }
  0xbc   :  { %2109 = vmatpush.bf16.msra.mxu1 %v5194_v59  ;;  %v4694_v59 = vor.u32 %v6368_v47, %v4691_v50  ;;  %v430_v1 = vperm.slane %v7100_v56, 0  ;;  %v4595_v47 = vld [vmem:[#allocation5 + $0x320] sm:$0xf0]  ;;  %v5006_v50 = vor.u32 %v6446_v38, %v5003_v39  ;;  %v6378_v38 = vld [vmem:[#allocation5 + $0x414] sm:$0xf0] }
  0xbd   :  { %2122 = vmatpush.bf16.msra.mxu2 %v4238_v60  ;;  %v6362_v60 = vld [vmem:[#allocation5 + $0x39c] sm:$0xf]  ;;  %v4913_v39 = vld [vmem:[#allocation5 + $0x580] sm:$0xf] }
  0xbe   :  { %2135 = vmatpush.bf16.msra.mxu3 %v4430_v0  ;;  %v6410_v0 = vld [vmem:[#allocation5 + $0x51c] sm:$0xf]  ;;  %v4670_v10 = vor.u32 %v6362_v60, %v4667_v63  ;;  %v4385_v60 = vld [vmem:[#allocation5 + $0x160] sm:$0xf] }
  0xbf   :  { %2097 = vmatpush.bf16.msra.mxu0 %v4978_v7  ;;  %v5243_v7 = vld [vmem:[#allocation5 + $0x830] sm:$0xf0]  ;;  %v1891_v11 = vpop.f32.mrf.mxu0  ;;  %v4862_v12 = vor.u32 %v6410_v0, %v4859_v3  ;;  %v6342_v0 = vld [vmem:[#allocation5 + $0x2f4] sm:$0xf0]  ;;  %v4241_v31 = vld [vmem:[#allocation5 + $0x40] sm:$0xf] }
  0xc0   :  { %2110 = vmatpush.bf16.msra.mxu1 %v5170_v13  ;;  %v5054_v13 = vor.u32 %v6458_v4, %v5051_v5  ;;  %v4790_v4 = vor.u32 %v6392_v51, %v4787_v52  ;;  %v4889_v51 = vld [vmem:[#allocation5 + $0x550] sm:$0xf]  ;;  %v6420_v52 = vld [vmem:[#allocation5 + $0x564] sm:$0xf0] }
  0xc1   :  { %2123 = vmatpush.bf16.msra.mxu2 %v4214_v14  ;;  %v6356_v14 = vld [vmem:[#allocation5 + $0x36c] sm:$0xf] }
  0xc2   :  { %2136 = vmatpush.bf16.msra.mxu3 %v4406_v18  ;;  %2098 = vmatmul.bf16.vlgmr.msra.gmra.mxu0 %v7080_v32  ;;  %v1892_v18 = vadd.f32 %v1891_v11, %v430_v1  ;;  %v4769_v1 = vld [vmem:[#allocation5 + $0x460] sm:$0xf] }
  0xc3   :  { %2142 = vmatpush.bf16.msrb.mxu0 %v4766_v19  ;;  %2111 = vmatmul.bf16.vlgmr.msra.gmra.mxu1 %v7082_v35  ;;  %v5246_v19 = vor.u32 %v6506_v6, %v5243_v7  ;;  %v1904_v27 = vpop.f32.mrf.mxu1  ;;  %v4961_v6 = vld [vmem:[#allocation5 + $0x5e0] sm:$0xf]  ;;  %v6438_v7 = vld [vmem:[#allocation5 + $0x5f4] sm:$0xf0] }
  0xc4   :  { %2155 = vmatpush.bf16.msrb.mxu1 %v4958_v20  ;;  %2124 = vmatmul.bf16.vlgmr.msra.gmra.mxu2 %v7070_v9  ;;  %v4835_v20 = vld [vmem:[#allocation5 + $0x500] sm:$0xf0] }
  0xc5   :  { %2168 = vmatpush.bf16.msrb.mxu2 %v5150_v21  ;;  %2137 = vmatmul.bf16.vlgmr.msra.gmra.mxu3 %v7077_v25  ;;  %v6452_v21 = vld [vmem:[#allocation5 + $0x66c] sm:$0xf]  ;;  %v4838_v28 = vor.u32 %v6404_v17, %v4835_v20  ;;  %v6288_v17 = vld [vmem:[#allocation5 + $0x144] sm:$0xf0]  ;;  %v4962_v20 = vor.u32 %v6438_v7, %v4961_v6  ;;  %v6414_v6 = vld [vmem:[#allocation5 + $0x534] sm:$0xf0] }
  0xc6   :  { %2181 = vmatpush.bf16.msrb.mxu3 %v5342_v26  ;;  %v4646_v26 = vor.u32 %v6356_v14, %v4643_v16  ;;  %v5030_v29 = vor.u32 %v6452_v21, %v5027_v22  ;;  %v4361_v16 = vld [vmem:[#allocation5 + $0x130] sm:$0xf]  ;;  %v6336_v21 = vld [vmem:[#allocation5 + $0x2c4] sm:$0xf0]  ;;  %v431_v7 = vperm.slane %v7100_v56, 1 }
  0xc7   :  { %2143 = vmatpush.bf16.msrb.mxu0 %v4742_v33  ;;  %v6398_v33 = vld [vmem:[#allocation5 + $0x4bc] sm:$0xf]  ;;  %v4745_v22 = vld [vmem:[#allocation5 + $0x430] sm:$0xf] }
  0xc8   :  { %2156 = vmatpush.bf16.msrb.mxu1 %v4934_v34  ;;  %v1905_v34 = vadd.f32 %v1904_v27, %v1892_v18  ;;  %v1930_v44 = vpop.f32.mrf.mxu3  ;;  %v4553_v18 = vld [vmem:[#allocation5 + $0x2b0] sm:$0xf]  ;;  %v4362_v27 = vor.u32 %v6288_v17, %v4361_v16  ;;  %v6312_v17 = vld [vmem:[#allocation5 + $0x204] sm:$0xf0] }
  0xc9   :  { %2169 = vmatpush.bf16.msrb.mxu2 %v5126_v36  ;;  %v5222_v36 = vor.u32 %v6500_v23, %v5219_v24  ;;  %v6384_v23 = vld [vmem:[#allocation5 + $0x444] sm:$0xf0]  ;;  %v4937_v24 = vld [vmem:[#allocation5 + $0x5b0] sm:$0xf] }
  0xca   :  { %2182 = vmatpush.bf16.msrb.mxu3 %v5318_v40  ;;  %v1917_v40 = vpop.f32.mrf.mxu2 }
  0xcb   :  { %2144 = vmatpush.bf16.msrb.mxu0 %v4718_v46  ;;  %v1918_v43 = vadd.f32 %v1917_v40, %v1905_v34  ;;  %v6344_v46 = vld [vmem:[#allocation5 + $0x30c] sm:$0xf]  ;;  %v1906_v3 = vpop.f32.mrf.mxu1  ;;  %v6426_v40 = vld [vmem:[#allocation5 + $0x594] sm:$0xf0] }
  0xcc   :  { %2157 = vmatpush.bf16.msrb.mxu1 %v4910_v48  ;;  %v1893_v48 = vpop.f32.mrf.mxu0  ;;  %v4598_v63 = vor.u32 %v6344_v46, %v4595_v47  ;;  %v4505_v46 = vld [vmem:[#allocation5 + $0x250] sm:$0xf]  ;;  %v4914_v47 = vor.u32 %v6426_v40, %v4913_v39  ;;  %v6366_v3 = vld [vmem:[#allocation5 + $0x3b4] sm:$0xf0]  ;;  %v4625_v39 = vld [vmem:[#allocation5 + $0x340] sm:$0xf] }
  0xcd   :  { %2170 = vmatpush.bf16.msrb.mxu2 %v5102_v49  ;;  %v4814_v49 = vor.u32 %v6398_v33, %v4811_v37  ;;  %v7103_v54 = vadd.f32 %v1930_v44, %v1918_v43  ;;  %v4529_v33 = vld [vmem:[#allocation5 + $0x280] sm:$0xf]  ;;  %v4313_v44 = vld [vmem:[#allocation5 + $0xd0] sm:$0xf]  ;;  %v6324_v48 = vld [vmem:[#allocation5 + $0x264] sm:$0xf0] }
  0xce   :  { %2183 = vmatpush.bf16.msrb.mxu3 %v5294_v53  ;;  %v6440_v53 = vld [vmem:[#allocation5 + $0x60c] sm:$0xf]  ;;  %v4721_v37 = vld [vmem:[#allocation5 + $0x400] sm:$0xf]  ;;  %v6354_v40 = vld [vmem:[#allocation5 + $0x354] sm:$0xf0] }
  0xcf   :  { %2145 = vmatpush.bf16.msrb.mxu0 %v4694_v59  ;;  %v5171_v59 = vld [vmem:[#allocation5 + $0x7a0] sm:$0xf0]  ;;  %v4982_v5 = vor.u32 %v6440_v53, %v4979_v57  ;;  %v4722_v43 = vor.u32 %v6378_v38, %v4721_v37  ;;  %v6306_v38 = vld [vmem:[#allocation5 + $0x1d4] sm:$0xf0] }
  0xd0   :  { %2158 = vmatpush.bf16.msrb.mxu1 %v4886_v61  ;;  %v6294_v61 = vld [vmem:[#allocation5 + $0x174] sm:$0xf0] }
  0xd1   :  { %2171 = vmatpush.bf16.msrb.mxu2 %v5078_v62  ;;  %v4577_v62 = vld [vmem:[#allocation5 + $0x2e0] sm:$0xf]  ;;  %v4386_v11 = vor.u32 %v6294_v61, %v4385_v60 }
  0xd2   :  { %2184 = vmatpush.bf16.msrb.mxu3 %v5270_v2  ;;  %v6390_v2 = vld [vmem:[#allocation5 + $0x474] sm:$0xf0]  ;;  %v4289_v61 = vld [vmem:[#allocation5 + $0xa0] sm:$0xf] }
  0xd3   :  { %2146 = vmatpush.bf16.msrb.mxu0 %v4670_v10  ;;  %v5174_v10 = vor.u32 %v6488_v58, %v5171_v59  ;;  %v4770_v14 = vor.u32 %v6390_v2, %v4769_v1  ;;  %v4506_v59 = vor.u32 %v6324_v48, %v4505_v46  ;;  %v6318_v1 = vld [vmem:[#allocation5 + $0x234] sm:$0xf0]  ;;  %v4673_v2 = vld [vmem:[#allocation5 + $0x3a0] sm:$0xf]  ;;  %v4409_v48 = vld [vmem:[#allocation5 + $0x190] sm:$0xf] }
  0xd4   :  { %2159 = vmatpush.bf16.msrb.mxu1 %v4862_v12  ;;  %v1919_v12 = vpop.f32.mrf.mxu2 }
  0xd5   :  { %2172 = vmatpush.bf16.msrb.mxu2 %v5054_v13  ;;  %v4578_v13 = vor.u32 %v6342_v0, %v4577_v62  ;;  %v6270_v62 = vld [vmem:[#allocation5 + $0xb4] sm:$0xf0]  ;;  %v4890_v0 = vor.u32 %v6420_v52, %v4889_v51  ;;  %v4265_v12 = vld [vmem:[#allocation5 + $0x70] sm:$0xf]  ;;  %v6348_v52 = vld [vmem:[#allocation5 + $0x324] sm:$0xf0] }
  0xd6   :  { %2185 = vmatpush.bf16.msrb.mxu3 %v5246_v19  ;;  %v1932_v19 = vpop.f32.mrf.mxu3 }
  0xd7   :  { %2147 = vmatpush.bf16.msrb.mxu0 %v4646_v26  ;;  %v6432_v26 = vld [vmem:[#allocation5 + $0x5c4] sm:$0xf0] }
  0xd8   :  { %2160 = vmatpush.bf16.msrb.mxu1 %v4838_v28  ;;  %v4554_v28 = vor.u32 %v6336_v21, %v4553_v18  ;;  %v4938_v34 = vor.u32 %v6432_v26, %v4937_v24  ;;  %v4649_v18 = vld [vmem:[#allocation5 + $0x370] sm:$0xf]  ;;  %v6360_v19 = vld [vmem:[#allocation5 + $0x384] sm:$0xf0] }
  0xd9   :  { %2173 = vmatpush.bf16.msrb.mxu2 %v5030_v29  ;;  %v4746_v29 = vor.u32 %v6384_v23, %v4745_v22  ;;  %v4841_v21 = vld [vmem:[#allocation5 + $0x4f0] sm:$0xf]  ;;  %v6408_v22 = vld [vmem:[#allocation5 + $0x504] sm:$0xf0]  ;;  %v4650_v30 = vor.u32 %v6360_v19, %v4649_v18  ;;  %v6285_v18 = vld [vmem:[#allocation5 + $0x134] sm:$0xf] }
  0xda   :  { %2186 = vmatpush.bf16.msrb.mxu3 %v5222_v36  ;;  %v6330_v36 = vld [vmem:[#allocation5 + $0x294] sm:$0xf0]  ;;  %v4842_v37 = vor.u32 %v6408_v22, %v4841_v21  ;;  %v4363_v19 = vld [vmem:[#allocation5 + $0x148] sm:$0xf0] }
  0xdb   :  { %2148 = vmatpush.bf16.msrb.mxu0 %v4622_v45  ;;  %v4530_v42 = vor.u32 %v6330_v36, %v4529_v33  ;;  %v6276_v45 = vld [vmem:[#allocation5 + $0xe4] sm:$0xf0]  ;;  %v6258_v33 = vld [vmem:[#allocation5 + $0x54] sm:$0xf0]  ;;  %v4555_v21 = vld [vmem:[#allocation5 + $0x2c8] sm:$0xf0] }
  0xdc   :  { %2161 = vmatpush.bf16.msrb.mxu1 %v4814_v49  ;;  %v4697_v49 = vld [vmem:[#allocation5 + $0x3d0] sm:$0xf] }
  0xdd   :  { %2174 = vmatpush.bf16.msrb.mxu2 %v5006_v50  ;;  %v6372_v50 = vld [vmem:[#allocation5 + $0x3e4] sm:$0xf0] }
  0xde   :  { %2187 = vmatpush.bf16.msrb.mxu3 %v5198_v55  ;;  %v4314_v55 = vor.u32 %v6276_v45, %v4313_v44  ;;  %v4698_v60 = vor.u32 %v6372_v50, %v4697_v49  ;;  %v4217_v44 = vld [vmem:[#allocation5 + $0x10] sm:$0xf]  ;;  %v6252_v45 = vld [vmem:[#allocation5 + $0x24] sm:$0xf0] }
  0xdf   :  { %2149 = vmatpush.bf16.msrb.mxu0 %v4598_v63  ;;  %v1943_v53 = vpop.f32.mrf.mxu0  ;;  %v4481_v63 = vld [vmem:[#allocation5 + $0x220] sm:$0xf]  ;;  %v6300_v49 = vld [vmem:[#allocation5 + $0x1a4] sm:$0xf0]  ;;  %v4601_v50 = vld [vmem:[#allocation5 + $0x310] sm:$0xf] }
  0xe0   :  { %2162 = vmatpush.bf16.msrb.mxu1 %v4790_v4  ;;  %v1944_v57 = vadd.f32 %v1943_v53, %v7103_v54  ;;  %v1956_v58 = vpop.f32.mrf.mxu1  ;;  %v4290_v54 = vor.u32 %v6270_v62, %v4289_v61  ;;  %v4793_v53 = vld [vmem:[#allocation5 + $0x490] sm:$0xf]  ;;  %v4218_v62 = vor.u32 %v6252_v45, %v4217_v44  ;;  %v6516_v45 = vld [vmem:[#allocation5 + $0x864] sm:$0xf0] }
  0xe1   :  { %2175 = vmatpush.bf16.msrb.mxu2 %v4982_v5  ;;  %v4865_v5 = vld [vmem:[#allocation5 + $0x520] sm:$0xf] }
  0xe2   :  { %2188 = vmatpush.bf16.msrb.mxu3 %v5174_v10  ;;  %2150 = vmatmul.bf16.vlgmr.msrb.gmra.mxu0 %v7068_v8  ;;  %v7110_v4 = vadd.f32 %v1956_v58, %v1944_v57  ;;  %v4482_v10 = vor.u32 %v6318_v1, %v4481_v63  ;;  %v4866_v16 = vor.u32 %v6414_v6, %v4865_v5  ;;  %v5153_v58 = vld [vmem:[#allocation5 + $0x760] sm:$0xf]  ;;  %v6534_v63 = vld [vmem:[#allocation5 + $0x8f4] sm:$0xf0]  ;;  %v4387_v1 = vld [vmem:[#allocation5 + $0x178] sm:$0xf0] }
  0xe3   :  { %2194 = vmatpush.bf16.msra.mxu0 %v4386_v11  ;;  %2163 = vmatmul.bf16.vlgmr.msrb.gmra.mxu1 %v7072_v15  ;;  %v4674_v11 = vor.u32 %v6366_v3, %v4673_v2  ;;  %v4410_v2 = vor.u32 %v6300_v49, %v4409_v48  ;;  %v4602_v3 = vor.u32 %v6348_v52, %v4601_v50  ;;  %v6339_v5 = vld [vmem:[#allocation5 + $0x2e4] sm:$0xf]  ;;  %v4579_v6 = vld [vmem:[#allocation5 + $0x2f8] sm:$0xf0]  ;;  %v6321_v48 = vld [vmem:[#allocation5 + $0x254] sm:$0xf] }
  0xe4   :  { %2207 = vmatpush.bf16.msra.mxu1 %v4578_v13  ;;  %2176 = vmatmul.bf16.vlgmr.msrb.gmra.mxu2 %v7080_v32  ;;  %v6264_v13 = vld [vmem:[#allocation5 + $0x84] sm:$0xf0]  ;;  %v4507_v49 = vld [vmem:[#allocation5 + $0x268] sm:$0xf0] }
  0xe5   :  { %2220 = vmatpush.bf16.msra.mxu2 %v4770_v14  ;;  %2189 = vmatmul.bf16.vlgmr.msrb.gmra.mxu3 %v7082_v35  ;;  %v4457_v14 = vld [vmem:[#allocation5 + $0x1f0] sm:$0xf] }
  0xe6   :  { %2233 = vmatpush.bf16.msra.mxu3 %v4962_v20 }
  0xe7   :  { %2195 = vmatpush.bf16.msra.mxu0 %v4362_v27  ;;  %v1969_v20 = vpop.f32.mrf.mxu2  ;;  %v1945_v26 = vpop.f32.mrf.mxu0  ;;  %v4266_v27 = vor.u32 %v6264_v13, %v4265_v12  ;;  %v5129_v12 = vld [vmem:[#allocation5 + $0x730] sm:$0xf]  ;;  %v6480_v13 = vld [vmem:[#allocation5 + $0x744] sm:$0xf0] }
  0xe8   :  { %2208 = vmatpush.bf16.msra.mxu1 %v4554_v28  ;;  %v1970_v23 = vadd.f32 %v1969_v20, %v431_v7  ;;  %v1982_v24 = vpop.f32.mrf.mxu3  ;;  %v1958_v28 = vpop.f32.mrf.mxu1  ;;  %v6333_v20 = vld [vmem:[#allocation5 + $0x2b4] sm:$0xf]  ;;  %v5130_v22 = vor.u32 %v6480_v13, %v5129_v12  ;;  %v5105_v26 = vld [vmem:[#allocation5 + $0x700] sm:$0xf]  ;;  %v6504_v12 = vld [vmem:[#allocation5 + $0x804] sm:$0xf0] }
  0xe9   :  { %2221 = vmatpush.bf16.msra.mxu2 %v4746_v29  ;;  %v4458_v29 = vor.u32 %v6312_v17, %v4457_v14  ;;  %v5321_v14 = vld [vmem:[#allocation5 + $0x8b0] sm:$0xf]  ;;  %v6528_v17 = vld [vmem:[#allocation5 + $0x8c4] sm:$0xf0]  ;;  %v5297_v28 = vld [vmem:[#allocation5 + $0x880] sm:$0xf] }
  0xea   :  { %2234 = vmatpush.bf16.msra.mxu3 %v4938_v34  ;;  %v4433_v34 = vld [vmem:[#allocation5 + $0x1c0] sm:$0xf]  ;;  %v7113_v36 = vadd.f32 %v1982_v24, %v1970_v23  ;;  %v5322_v23 = vor.u32 %v6528_v17, %v5321_v14  ;;  %v4366_v24 = vor.u32 %v6285_v18, %v4363_v19  ;;  %v6261_v13 = vld [vmem:[#allocation5 + $0x74] sm:$0xf]  ;;  %v4267_v14 = vld [vmem:[#allocation5 + $0x88] sm:$0xf0] }
  0xeb   :  { %2196 = vmatpush.bf16.msra.mxu0 %v4338_v41  ;;  %v4817_v41 = vld [vmem:[#allocation5 + $0x4c0] sm:$0xf]  ;;  %v4434_v46 = vor.u32 %v6306_v38, %v4433_v34  ;;  %v6327_v34 = vld [vmem:[#allocation5 + $0x284] sm:$0xf]  ;;  %v6309_v17 = vld [vmem:[#allocation5 + $0x1f4] sm:$0xf] }
  0xec   :  { %2209 = vmatpush.bf16.msra.mxu1 %v4530_v42  ;;  %v6402_v42 = vld [vmem:[#allocation5 + $0x4d4] sm:$0xf0]  ;;  %v4459_v18 = vld [vmem:[#allocation5 + $0x208] sm:$0xf0] }
  0xed   :  { %2222 = vmatpush.bf16.msra.mxu2 %v4722_v43  ;;  %v4242_v43 = vor.u32 %v6258_v33, %v4241_v31  ;;  %v4818_v51 = vor.u32 %v6402_v42, %v4817_v41  ;;  %v6279_v31 = vld [vmem:[#allocation5 + $0x104] sm:$0xf]  ;;  %v4339_v33 = vld [vmem:[#allocation5 + $0x118] sm:$0xf0]  ;;  %v5081_v41 = vld [vmem:[#allocation5 + $0x6d0] sm:$0xf] }
  0xee   :  { %2235 = vmatpush.bf16.msra.mxu3 %v4914_v47  ;;  %v4626_v47 = vor.u32 %v6354_v40, %v4625_v39  ;;  %v4342_v40 = vor.u32 %v6279_v31, %v4339_v33  ;;  %v6468_v42 = vld [vmem:[#allocation5 + $0x6e4] sm:$0xf0]  ;;  %v4243_v31 = vld [vmem:[#allocation5 + $0x58] sm:$0xf0]  ;;  %v6303_v33 = vld [vmem:[#allocation5 + $0x1c4] sm:$0xf] }
  0xef   :  { %2197 = vmatpush.bf16.msra.mxu0 %v4314_v55  ;;  %v6396_v55 = vld [vmem:[#allocation5 + $0x4a4] sm:$0xf0]  ;;  %v1971_v57 = vpop.f32.mrf.mxu2  ;;  %v5082_v50 = vor.u32 %v6468_v42, %v5081_v41  ;;  %v5177_v42 = vld [vmem:[#allocation5 + $0x790] sm:$0xf] }
  0xf0   :  { %2210 = vmatpush.bf16.msra.mxu1 %v4506_v59  ;;  %v6486_v59 = vld [vmem:[#allocation5 + $0x774] sm:$0xf0]  ;;  %v1984_v61 = vpop.f32.mrf.mxu3  ;;  %v4794_v7 = vor.u32 %v6396_v55, %v4793_v53  ;;  %v5057_v55 = vld [vmem:[#allocation5 + $0x6a0] sm:$0xf] }
  0xf1   :  { %2223 = vmatpush.bf16.msra.mxu2 %v4698_v60  ;;  %v5345_v60 = vld [vmem:[#allocation5 + $0x8e0] sm:$0xf]  ;;  %v6462_v57 = vld [vmem:[#allocation5 + $0x6b4] sm:$0xf0] }
  0xf2   :  { %2236 = vmatpush.bf16.msra.mxu3 %v4890_v0  ;;  %v6291_v0 = vld [vmem:[#allocation5 + $0x164] sm:$0xf]  ;;  %v6510_v61 = vld [vmem:[#allocation5 + $0x834] sm:$0xf0] }
  0xf3   :  { %2198 = vmatpush.bf16.msra.mxu0 %v4290_v54  ;;  %v5154_v54 = vor.u32 %v6486_v59, %v5153_v58  ;;  %v5249_v58 = vld [vmem:[#allocation5 + $0x820] sm:$0xf] }
  0xf4   :  { %2211 = vmatpush.bf16.msra.mxu1 %v4482_v10  ;;  %v5346_v10 = vor.u32 %v6534_v63, %v5345_v60  ;;  %v4510_v60 = vor.u32 %v6321_v48, %v4507_v49  ;;  %v4291_v63 = vld [vmem:[#allocation5 + $0xb8] sm:$0xf0]  ;;  %v6297_v48 = vld [vmem:[#allocation5 + $0x194] sm:$0xf]  ;;  %v4411_v49 = vld [vmem:[#allocation5 + $0x1a8] sm:$0xf0] }
  0xf5   :  { %2224 = vmatpush.bf16.msra.mxu2 %v4674_v11  ;;  %v4390_v11 = vor.u32 %v6291_v0, %v4387_v1  ;;  %v6315_v0 = vld [vmem:[#allocation5 + $0x224] sm:$0xf]  ;;  %v4483_v1 = vld [vmem:[#allocation5 + $0x238] sm:$0xf0] }
  0xf6   :  { %2237 = vmatpush.bf16.msra.mxu3 %v4866_v16  ;;  %v4582_v16 = vor.u32 %v6339_v5, %v4579_v6  ;;  %v5033_v6 = vld [vmem:[#allocation5 + $0x670] sm:$0xf] }
  0xf7   :  { %2199 = vmatpush.bf16.msra.mxu0 %v4266_v27  ;;  %v6474_v27 = vld [vmem:[#allocation5 + $0x714] sm:$0xf0] }
  0xf8   :  { %2212 = vmatpush.bf16.msra.mxu1 %v4458_v29  ;;  %v4558_v29 = vor.u32 %v6333_v20, %v4555_v21  ;;  %v5106_v38 = vor.u32 %v6474_v27, %v5105_v26  ;;  %v5201_v26 = vld [vmem:[#allocation5 + $0x7c0] sm:$0xf] }
  0xf9   :  { %2225 = vmatpush.bf16.msra.mxu2 %v4650_v30  ;;  %v6522_v30 = vld [vmem:[#allocation5 + $0x894] sm:$0xf0] }
  0xfa   :  { %2238 = vmatpush.bf16.msra.mxu3 %v4842_v37  ;;  %v4531_v37 = vld [vmem:[#allocation5 + $0x298] sm:$0xf0]  ;;  %v5298_v39 = vor.u32 %v6522_v30, %v5297_v28  ;;  %v4462_v28 = vor.u32 %v6309_v17, %v4459_v18  ;;  %v6255_v30 = vld [vmem:[#allocation5 + $0x44] sm:$0xf]  ;;  %v5131_v17 = vld [vmem:[#allocation5 + $0x748] sm:$0xf0] }
  0xfb   :  { %2200 = vmatpush.bf16.msra.mxu0 %v4242_v43  ;;  %v5273_v43 = vld [vmem:[#allocation5 + $0x850] sm:$0xf]  ;;  %v4534_v44 = vor.u32 %v6327_v34, %v4531_v37  ;;  %v4435_v34 = vld [vmem:[#allocation5 + $0x1d8] sm:$0xf0]  ;;  %v4246_v41 = vor.u32 %v6255_v30, %v4243_v31  ;;  %v6525_v18 = vld [vmem:[#allocation5 + $0x8b4] sm:$0xf] }
  0xfc   :  { %2213 = vmatpush.bf16.msra.mxu1 %v4434_v46  ;;  %v6273_v46 = vld [vmem:[#allocation5 + $0xd4] sm:$0xf]  ;;  %v5274_v52 = vor.u32 %v6516_v45, %v5273_v43  ;;  %v6492_v43 = vld [vmem:[#allocation5 + $0x7a4] sm:$0xf0]  ;;  %v5107_v30 = vld [vmem:[#allocation5 + $0x718] sm:$0xf0] }
  0xfd   :  { %2226 = vmatpush.bf16.msra.mxu2 %v4626_v47  ;;  %v4315_v47 = vld [vmem:[#allocation5 + $0xe8] sm:$0xf0]  ;;  %v6519_v31 = vld [vmem:[#allocation5 + $0x884] sm:$0xf] }
  0xfe   :  { %2239 = vmatpush.bf16.msra.mxu3 %v4818_v51  ;;  %v4318_v53 = vor.u32 %v6273_v46, %v4315_v47  ;;  %v4438_v46 = vor.u32 %v6303_v33, %v4435_v34  ;;  %v4219_v47 = vld [vmem:[#allocation5 + $0x28] sm:$0xf0]  ;;  %v5299_v33 = vld [vmem:[#allocation5 + $0x898] sm:$0xf0] }
  0xff   :  { %2201 = vmatpush.bf16.msra.mxu0 %v4218_v62  ;;  %v7119_v51 = vpop.f32.mrf.mxu0  ;;  %v6267_v62 = vld [vmem:[#allocation5 + $0xa4] sm:$0xf] }
 0x100   :  { %2214 = vmatpush.bf16.msra.mxu1 %v4410_v2  ;;  %v7121_v59 = vpop.f32.mrf.mxu1  ;;  %v5058_v2 = vor.u32 %v6462_v57, %v5057_v55  ;;  %v4294_v5 = vor.u32 %v6267_v62, %v4291_v63  ;;  %v6435_v55 = vld [vmem:[#allocation5 + $0x5e4] sm:$0xf]  ;;  %v5178_v62 = vor.u32 %v6492_v43, %v5177_v42  ;;  %v5302_v42 = vor.u32 %v6519_v31, %v5299_v33  ;;  %v4891_v43 = vld [vmem:[#allocation5 + $0x568] sm:$0xf0]  ;;  %v5011_v31 = vld [vmem:[#allocation5 + $0x658] sm:$0xf0] }
 0x101   :  { %2227 = vmatpush.bf16.msra.mxu2 %v4602_v3  ;;  %v5250_v3 = vor.u32 %v6510_v61, %v5249_v58  ;;  %v4963_v58 = vld [vmem:[#allocation5 + $0x5f8] sm:$0xf0]  ;;  %v432_v33 = vperm.slane %v7100_v56, 2  ;;  %v5179_v56 = vld [vmem:[#allocation5 + $0x7a8] sm:$0xf0] }
 0x102   :  { %2240 = vmatpush.bf16.msra.mxu3 %v4794_v7  ;;  %2202 = vmatmul.bf16.vlgmr.msra.gmra.mxu0 %v7070_v9  ;;  %v6456_v7 = vld [vmem:[#allocation5 + $0x684] sm:$0xf0]  ;;  %v5155_v61 = vld [vmem:[#allocation5 + $0x778] sm:$0xf0] }
 0x103   :  { %2246 = vmatpush.bf16.msrb.mxu0 %v5154_v54  ;;  %2215 = vmatmul.bf16.vlgmr.msra.gmra.mxu1 %v7077_v25  ;;  %v5225_v54 = vld [vmem:[#allocation5 + $0x7f0] sm:$0xf]  ;;  %v5034_v19 = vor.u32 %v6456_v7, %v5033_v6  ;;  %v6381_v7 = vld [vmem:[#allocation5 + $0x434] sm:$0xf] }
 0x104   :  { %2259 = vmatpush.bf16.msrb.mxu1 %v5346_v10  ;;  %2228 = vmatmul.bf16.vlgmr.msra.gmra.mxu2 %v7068_v8  ;;  %v5226_v21 = vor.u32 %v6504_v12, %v5225_v54  ;;  %v4747_v54 = vld [vmem:[#allocation5 + $0x448] sm:$0xf0] }
 0x105   :  { %2272 = vmatpush.bf16.msrb.mxu2 %v4390_v11  ;;  %2241 = vmatmul.bf16.vlgmr.msra.gmra.mxu3 %v7072_v15  ;;  %v4486_v11 = vor.u32 %v6315_v0, %v4483_v1  ;;  %v6531_v0 = vld [vmem:[#allocation5 + $0x8e4] sm:$0xf]  ;;  %v5347_v1 = vld [vmem:[#allocation5 + $0x8f8] sm:$0xf0] }
 0x106   :  { %2285 = vmatpush.bf16.msrb.mxu3 %v4582_v16  ;;  %v5350_v12 = vor.u32 %v6531_v0, %v5347_v1 }
 0x107   :  { %2247 = vmatpush.bf16.msrb.mxu0 %v5130_v22  ;;  %v7123_v10 = vpop.f32.mrf.mxu2  ;;  %v1997_v20 = vpop.f32.mrf.mxu0  ;;  %v4270_v22 = vor.u32 %v6261_v13, %v4267_v14  ;;  %v4939_v13 = vld [vmem:[#allocation5 + $0x5c8] sm:$0xf0]  ;;  %v6477_v14 = vld [vmem:[#allocation5 + $0x734] sm:$0xf] }
 0x108   :  { %2260 = vmatpush.bf16.msrb.mxu1 %v5322_v23  ;;  %v7125_v16 = vpop.f32.mrf.mxu3  ;;  %v5009_v23 = vld [vmem:[#allocation5 + $0x640] sm:$0xf]  ;;  %v2010_v27 = vpop.f32.mrf.mxu1  ;;  %v4750_v20 = vor.u32 %v6381_v7, %v4747_v54  ;;  %v4843_v54 = vld [vmem:[#allocation5 + $0x508] sm:$0xf0] }
 0x109   :  { %2273 = vmatpush.bf16.msrb.mxu2 %v4366_v24  ;;  %v6450_v24 = vld [vmem:[#allocation5 + $0x654] sm:$0xf0] }
 0x10a   :  { %2286 = vmatpush.bf16.msrb.mxu3 %v4558_v29  ;;  %v6498_v29 = vld [vmem:[#allocation5 + $0x7d4] sm:$0xf0]  ;;  %v5010_v37 = vor.u32 %v6450_v24, %v5009_v23  ;;  %v6375_v23 = vld [vmem:[#allocation5 + $0x404] sm:$0xf]  ;;  %v4723_v24 = vld [vmem:[#allocation5 + $0x418] sm:$0xf0] }
 0x10b   :  { %2248 = vmatpush.bf16.msrb.mxu0 %v5106_v38  ;;  %v4985_v38 = vld [vmem:[#allocation5 + $0x610] sm:$0xf]  ;;  %v4726_v34 = vor.u32 %v6375_v23, %v4723_v24 }
 0x10c   :  { %2261 = vmatpush.bf16.msrb.mxu1 %v5298_v39  ;;  %v6444_v39 = vld [vmem:[#allocation5 + $0x624] sm:$0xf0] }
 0x10d   :  { %2274 = vmatpush.bf16.msrb.mxu2 %v4342_v40  ;;  %v5202_v40 = vor.u32 %v6498_v29, %v5201_v26  ;;  %v4986_v57 = vor.u32 %v6444_v39, %v4985_v38  ;;  %v6423_v26 = vld [vmem:[#allocation5 + $0x584] sm:$0xf]  ;;  %v6369_v39 = vld [vmem:[#allocation5 + $0x3d4] sm:$0xf] }
 0x10e   :  { %2287 = vmatpush.bf16.msrb.mxu3 %v4534_v44  ;;  %v6249_v44 = vld [vmem:[#allocation5 + $0x14] sm:$0xf]  ;;  %v6471_v29 = vld [vmem:[#allocation5 + $0x704] sm:$0xf] }
 0x10f   :  { %2249 = vmatpush.bf16.msrb.mxu0 %v5082_v50  ;;  %v2023_v45 = vpop.f32.mrf.mxu2  ;;  %v4222_v63 = vor.u32 %v6249_v44, %v4219_v47  ;;  %v5110_v38 = vor.u32 %v6471_v29, %v5107_v30  ;;  %v6465_v44 = vld [vmem:[#allocation5 + $0x6d4] sm:$0xf]  ;;  %v6447_v30 = vld [vmem:[#allocation5 + $0x644] sm:$0xf] }
 0x110   :  { %2262 = vmatpush.bf16.msrb.mxu1 %v5274_v52  ;;  %v2036_v50 = vpop.f32.mrf.mxu3  ;;  %v6387_v52 = vld [vmem:[#allocation5 + $0x464] sm:$0xf]  ;;  %v5083_v45 = vld [vmem:[#allocation5 + $0x6e8] sm:$0xf0] }
 0x111   :  { %2275 = vmatpush.bf16.msrb.mxu2 %v4318_v53  ;;  %v4771_v53 = vld [vmem:[#allocation5 + $0x478] sm:$0xf0]  ;;  %v5086_v50 = vor.u32 %v6465_v44, %v5083_v45  ;;  %v4795_v44 = vld [vmem:[#allocation5 + $0x4a8] sm:$0xf0]  ;;  %v6441_v45 = vld [vmem:[#allocation5 + $0x614] sm:$0xf] }
 0x112   :  { %2288 = vmatpush.bf16.msrb.mxu3 %v4510_v60  ;;  %v6483_v60 = vld [vmem:[#allocation5 + $0x764] sm:$0xf] }
 0x113   :  { %2250 = vmatpush.bf16.msrb.mxu0 %v5058_v2  ;;  %v4414_v2 = vor.u32 %v6297_v48, %v4411_v49  ;;  %v5158_v6 = vor.u32 %v6483_v60, %v5155_v61  ;;  %v6459_v60 = vld [vmem:[#allocation5 + $0x6a4] sm:$0xf]  ;;  %v5059_v61 = vld [vmem:[#allocation5 + $0x6b8] sm:$0xf0] }
 0x114   :  { %2263 = vmatpush.bf16.msrb.mxu1 %v5250_v3  ;;  %v4774_v3 = vor.u32 %v6387_v52, %v4771_v53  ;;  %v6363_v52 = vld [vmem:[#allocation5 + $0x3a4] sm:$0xf]  ;;  %v4675_v53 = vld [vmem:[#allocation5 + $0x3b8] sm:$0xf0] }
 0x115   :  { %2276 = vmatpush.bf16.msrb.mxu2 %v4294_v5  ;;  %v4966_v5 = vor.u32 %v6435_v55, %v4963_v58  ;;  %v6411_v55 = vld [vmem:[#allocation5 + $0x524] sm:$0xf]  ;;  %v4867_v58 = vld [vmem:[#allocation5 + $0x538] sm:$0xf0]  ;;  %v4678_v0 = vor.u32 %v6363_v52, %v4675_v53  ;;  %v6565_v53 = vld [vmem:[#allocation8 + $0xec] sm:$0xf0] }
 0x116   :  { %2289 = vmatpush.bf16.msrb.mxu3 %v4486_v11  ;;  %v6429_v11 = vld [vmem:[#allocation5 + $0x5b4] sm:$0xf]  ;;  %v4870_v1 = vor.u32 %v6411_v55, %v4867_v58  ;;  %v5465_v52 = vld [vmem:[#allocation8 + $0xe0] sm:$0xf] }
 0x117   :  { %2251 = vmatpush.bf16.msrb.mxu0 %v5034_v19  ;;  %v5323_v19 = vld [vmem:[#allocation5 + $0x8c8] sm:$0xf0]  ;;  %v5593_v55 = vld [vmem:[#allocation8 + $0x1e0] sm:$0xf] }
 0x118   :  { %2264 = vmatpush.bf16.msrb.mxu1 %v5226_v21  ;;  %v4942_v21 = vor.u32 %v6429_v11, %v4939_v13  ;;  %v5326_v27 = vor.u32 %v6525_v18, %v5323_v19  ;;  %v6453_v11 = vld [vmem:[#allocation5 + $0x674] sm:$0xf] }
 0x119   :  { %2277 = vmatpush.bf16.msrb.mxu2 %v4270_v22  ;;  %v5134_v22 = vor.u32 %v6477_v14, %v5131_v17  ;;  %v6501_v14 = vld [vmem:[#allocation5 + $0x7f4] sm:$0xf]  ;;  %v5227_v17 = vld [vmem:[#allocation5 + $0x808] sm:$0xf0] }
 0x11a   :  { %2290 = vmatpush.bf16.msrb.mxu3 %v4462_v28  ;;  %v4915_v28 = vld [vmem:[#allocation5 + $0x598] sm:$0xf0]  ;;  %v5230_v29 = vor.u32 %v6501_v14, %v5227_v17  ;;  %v6661_v14 = vld [vmem:[#allocation8 + $0x3ec] sm:$0xf0] }
 0x11b   :  { %2252 = vmatpush.bf16.msrb.mxu0 %v5010_v37  ;;  %v4918_v37 = vor.u32 %v6423_v26, %v4915_v28  ;;  %v4627_v26 = vld [vmem:[#allocation5 + $0x358] sm:$0xf0]  ;;  %v6593_v17 = vld [vmem:[#allocation8 + $0x1cc] sm:$0xf0] }
 0x11c   :  { %2265 = vmatpush.bf16.msrb.mxu1 %v5202_v40  ;;  %v4699_v40 = vld [vmem:[#allocation5 + $0x3e8] sm:$0xf0]  ;;  %v4819_v28 = vld [vmem:[#allocation5 + $0x4d8] sm:$0xf0] }
 0x11d   :  { %2278 = vmatpush.bf16.msrb.mxu2 %v4246_v41  ;;  %v6417_v41 = vld [vmem:[#allocation5 + $0x554] sm:$0xf]  ;;  %v4702_v48 = vor.u32 %v6369_v39, %v4699_v40  ;;  %v4603_v40 = vld [vmem:[#allocation5 + $0x328] sm:$0xf0] }
 0x11e   :  { %2291 = vmatpush.bf16.msrb.mxu3 %v4438_v46  ;;  %v6513_v46 = vld [vmem:[#allocation5 + $0x854] sm:$0xf] }
 0x11f   :  { %2253 = vmatpush.bf16.msrb.mxu0 %v4986_v57  ;;  %v7131_v47 = vpop.f32.mrf.mxu0  ;;  %v6345_v39 = vld [vmem:[#allocation5 + $0x314] sm:$0xf] }
 0x120   :  { %2266 = vmatpush.bf16.msrb.mxu1 %v5178_v62  ;;  %v7133_v49 = vpop.f32.mrf.mxu1  ;;  %v6507_v62 = vld [vmem:[#allocation5 + $0x824] sm:$0xf]  ;;  %v4606_v58 = vor.u32 %v6345_v39, %v4603_v40 }
 0x121   :  { %2279 = vmatpush.bf16.msrb.mxu2 %v4222_v63  ;;  %v5251_v63 = vld [vmem:[#allocation5 + $0x838] sm:$0xf0]  ;;  %v5545_v40 = vld [vmem:[#allocation8 + $0x180] sm:$0xf] }
 0x122   :  { %2292 = vmatpush.bf16.msrb.mxu3 %v4414_v2  ;;  %2254 = vmatmul.bf16.vlgmr.msrb.gmra.mxu0 %v7080_v32  ;;  %v5062_v2 = vor.u32 %v6459_v60, %v5059_v61  ;;  %v5254_v7 = vor.u32 %v6507_v62, %v5251_v63  ;;  %v6597_v60 = vld [vmem:[#allocation8 + $0x1ec] sm:$0xf0]  ;;  %v5721_v61 = vld [vmem:[#allocation8 + $0x2e0] sm:$0xf] }
 0x123   :  { %2298 = vmatpush.bf16.msra.mxu0 %v4774_v3  ;;  %2267 = vmatmul.bf16.vlgmr.msrb.gmra.mxu1 %v7082_v35  ;;  %v6357_v3 = vld [vmem:[#allocation5 + $0x374] sm:$0xf] }
 0x124   :  { %2311 = vmatpush.bf16.msra.mxu1 %v4966_v5  ;;  %2280 = vmatmul.bf16.vlgmr.msrb.gmra.mxu2 %v7070_v9  ;;  %v5275_v9 = vld [vmem:[#allocation5 + $0x868] sm:$0xf0]  ;;  %v6629_v62 = vld [vmem:[#allocation8 + $0x2ec] sm:$0xf0] }
 0x125   :  { %2324 = vmatpush.bf16.msra.mxu2 %v5158_v6  ;;  %2293 = vmatmul.bf16.vlgmr.msrb.gmra.mxu3 %v7077_v25  ;;  %v4894_v25 = vor.u32 %v6417_v41, %v4891_v43  ;;  %v5278_v57 = vor.u32 %v6513_v46, %v5275_v9  ;;  %v4651_v5 = vld [vmem:[#allocation5 + $0x388] sm:$0xf0]  ;;  %v6405_v6 = vld [vmem:[#allocation5 + $0x4f4] sm:$0xf]  ;;  %v2048_v9 = vadd.f32 %v7131_v47, %v432_v33 }
 0x126   :  { %2337 = vmatpush.bf16.msra.mxu3 %v5350_v12  ;;  %v5035_v12 = vld [vmem:[#allocation5 + $0x688] sm:$0xf0]  ;;  %v4846_v23 = vor.u32 %v6405_v6, %v4843_v54  ;;  %v6393_v43 = vld [vmem:[#allocation5 + $0x494] sm:$0xf]  ;;  %v1996_v6 = vadd.f32 %v7119_v51, %v7113_v36  ;;  %v5722_v54 = vor.u32 %v6629_v62, %v5721_v61  ;;  %v2350_v62 = vpack.c.bf16 %v7110_v4, %v7110_v4 }
 0x127   :  { %2299 = vmatpush.bf16.msra.mxu0 %v4750_v20  ;;  %v7135_v13 = vpop.f32.mrf.mxu2  ;;  %v2049_v18 = vpop.f32.mrf.mxu0  ;;  %v4654_v20 = vor.u32 %v6357_v3, %v4651_v5  ;;  %v5038_v24 = vor.u32 %v6453_v11, %v5035_v12  ;;  %v4798_v63 = vor.u32 %v6393_v43, %v4795_v44  ;;  %v2061_v47 = vadd.f32 %v7133_v49, %v2048_v9  ;;  %v5449_v3 = vld [vmem:[#allocation8 + $0xc0] sm:$0xf]  ;;  %v6561_v5 = vld [vmem:[#allocation8 + $0xcc] sm:$0xf0] }
 0x128   :  { %2312 = vmatpush.bf16.msra.mxu1 %v4942_v21  ;;  %v7137_v19 = vpop.f32.mrf.mxu3  ;;  %v6351_v21 = vld [vmem:[#allocation5 + $0x344] sm:$0xf]  ;;  %v5450_v49 = vor.u32 %v6561_v5, %v5449_v3  ;;  %v2009_v36 = vadd.f32 %v7121_v59, %v1996_v6  ;;  %v6621_v33 = vld [vmem:[#allocation8 + $0x2ac] sm:$0xf0] }
 0x129   :  { %2325 = vmatpush.bf16.msra.mxu2 %v5134_v22  ;;  %v2062_v22 = vpop.f32.mrf.mxu1  ;;  %v5577_v11 = vld [vmem:[#allocation8 + $0x1c0] sm:$0xf]  ;;  %v6613_v61 = vld [vmem:[#allocation8 + $0x26c] sm:$0xf0] }
 0x12a   :  { %2338 = vmatpush.bf16.msra.mxu3 %v5326_v27  ;;  %v6399_v27 = vld [vmem:[#allocation5 + $0x4c4] sm:$0xf]  ;;  %v5578_v51 = vor.u32 %v6593_v17, %v5577_v11  ;;  %v2022_v39 = vadd.f32 %v7123_v10, %v2009_v36  ;;  %v6577_v11 = vld [vmem:[#allocation8 + $0x14c] sm:$0xf0] }
 0x12b   :  { %2300 = vmatpush.bf16.msra.mxu0 %v4726_v34  ;;  %v6495_v34 = vld [vmem:[#allocation5 + $0x7c4] sm:$0xf]  ;;  %v4822_v41 = vor.u32 %v6399_v27, %v4819_v28 }
 0x12c   :  { %2313 = vmatpush.bf16.msra.mxu1 %v4918_v37  ;;  %v5203_v37 = vld [vmem:[#allocation5 + $0x7d8] sm:$0xf0]  ;;  %v5849_v12 = vld [vmem:[#allocation8 + $0x3e0] sm:$0xf]  ;;  %v2035_v10 = vadd.f32 %v7125_v16, %v2022_v39 }
 0x12d   :  { %2326 = vmatpush.bf16.msra.mxu2 %v5110_v38  ;;  %v4630_v38 = vor.u32 %v6351_v21, %v4627_v26  ;;  %v5206_v46 = vor.u32 %v6495_v34, %v5203_v37  ;;  %v5705_v18 = vld [vmem:[#allocation8 + $0x2c0] sm:$0xf]  ;;  %v2074_v21 = vadd.f32 %v7135_v13, %v2061_v47  ;;  %v6553_v37 = vld [vmem:[#allocation8 + $0x8c] sm:$0xf0] }
 0x12e   :  { %2339 = vmatpush.bf16.msra.mxu3 %v5302_v42  ;;  %v5014_v42 = vor.u32 %v6447_v30, %v5011_v31  ;;  %v5433_v22 = vld [vmem:[#allocation8 + $0xa0] sm:$0xf]  ;;  %v6589_v30 = vld [vmem:[#allocation8 + $0x1ac] sm:$0xf0] }
 0x12f   :  { %2301 = vmatpush.bf16.msra.mxu0 %v4702_v48  ;;  %v4987_v48 = vld [vmem:[#allocation5 + $0x628] sm:$0xf0]  ;;  %v5561_v27 = vld [vmem:[#allocation8 + $0x1a0] sm:$0xf]  ;;  %v2087_v13 = vadd.f32 %v7137_v19, %v2074_v21 }
 0x130   :  { %2314 = vmatpush.bf16.msra.mxu1 %v4894_v25  ;;  %v6489_v25 = vld [vmem:[#allocation5 + $0x794] sm:$0xf]  ;;  %v5833_v28 = vld [vmem:[#allocation8 + $0x3c0] sm:$0xf] }
 0x131   :  { %2327 = vmatpush.bf16.msra.mxu2 %v5086_v50  ;;  %v2075_v50 = vpop.f32.mrf.mxu2  ;;  %v5689_v31 = vld [vmem:[#allocation8 + $0x2a0] sm:$0xf] }
 0x132   :  { %2340 = vmatpush.bf16.msra.mxu3 %v5278_v57  ;;  %v2088_v57 = vpop.f32.mrf.mxu3  ;;  %v5417_v34 = vld [vmem:[#allocation8 + $0x80] sm:$0xf] }
 0x133   :  { %2302 = vmatpush.bf16.msra.mxu0 %v4678_v0  ;;  %v4990_v0 = vor.u32 %v6441_v45, %v4987_v48  ;;  %v5673_v43 = vld [vmem:[#allocation8 + $0x280] sm:$0xf]  ;;  %v5418_v45 = vor.u32 %v6553_v37, %v5417_v34  ;;  %v6549_v48 = vld [vmem:[#allocation8 + $0x6c] sm:$0xf0] }
 0x134   :  { %2315 = vmatpush.bf16.msra.mxu1 %v4870_v1  ;;  %v5182_v1 = vor.u32 %v6489_v25, %v5179_v56  ;;  %v5401_v9 = vld [vmem:[#allocation8 + $0x60] sm:$0xf]  ;;  %v6537_v37 = vld [vmem:[#allocation8 + $0xc] sm:$0xf0] }
 0x135   :  { %2328 = vmatpush.bf16.msra.mxu2 %v5062_v2  ;;  %v5466_v2 = vor.u32 %v6565_v53, %v5465_v52  ;;  %v5529_v52 = vld [vmem:[#allocation8 + $0x160] sm:$0xf] }
 0x136   :  { %2341 = vmatpush.bf16.msra.mxu3 %v5254_v7  ;;  %v5594_v7 = vor.u32 %v6597_v60, %v5593_v55  ;;  %v5801_v53 = vld [vmem:[#allocation8 + $0x380] sm:$0xf]  ;;  %v6649_v55 = vld [vmem:[#allocation8 + $0x38c] sm:$0xf0] }
 0x137   :  { %2303 = vmatpush.bf16.msra.mxu0 %v4654_v20  ;;  %v6625_v20 = vld [vmem:[#allocation8 + $0x2cc] sm:$0xf0]  ;;  %v5657_v60 = vld [vmem:[#allocation8 + $0x260] sm:$0xf]  ;;  %v5802_v16 = vor.u32 %v6649_v55, %v5801_v53 }
 0x138   :  { %2316 = vmatpush.bf16.msra.mxu1 %v4846_v23  ;;  %v6557_v23 = vld [vmem:[#allocation8 + $0xac] sm:$0xf0]  ;;  %v5706_v26 = vor.u32 %v6625_v20, %v5705_v18  ;;  %v5385_v47 = vld [vmem:[#allocation8 + $0x40] sm:$0xf]  ;;  %v5658_v5 = vor.u32 %v6613_v61, %v5657_v60 }
 0x139   :  { %2329 = vmatpush.bf16.msra.mxu2 %v5038_v24  ;;  %v5850_v24 = vor.u32 %v6661_v14, %v5849_v12  ;;  %v5434_v59 = vor.u32 %v6557_v23, %v5433_v22  ;;  %v5513_v6 = vld [vmem:[#allocation8 + $0x140] sm:$0xf]  ;;  %v6609_v14 = vld [vmem:[#allocation8 + $0x24c] sm:$0xf0] }
 0x13a   :  { %2342 = vmatpush.bf16.msra.mxu3 %v5230_v29  ;;  %v6657_v29 = vld [vmem:[#allocation8 + $0x3cc] sm:$0xf0]  ;;  %v5641_v12 = vld [vmem:[#allocation8 + $0x240] sm:$0xf] }
 0x13b   :  { %2304 = vmatpush.bf16.msra.mxu0 %v4630_v38  ;;  %v5834_v38 = vor.u32 %v6657_v29, %v5833_v28  ;;  %v5369_v22 = vld [vmem:[#allocation8 + $0x20] sm:$0xf]  ;;  %v6541_v23 = vld [vmem:[#allocation8 + $0x2c] sm:$0xf0] }
 0x13c   :  { %2317 = vmatpush.bf16.msra.mxu1 %v4822_v41  ;;  %v5817_v41 = vld [vmem:[#allocation8 + $0x3a0] sm:$0xf]  ;;  %v6633_v61 = vld [vmem:[#allocation8 + $0x30c] sm:$0xf0] }
 0x13d   :  { %2330 = vmatpush.bf16.msra.mxu2 %v5014_v42  ;;  %v6653_v42 = vld [vmem:[#allocation8 + $0x3ac] sm:$0xf0]  ;;  %v5497_v28 = vld [vmem:[#allocation8 + $0x120] sm:$0xf] }
 0x13e   :  { %2343 = vmatpush.bf16.msra.mxu3 %v5206_v46  ;;  %v5818_v25 = vor.u32 %v6653_v42, %v5817_v41  ;;  %v5769_v29 = vld [vmem:[#allocation8 + $0x340] sm:$0xf]  ;;  %v6637_v41 = vld [vmem:[#allocation8 + $0x32c] sm:$0xf0] }
 0x13f   :  { %2305 = vmatpush.bf16.msra.mxu0 %v4606_v58  ;;  %v2099_v44 = vpop.f32.mrf.mxu0  ;;  %v6581_v58 = vld [vmem:[#allocation8 + $0x16c] sm:$0xf0]  ;;  %v5353_v34 = vld [vmem:[#allocation8] sm:$0xf] }
 0x140   :  { %2318 = vmatpush.bf16.msra.mxu1 %v4798_v63  ;;  %v2100_v19 = vadd.f32 %v2099_v44, %v2087_v13  ;;  %v2112_v46 = vpop.f32.mrf.mxu1  ;;  %v5530_v3 = vor.u32 %v6581_v58, %v5529_v52  ;;  %v5370_v13 = vor.u32 %v6541_v23, %v5369_v22  ;;  %v6569_v42 = vld [vmem:[#allocation8 + $0x10c] sm:$0xf0]  ;;  %v6563_v44 = vld [vmem:[#allocation8 + $0xe4] sm:$0xf]  ;;  %v7159_v52 = vld [vmem:[#allocation7] sm:$0x3f] }
 0x141   :  { %2331 = vmatpush.bf16.msra.mxu2 %v4990_v0  ;;  %v5402_v0 = vor.u32 %v6549_v48, %v5401_v9  ;;  %v5977_v48 = vld [vmem:[#allocation8 + $0x4e0] sm:$0xf]  ;;  %v433_v53 = vperm.slane %v7159_v52, 3  ;;  %v6559_v58 = vld [vmem:[#allocation8 + $0xc4] sm:$0xf] }
 0x142   :  { %2344 = vmatpush.bf16.msra.mxu3 %v5182_v1  ;;  %2306 = vmatmul.bf16.vlgmr.msra.gmra.mxu0 %v7068_v8  ;;  %v5562_v8 = vor.u32 %v6589_v30, %v5561_v27  ;;  %v2113_v57 = vadd.f32 %v2112_v46, %v2100_v19  ;;  %v6545_v1 = vld [vmem:[#allocation8 + $0x4c] sm:$0xf0]  ;;  %v5642_v27 = vor.u32 %v6609_v14, %v5641_v12  ;;  %v5737_v60 = vld [vmem:[#allocation8 + $0x300] sm:$0xf] }
 0x143   :  { %3536 = vmatpush.bf16.msrb.mxu0 %v5466_v2  ;;  %2319 = vmatmul.bf16.vlgmr.msra.gmra.mxu1 %v7072_v15  ;;  %v5690_v15 = vor.u32 %v6621_v33, %v5689_v31  ;;  %v2351_v2 = vpack.c.bf16 %v2035_v10, %v2035_v10  ;;  %v5386_v21 = vor.u32 %v6545_v1, %v5385_v47  ;;  %v6641_v30 = vld [vmem:[#allocation8 + $0x34c] sm:$0xf0]  ;;  %v5625_v33 = vld [vmem:[#allocation8 + $0x220] sm:$0xf]  ;;  %v6595_v47 = vld [vmem:[#allocation8 + $0x1e4] sm:$0xf] }
 0x144   :  { %3549 = vmatpush.bf16.msrb.mxu1 %v5594_v7  ;;  %2332 = vmatmul.bf16.vlgmr.msra.gmra.mxu2 %v7080_v32  ;;  %v6585_v32 = vld [vmem:[#allocation8 + $0x18c] sm:$0xf0]  ;;  %v2352_v63 = vpack.c.bf16 %v2113_v57, %v2113_v57  ;;  %v5785_v7 = vld [vmem:[#allocation8 + $0x360] sm:$0xf]  ;;  %v5354_v46 = vor.u32 %v6537_v37, %v5353_v34  ;;  %v5595_v1 = vld [vmem:[#allocation8 + $0x1f0] sm:$0xf0] }
 0x145   :  { %3562 = vmatpush.bf16.msrb.mxu2 %v5722_v54  ;;  %2345 = vmatmul.bf16.vlgmr.msra.gmra.mxu3 %v7082_v35  ;;  %v6617_v35 = vld [vmem:[#allocation8 + $0x28c] sm:$0xf0]  ;;  %v5546_v56 = vor.u32 %v6585_v32, %v5545_v40  ;;  %v5753_v40 = vld [vmem:[#allocation8 + $0x320] sm:$0xf]  ;;  %v5598_v12 = vor.u32 %v6595_v47, %v5595_v1 }
 0x146   :  { %3575 = vmatpush.bf16.msrb.mxu3 %v5850_v24  ;;  %v5674_v50 = vor.u32 %v6617_v35, %v5673_v43  ;;  %v6645_v54 = vld [vmem:[#allocation8 + $0x36c] sm:$0xf0]  ;;  %v2358_v4 = vunpack.c.l.bf16 %v2352_v63  ;;  %v5609_v32 = vld [vmem:[#allocation8 + $0x200] sm:$0xf]  ;;  %v5754_v9 = vor.u32 %v6637_v41, %v5753_v40 }
 0x147   :  { %3537 = vmatpush.bf16.msrb.mxu0 %v5450_v49  ;;  %v7155_v17 = vpop.f32.mrf.mxu2  ;;  %v2101_v20 = vpop.f32.mrf.mxu0  ;;  %v2356_v49 = vunpack.c.l.bf16 %v2350_v62  ;;  %v5786_v36 = vor.u32 %v6645_v54, %v5785_v7  ;;  %v6573_v31 = vld [vmem:[#allocation8 + $0x12c] sm:$0xf0]  ;;  %v5945_v22 = vld [vmem:[#allocation8 + $0x4a0] sm:$0xf] }
 0x148   :  { %3550 = vmatpush.bf16.msrb.mxu1 %v5578_v51  ;;  %v7157_v18 = vpop.f32.mrf.mxu3  ;;  %v2114_v24 = vpop.f32.mrf.mxu1  ;;  %v2357_v51 = vunpack.c.l.bf16 %v2351_v2  ;;  %6774 = vtanh.f32 %v2358_v4  ;;  %v5498_v39 = vor.u32 %v6573_v31, %v5497_v28  ;;  %v6601_v43 = vld [vmem:[#allocation8 + $0x20c] sm:$0xf0]  ;;  %v5961_v2 = vld [vmem:[#allocation8 + $0x4c0] sm:$0xf]  ;;  %v2126_v14 = vadd.f32 %v7155_v17, %v433_v53  ;;  %v5435_v4 = vld [vmem:[#allocation8 + $0xb0] sm:$0xf0] }
 0x149   :  { %3563 = vmatpush.bf16.msrb.mxu2 %v5706_v26  ;;  %v5514_v26 = vor.u32 %v6577_v11, %v5513_v6  ;;  %6776 = vtanh.f32 %v2356_v49  ;;  %v5738_v6 = vor.u32 %v6633_v61, %v5737_v60  ;;  %v6555_v11 = vld [vmem:[#allocation8 + $0xa4] sm:$0xf]  ;;  %v5579_v49 = vld [vmem:[#allocation8 + $0x1d0] sm:$0xf0]  ;;  %v6685_v23 = vld [vmem:[#allocation8 + $0x4ac] sm:$0xf0] }
 0x14a   :  { %3576 = vmatpush.bf16.msrb.mxu3 %v5834_v38  ;;  %v5770_v38 = vor.u32 %v6641_v30, %v5769_v29  ;;  %6778 = vtanh.f32 %v2357_v51  ;;  %v6591_v20 = vld [vmem:[#allocation8 + $0x1c4] sm:$0xf]  ;;  %v5438_v24 = vor.u32 %v6555_v11, %v5435_v4  ;;  %v2139_v17 = vadd.f32 %v7157_v18, %v2126_v14  ;;  %v5563_v28 = vld [vmem:[#allocation8 + $0x1b0] sm:$0xf0]  ;;  %v5929_v30 = vld [vmem:[#allocation8 + $0x480] sm:$0xf] }
 0x14b   :  { %3538 = vmatpush.bf16.msrb.mxu0 %v5434_v59  ;;  %v6605_v59 = vld [vmem:[#allocation8 + $0x22c] sm:$0xf0]  ;;  %v5582_v51 = vor.u32 %v6591_v20, %v5579_v49  ;;  %v5946_v29 = vor.u32 %v6685_v23, %v5945_v22  ;;  %v5913_v40 = vld [vmem:[#allocation8 + $0x460] sm:$0xf]  ;;  %v5371_v60 = vld [vmem:[#allocation8 + $0x30] sm:$0xf0] }
 0x14c   :  { %3551 = vmatpush.bf16.msrb.mxu1 %v5562_v8  ;;  %v5626_v8 = vor.u32 %v6605_v59, %v5625_v33  ;;  %v6681_v31 = vld [vmem:[#allocation8 + $0x48c] sm:$0xf0]  ;;  %v6575_v61 = vld [vmem:[#allocation8 + $0x144] sm:$0xf]  ;;  %v5881_v1 = vld [vmem:[#allocation8 + $0x420] sm:$0xf] }
 0x14d   :  { %3564 = vmatpush.bf16.msrb.mxu2 %v5690_v15  ;;  %v5481_v15 = vld [vmem:[#allocation8 + $0x100] sm:$0xf]  ;;  %v5930_v18 = vor.u32 %v6681_v31, %v5929_v30  ;;  %v6677_v41 = vld [vmem:[#allocation8 + $0x46c] sm:$0xf0]  ;;  %v5355_v11 = vld [vmem:[#allocation8 + $0x10] sm:$0xf0] }
 0x14e   :  { %3577 = vmatpush.bf16.msrb.mxu3 %v5818_v25  ;;  %v6693_v25 = vld [vmem:[#allocation8 + $0x4ec] sm:$0xf0]  ;;  %v6775_v10 = vpop.eup %6774  ;;  %v6691_v14 = vld [vmem:[#allocation8 + $0x4e4] sm:$0xf]  ;;  %v5499_v49 = vld [vmem:[#allocation8 + $0x130] sm:$0xf0] }
 0x14f   :  { %3539 = vmatpush.bf16.msrb.mxu0 %v5418_v45  ;;  %v2127_v35 = vpop.f32.mrf.mxu2  ;;  %v5467_v45 = vld [vmem:[#allocation8 + $0xf0] sm:$0xf0]  ;;  %v6777_v55 = vpop.eup %6776  ;;  %v5978_v62 = vor.u32 %v6693_v25, %v5977_v48  ;;  %v6571_v20 = vld [vmem:[#allocation8 + $0x124] sm:$0xf] }
 0x150   :  { %3552 = vmatpush.bf16.msrb.mxu1 %v5546_v56  ;;  %v2140_v19 = vpop.f32.mrf.mxu3  ;;  %v5482_v56 = vor.u32 %v6569_v42, %v5481_v15  ;;  %v5470_v57 = vor.u32 %v6563_v44, %v5467_v45  ;;  %v6779_v63 = vpop.eup %6778  ;;  %v5547_v15 = vld [vmem:[#allocation8 + $0x190] sm:$0xf0] }
 0x151   :  { %3565 = vmatpush.bf16.msrb.mxu2 %v5674_v50  ;;  %v5610_v50 = vor.u32 %v6601_v43, %v5609_v32  ;;  %v7166_v7 = vpack.c.bf16 %v6779_v63, %v6779_v63  ;;  %v6543_v43 = vld [vmem:[#allocation8 + $0x44] sm:$0xf]  ;;  %v5387_v45 = vld [vmem:[#allocation8 + $0x50] sm:$0xf0] }
 0x152   :  { %3578 = vmatpush.bf16.msrb.mxu3 %v5802_v16  ;;  %v7162_v16 = vpack.c.bf16 %v6775_v10, %v6775_v10  ;;  %v6579_v19 = vld [vmem:[#allocation8 + $0x164] sm:$0xf]  ;;  %v5897_v10 = vld [vmem:[#allocation8 + $0x440] sm:$0xf]  ;;  %v5390_v53 = vor.u32 %v6543_v43, %v5387_v45  ;;  %v5979_v22 = vld [vmem:[#allocation8 + $0x4f0] sm:$0xf0] }
 0x153   :  { %3540 = vmatpush.bf16.msrb.mxu0 %v5402_v0  ;;  %v5451_v0 = vld [vmem:[#allocation8 + $0xd0] sm:$0xf0] }
 0x154   :  { %3553 = vmatpush.bf16.msrb.mxu1 %v5530_v3  ;;  %v6689_v3 = vld [vmem:[#allocation8 + $0x4cc] sm:$0xf0]  ;;  %v5454_v54 = vor.u32 %v6559_v58, %v5451_v0  ;;  %v5483_v30 = vld [vmem:[#allocation8 + $0x110] sm:$0xf0] }
 0x155   :  { %3566 = vmatpush.bf16.msrb.mxu2 %v5658_v5  ;;  %v7164_v5 = vpack.c.bf16 %v6777_v55, %v6777_v55  ;;  %v6539_v55 = vld [vmem:[#allocation8 + $0x24] sm:$0xf] }
 0x156   :  { %3579 = vmatpush.bf16.msrb.mxu3 %v5786_v36  ;;  %v6551_v36 = vld [vmem:[#allocation8 + $0x84] sm:$0xf] }
 0x157   :  { %3541 = vmatpush.bf16.msrb.mxu0 %v5386_v21  ;;  %v5962_v21 = vor.u32 %v6689_v3, %v5961_v2  ;;  %v6669_v2 = vld [vmem:[#allocation8 + $0x42c] sm:$0xf0] }
 0x158   :  { %3554 = vmatpush.bf16.msrb.mxu1 %v5514_v26  ;;  %v5419_v26 = vld [vmem:[#allocation8 + $0x90] sm:$0xf0] }
 0x159   :  { %3567 = vmatpush.bf16.msrb.mxu2 %v5642_v27  ;;  %v6587_v27 = vld [vmem:[#allocation8 + $0x1a4] sm:$0xf]  ;;  %v5422_v33 = vor.u32 %v6551_v36, %v5419_v26  ;;  %v6665_v36 = vld [vmem:[#allocation8 + $0x40c] sm:$0xf0] }
 0x15a   :  { %3580 = vmatpush.bf16.msrb.mxu3 %v5770_v38  ;;  %v5566_v34 = vor.u32 %v6587_v27, %v5563_v28  ;;  %v5502_v27 = vor.u32 %v6571_v20, %v5499_v49  ;;  %v5982_v28 = vor.u32 %v6691_v14, %v5979_v22  ;;  %v5659_v20 = vld [vmem:[#allocation8 + $0x270] sm:$0xf0]  ;;  %v6713_v22 = vld [vmem:[#allocation8 + $0x58c] sm:$0xf0] }
 0x15b   :  { %3542 = vmatpush.bf16.msrb.mxu0 %v5370_v13  ;;  %v6547_v13 = vld [vmem:[#allocation8 + $0x64] sm:$0xf] }
 0x15c   :  { %3555 = vmatpush.bf16.msrb.mxu1 %v5498_v39  ;;  %v5403_v39 = vld [vmem:[#allocation8 + $0x70] sm:$0xf0] }
 0x15d   :  { %3568 = vmatpush.bf16.msrb.mxu2 %v5626_v8  ;;  %v6583_v8 = vld [vmem:[#allocation8 + $0x184] sm:$0xf]  ;;  %v5406_v32 = vor.u32 %v6547_v13, %v5403_v39 }
 0x15e   :  { %3581 = vmatpush.bf16.msrb.mxu3 %v5754_v9  ;;  %v5550_v35 = vor.u32 %v6583_v8, %v5547_v15  ;;  %v5914_v9 = vor.u32 %v6677_v41, %v5913_v40  ;;  %v6725_v40 = vld [vmem:[#allocation8 + $0x5ec] sm:$0xf0]  ;;  %v6723_v41 = vld [vmem:[#allocation8 + $0x5e4] sm:$0xf] }
 0x15f   :  { %3543 = vmatpush.bf16.msrb.mxu0 %v5354_v46  ;;  %v2151_v59 = vpop.f32.mrf.mxu0  ;;  %v5531_v46 = vld [vmem:[#allocation8 + $0x170] sm:$0xf0] }
 0x160   :  { %3556 = vmatpush.bf16.msrb.mxu1 %v5482_v56  ;;  %v2152_v37 = vadd.f32 %v2151_v59, %v2139_v17  ;;  %v2164_v38 = vpop.f32.mrf.mxu1  ;;  %v6673_v56 = vld [vmem:[#allocation8 + $0x44c] sm:$0xf0]  ;;  %v5723_v17 = vld [vmem:[#allocation8 + $0x2f0] sm:$0xf0] }
 0x161   :  { %3569 = vmatpush.bf16.msrb.mxu2 %v5610_v50  ;;  %v5898_v0 = vor.u32 %v6673_v56, %v5897_v10  ;;  %v5963_v59 = vld [vmem:[#allocation8 + $0x4d0] sm:$0xf0]  ;;  %v6719_v10 = vld [vmem:[#allocation8 + $0x5c4] sm:$0xf] }
 0x162   :  { %3544 = vmatmul.bf16.vlgmr.msrb.gmra.mxu0 %v7164_v5  ;;  %3582 = vmatpush.bf16.msrb.mxu3 %v5738_v6  ;;  %v2165_v42 = vadd.f32 %v2164_v38, %v2152_v37  ;;  %v5374_v6 = vor.u32 %v6539_v55, %v5371_v60  ;;  %v5707_v37 = vld [vmem:[#allocation8 + $0x2d0] sm:$0xf0]  ;;  %v6679_v56 = vld [vmem:[#allocation8 + $0x484] sm:$0xf] }
 0x163   :  { %3588 = vmatpush.bf16.msra.mxu0 %v5978_v62  ;;  %3557 = vmatmul.bf16.vlgmr.msrb.gmra.mxu1 %v7166_v7  ;;  %v5515_v62 = vld [vmem:[#allocation8 + $0x150] sm:$0xf0]  ;;  %v6615_v60 = vld [vmem:[#allocation8 + $0x284] sm:$0xf] }
 0x164   :  { %3570 = vmatmul.bf16.vlgmr.msrb.gmra.mxu2 %v7162_v16 }
 0x165   :  { %3614 = vmatpush.bf16.msra.mxu2 %v5470_v57  ;;  %v5534_v57 = vor.u32 %v6579_v19, %v5531_v46  ;;  %v6619_v19 = vld [vmem:[#allocation8 + $0x2a4] sm:$0xf]  ;;  %v5691_v46 = vld [vmem:[#allocation8 + $0x2b0] sm:$0xf0] }
 0x166   :  { %3627 = vmatpush.bf16.msra.mxu3 %v5598_v12  ;;  %v5518_v12 = vor.u32 %v6575_v61, %v5515_v62  ;;  %v5675_v61 = vld [vmem:[#allocation8 + $0x290] sm:$0xf0] }
 0x167   :  { %3589 = vmatpush.bf16.msra.mxu0 %v5962_v21  ;;  %v2177_v44 = vpop.f32.mrf.mxu2  ;;  %v2153_v58 = vpop.f32.mrf.mxu0  ;;  %v5882_v21 = vor.u32 %v6669_v2, %v5881_v1  ;;  %v6715_v1 = vld [vmem:[#allocation8 + $0x5a4] sm:$0xf] }
 0x168   :  { %v2178_v48 = vadd.f32 %v2177_v44, %v2165_v42  ;;  %v2190_v25 = vpop.f32.mrf.mxu3  ;;  %v2166_v63 = vpop.f32.mrf.mxu1  ;;  %v6683_v42 = vld [vmem:[#allocation8 + $0x4a4] sm:$0xf]  ;;  %v6107_v44 = vld [vmem:[#allocation8 + $0x5f0] sm:$0xf0] }
 0x169   :  { %3615 = vmatpush.bf16.msra.mxu2 %v5454_v54  ;;  %v6535_v54 = vld [vmem:[#allocation8 + $0x4] sm:$0xf]  ;;  %v6110_v45 = vor.u32 %v6723_v41, %v6107_v44  ;;  %v6043_v41 = vld [vmem:[#allocation8 + $0x570] sm:$0xf0] }
 0x16a   :  { %3628 = vmatpush.bf16.msra.mxu3 %v5582_v51  ;;  %v2191_v50 = vadd.f32 %v2190_v25, %v2178_v48  ;;  %v6627_v51 = vld [vmem:[#allocation8 + $0x2e4] sm:$0xf]  ;;  %v5358_v26 = vor.u32 %v6535_v54, %v5355_v11  ;;  %v6089_v48 = vld [vmem:[#allocation8 + $0x5c0] sm:$0xf]  ;;  %v6721_v25 = vld [vmem:[#allocation8 + $0x5cc] sm:$0xf0]  ;;  %v5678_v54 = vor.u32 %v6615_v60, %v5675_v61 }
 0x16b   :  { %3590 = vmatpush.bf16.msra.mxu0 %v5946_v29  ;;  %v6567_v29 = vld [vmem:[#allocation8 + $0x104] sm:$0xf]  ;;  %v5726_v13 = vor.u32 %v6627_v51, %v5723_v17  ;;  %v6090_v55 = vor.u32 %v6721_v25, %v6089_v48  ;;  %v5867_v48 = vld [vmem:[#allocation8 + $0x410] sm:$0xf0]  ;;  %v5729_v25 = vld [vmem:[#allocation8 + $0x2e8] sm:$0xf] }
 0x16c   :  { %v2353_v47 = vpack.c.bf16 %v2191_v50, %v2191_v50  ;;  %v5486_v39 = vor.u32 %v6567_v29, %v5483_v30  ;;  %v5931_v50 = vld [vmem:[#allocation8 + $0x490] sm:$0xf0]  ;;  %v6675_v2 = vld [vmem:[#allocation8 + $0x464] sm:$0xf] }
 0x16d   :  { %3616 = vmatpush.bf16.msra.mxu2 %v5438_v24  ;;  %v5865_v24 = vld [vmem:[#allocation8 + $0x400] sm:$0xf]  ;;  %v5934_v62 = vor.u32 %v6679_v56, %v5931_v50  ;;  %v5643_v29 = vld [vmem:[#allocation8 + $0x250] sm:$0xf0]  ;;  %v6663_v44 = vld [vmem:[#allocation8 + $0x404] sm:$0xf] }
 0x16e   :  { %3629 = vmatpush.bf16.msra.mxu3 %v5566_v34  ;;  %v2359_v3 = vunpack.c.l.bf16 %v2353_v47  ;;  %v5866_v31 = vor.u32 %v6665_v36, %v5865_v24  ;;  %v6623_v34 = vld [vmem:[#allocation8 + $0x2c4] sm:$0xf]  ;;  %v6717_v47 = vld [vmem:[#allocation8 + $0x5ac] sm:$0xf0]  ;;  %v5899_v36 = vld [vmem:[#allocation8 + $0x450] sm:$0xf0] }
 0x16f   :  { %3591 = vmatpush.bf16.msra.mxu0 %v5930_v18  ;;  %v2179_v4 = vpop.f32.mrf.mxu2  ;;  %v6105_v18 = vld [vmem:[#allocation8 + $0x5e0] sm:$0xf]  ;;  %v5710_v43 = vor.u32 %v6623_v34, %v5707_v37  ;;  %v6671_v24 = vld [vmem:[#allocation8 + $0x444] sm:$0xf]  ;;  %v6709_v34 = vld [vmem:[#allocation8 + $0x56c] sm:$0xf0] }
 0x170   :  { %6780 = vtanh.f32 %v2359_v3  ;;  %v2192_v23 = vpop.f32.mrf.mxu3  ;;  %v5915_v3 = vld [vmem:[#allocation8 + $0x470] sm:$0xf0]  ;;  %v6611_v4 = vld [vmem:[#allocation8 + $0x264] sm:$0xf] }
 0x171   :  { %3617 = vmatpush.bf16.msra.mxu2 %v5422_v33  ;;  %v6687_v33 = vld [vmem:[#allocation8 + $0x4c4] sm:$0xf]  ;;  %v5918_v49 = vor.u32 %v6675_v2, %v5915_v3  ;;  %v5662_v51 = vor.u32 %v6611_v4, %v5659_v20  ;;  %v6027_v50 = vld [vmem:[#allocation8 + $0x550] sm:$0xf0]  ;;  %v6009_v2 = vld [vmem:[#allocation8 + $0x520] sm:$0xf] }
 0x172   :  { %3630 = vmatpush.bf16.msra.mxu3 %v5550_v35  ;;  %v5966_v15 = vor.u32 %v6687_v33, %v5963_v59  ;;  %v6106_v35 = vor.u32 %v6725_v40, %v6105_v18  ;;  %v6711_v23 = vld [vmem:[#allocation8 + $0x584] sm:$0xf]  ;;  %v6701_v3 = vld [vmem:[#allocation8 + $0x52c] sm:$0xf0]  ;;  %v6011_v4 = vld [vmem:[#allocation8 + $0x530] sm:$0xf0] }
 0x173   :  { %3592 = vmatpush.bf16.msra.mxu0 %v5914_v9  ;;  %v6707_v37 = vld [vmem:[#allocation8 + $0x564] sm:$0xf] }
 0x174   :  { %3601 = vmatpush.bf16.msra.mxu1 %v6106_v35  ;;  %v434_v35 = vperm.slane %v7159_v52, 4 }
 0x175   :  { %3618 = vmatpush.bf16.msra.mxu2 %v5406_v32  ;;  %v5947_v32 = vld [vmem:[#allocation8 + $0x4b0] sm:$0xf0] }
 0x176   :  { %3631 = vmatpush.bf16.msra.mxu3 %v5534_v57  ;;  %v6781_v38 = vpop.eup %6780  ;;  %v5950_v9 = vor.u32 %v6683_v42, %v5947_v32  ;;  %v6091_v57 = vld [vmem:[#allocation8 + $0x5d0] sm:$0xf0]  ;;  %v6046_v42 = vor.u32 %v6707_v37, %v6043_v41  ;;  %v6603_v32 = vld [vmem:[#allocation8 + $0x224] sm:$0xf]  ;;  %v6658_v41 = vld [vmem:[#allocation8 + $0x3d4] sm:$0xf0] }
 0x177   :  { %3593 = vmatpush.bf16.msra.mxu0 %v5898_v0  ;;  %v7173_v8 = vpack.c.bf16 %v6781_v38, %v6781_v38  ;;  %v6094_v58 = vor.u32 %v6719_v10, %v6091_v57  ;;  %v6073_v0 = vld [vmem:[#allocation8 + $0x5a0] sm:$0xf]  ;;  %v6667_v38 = vld [vmem:[#allocation8 + $0x424] sm:$0xf] }
 0x178   :  { %3602 = vmatpush.bf16.msra.mxu1 %v6090_v55  ;;  %v6074_v11 = vor.u32 %v6717_v47, %v6073_v0  ;;  %v6599_v57 = vld [vmem:[#allocation8 + $0x204] sm:$0xf] }
 0x179   :  { %3619 = vmatpush.bf16.msra.mxu2 %v5390_v53  ;;  %3583 = vmatmul.bf16.vlgmr.msrb.gmra.mxu3 %v7173_v8  ;;  %v5694_v53 = vor.u32 %v6619_v19, %v5691_v46  ;;  %v6025_v19 = vld [vmem:[#allocation8 + $0x540] sm:$0xf]  ;;  %v6705_v46 = vld [vmem:[#allocation8 + $0x54c] sm:$0xf0]  ;;  %v6655_v37 = vld [vmem:[#allocation8 + $0x3c4] sm:$0xf] }
 0x17a   :  { %3632 = vmatpush.bf16.msra.mxu3 %v5518_v12  ;;  %v6075_v12 = vld [vmem:[#allocation8 + $0x5b0] sm:$0xf0]  ;;  %v6026_v56 = vor.u32 %v6705_v46, %v6025_v19  ;;  %v5665_v19 = vld [vmem:[#allocation8 + $0x268] sm:$0xf]  ;;  %v6614_v46 = vld [vmem:[#allocation8 + $0x274] sm:$0xf0] }
 0x17b   :  { %3594 = vmatpush.bf16.msra.mxu0 %v5882_v21  ;;  %v6078_v14 = vor.u32 %v6715_v1, %v6075_v12  ;;  %v6057_v21 = vld [vmem:[#allocation8 + $0x580] sm:$0xf]  ;;  %v6626_v12 = vld [vmem:[#allocation8 + $0x2d4] sm:$0xf0] }
 0x17c   :  { %3603 = vmatpush.bf16.msra.mxu1 %v6074_v11  ;;  %v6058_v17 = vor.u32 %v6713_v22, %v6057_v21  ;;  %v5713_v11 = vld [vmem:[#allocation8 + $0x2c8] sm:$0xf]  ;;  %v5993_v21 = vld [vmem:[#allocation8 + $0x500] sm:$0xf]  ;;  %v6697_v22 = vld [vmem:[#allocation8 + $0x50c] sm:$0xf0] }
 0x17d   :  { %3620 = vmatpush.bf16.msra.mxu2 %v5374_v6 }
 0x17e   :  { %3633 = vmatpush.bf16.msra.mxu3 %v5502_v27 }
 0x17f   :  { %3595 = vmatpush.bf16.msra.mxu0 %v5866_v31  ;;  %v7177_v63 = vpop.f32.mrf.mxu0  ;;  %v5902_v31 = vor.u32 %v6671_v24, %v5899_v36  ;;  %v5714_v24 = vor.u32 %v6626_v12, %v5713_v11  ;;  %v5994_v36 = vor.u32 %v6697_v22, %v5993_v21  ;;  %v5787_v11 = vld [vmem:[#allocation8 + $0x370] sm:$0xf0]  ;;  %v5793_v12 = vld [vmem:[#allocation8 + $0x368] sm:$0xf]  ;;  %v6646_v21 = vld [vmem:[#allocation8 + $0x374] sm:$0xf0] }
 0x180   :  { %v7179_v6 = vpop.f32.mrf.mxu1  ;;  %3604 = vmatpush.bf16.msra.mxu1 %v6058_v17  ;;  %v2204_v60 = vadd.f32 %v7177_v63, %v434_v35  ;;  %v5697_v63 = vld [vmem:[#allocation8 + $0x2a8] sm:$0xf]  ;;  %v6659_v17 = vld [vmem:[#allocation8 + $0x3e4] sm:$0xf]  ;;  %v5819_v35 = vld [vmem:[#allocation8 + $0x3b0] sm:$0xf0] }
 0x181   :  { %3621 = vmatpush.bf16.msra.mxu2 %v5358_v26  ;;  %v6059_v26 = vld [vmem:[#allocation8 + $0x590] sm:$0xf0] }
 0x182   :  { %3634 = vmatpush.bf16.msra.mxu3 %v5486_v39  ;;  %v6062_v27 = vor.u32 %v6711_v23, %v6059_v26  ;;  %v5883_v39 = vld [vmem:[#allocation8 + $0x430] sm:$0xf0]  ;;  %v2217_v20 = vadd.f32 %v7179_v6, %v2204_v60  ;;  %v6695_v23 = vld [vmem:[#allocation8 + $0x504] sm:$0xf]  ;;  %v6662_v6 = vld [vmem:[#allocation8 + $0x3f4] sm:$0xf0] }
 0x183   :  { %3640 = vmatpush.bf16.msrb.mxu0 %v5726_v13  ;;  %v6041_v13 = vld [vmem:[#allocation8 + $0x560] sm:$0xf]  ;;  %v5851_v26 = vld [vmem:[#allocation8 + $0x3f0] sm:$0xf0]  ;;  %v6610_v60 = vld [vmem:[#allocation8 + $0x254] sm:$0xf0] }
 0x184   :  { %3622 = vmatmul.bf16.vlgmr.msra.gmra.mxu2 %v7164_v5  ;;  %v6042_v40 = vor.u32 %v6709_v34, %v6041_v13 }
 0x185   :  { %3666 = vmatpush.bf16.msrb.mxu2 %v5982_v28  ;;  %v6607_v28 = vld [vmem:[#allocation8 + $0x244] sm:$0xf] }
 0x186   :  { %3679 = vmatpush.bf16.msrb.mxu3 %v6110_v45  ;;  %v5646_v18 = vor.u32 %v6607_v28, %v5643_v29  ;;  %3605 = vmatpush.bf16.msra.mxu1 %v6042_v40  ;;  %v5886_v45 = vor.u32 %v6667_v38, %v5883_v39  ;;  %v5854_v29 = vor.u32 %v6659_v17, %v5851_v26  ;;  %v5835_v38 = vld [vmem:[#allocation8 + $0x3d0] sm:$0xf0]  ;;  %v5841_v39 = vld [vmem:[#allocation8 + $0x3c8] sm:$0xf]  ;;  %v6639_v17 = vld [vmem:[#allocation8 + $0x344] sm:$0xf] }
 0x187   :  { %3641 = vmatpush.bf16.msrb.mxu0 %v5710_v43  ;;  %v7181_v30 = vpop.f32.mrf.mxu2  ;;  %v2205_v33 = vpop.f32.mrf.mxu0  ;;  %v5627_v43 = vld [vmem:[#allocation8 + $0x230] sm:$0xf0]  ;;  %v5838_v40 = vor.u32 %v6655_v37, %v5835_v38 }
 0x188   :  { %v7183_v59 = vpop.f32.mrf.mxu3  ;;  %v5630_v10 = vor.u32 %v6603_v32, %v5627_v43  ;;  %v2230_v33 = vadd.f32 %v7181_v30, %v2217_v20  ;;  %v5842_v32 = vor.u32 %v6658_v41, %v5841_v39  ;;  %v6651_v30 = vld [vmem:[#allocation8 + $0x3a4] sm:$0xf]  ;;  %v6606_v20 = vld [vmem:[#allocation8 + $0x234] sm:$0xf0]  ;;  %v5771_v26 = vld [vmem:[#allocation8 + $0x350] sm:$0xf0] }
 0x189   :  { %3667 = vmatpush.bf16.msrb.mxu2 %v5966_v15  ;;  %v2218_v15 = vpop.f32.mrf.mxu1  ;;  %3635 = vmatmul.bf16.vlgmr.msra.gmra.mxu3 %v7166_v7  ;;  %v6635_v41 = vld [vmem:[#allocation8 + $0x324] sm:$0xf] }
 0x18a   :  { %3680 = vmatpush.bf16.msrb.mxu3 %v6094_v58  ;;  %v5611_v58 = vld [vmem:[#allocation8 + $0x210] sm:$0xf0]  ;;  %3606 = vmatpush.bf16.msra.mxu1 %v6026_v56  ;;  %v5681_v15 = vld [vmem:[#allocation8 + $0x288] sm:$0xf] }
 0x18b   :  { %3642 = vmatpush.bf16.msrb.mxu0 %v5694_v53  ;;  %v6630_v53 = vld [vmem:[#allocation8 + $0x2f4] sm:$0xf0]  ;;  %v5614_v1 = vor.u32 %v6599_v57, %v5611_v58  ;;  %v5809_v57 = vld [vmem:[#allocation8 + $0x388] sm:$0xf] }
 0x18c   :  { %v5730_v47 = vor.u32 %v6630_v53, %v5729_v25  ;;  %v6647_v53 = vld [vmem:[#allocation8 + $0x384] sm:$0xf]  ;;  %v5649_v58 = vld [vmem:[#allocation8 + $0x248] sm:$0xf] }
 0x18d   :  { %3668 = vmatpush.bf16.msrb.mxu2 %v5950_v9  ;;  %v6703_v9 = vld [vmem:[#allocation8 + $0x544] sm:$0xf] }
 0x18e   :  { %3681 = vmatpush.bf16.msrb.mxu3 %v6078_v14  ;;  %v6030_v55 = vor.u32 %v6703_v9, %v6027_v50  ;;  %v6010_v14 = vor.u32 %v6701_v3, %v6009_v2  ;;  %v5822_v9 = vor.u32 %v6651_v30, %v5819_v35  ;;  %v5650_v2 = vor.u32 %v6610_v60, %v5649_v58  ;;  %v5755_v30 = vld [vmem:[#allocation8 + $0x330] sm:$0xf0]  ;;  %v5761_v35 = vld [vmem:[#allocation8 + $0x328] sm:$0xf]  ;;  %v6556_v58 = vld [vmem:[#allocation8 + $0xac] sm:$0xf] }
 0x18f   :  { %3643 = vmatpush.bf16.msrb.mxu0 %v5678_v54  ;;  %v2231_v61 = vpop.f32.mrf.mxu2  ;;  %v6699_v54 = vld [vmem:[#allocation8 + $0x524] sm:$0xf]  ;;  %v5443_v60 = vld [vmem:[#allocation8 + $0xb8] sm:$0xf0] }
 0x190   :  { %v2244_v0 = vpop.f32.mrf.mxu3  ;;  %3607 = vmatpush.bf16.msra.mxu1 %v6010_v14 }
 0x191   :  { %3669 = vmatpush.bf16.msrb.mxu2 %v5934_v62  ;;  %v5870_v62 = vor.u32 %v6663_v44, %v5867_v48  ;;  %v5825_v44 = vld [vmem:[#allocation8 + $0x3a8] sm:$0xf]  ;;  %v6654_v48 = vld [vmem:[#allocation8 + $0x3b4] sm:$0xf0] }
 0x192   :  { %3682 = vmatpush.bf16.msrb.mxu3 %v6062_v27  ;;  %v6622_v27 = vld [vmem:[#allocation8 + $0x2b4] sm:$0xf0]  ;;  %v5826_v56 = vor.u32 %v6654_v48, %v5825_v44 }
 0x193   :  { %3644 = vmatpush.bf16.msrb.mxu0 %v5662_v51  ;;  %v5995_v51 = vld [vmem:[#allocation8 + $0x510] sm:$0xf0]  ;;  %v5698_v34 = vor.u32 %v6622_v27, %v5697_v63  ;;  %v5777_v27 = vld [vmem:[#allocation8 + $0x348] sm:$0xf]  ;;  %v6638_v44 = vld [vmem:[#allocation8 + $0x334] sm:$0xf0] }
 0x194   :  { %v5998_v28 = vor.u32 %v6695_v23, %v5995_v51  ;;  %3608 = vmatpush.bf16.msra.mxu1 %v5994_v36  ;;  %v5794_v23 = vor.u32 %v6646_v21, %v5793_v12  ;;  %v6602_v36 = vld [vmem:[#allocation8 + $0x214] sm:$0xf0]  ;;  %v6548_v21 = vld [vmem:[#allocation8 + $0x6c] sm:$0xf] }
 0x195   :  { %3670 = vmatpush.bf16.msrb.mxu2 %v5918_v49  ;;  %v6014_v49 = vor.u32 %v6699_v54, %v6011_v4  ;;  %v6643_v54 = vld [vmem:[#allocation8 + $0x364] sm:$0xf]  ;;  %v5633_v4 = vld [vmem:[#allocation8 + $0x228] sm:$0xf] }
 0x196   :  { %3683 = vmatpush.bf16.msrb.mxu3 %v6046_v42  ;;  %v2243_v42 = vadd.f32 %v7183_v59, %v2230_v33  ;;  %v5666_v59 = vor.u32 %v6614_v46, %v5665_v19  ;;  %v5790_v63 = vor.u32 %v6643_v54, %v5787_v11  ;;  %v5634_v51 = vor.u32 %v6606_v20, %v5633_v4  ;;  %v6564_v33 = vld [vmem:[#allocation8 + $0xec] sm:$0xf]  ;;  %v5459_v19 = vld [vmem:[#allocation8 + $0xd8] sm:$0xf0] }
 0x197   :  { %3645 = vmatpush.bf16.msrb.mxu0 %v5646_v18  ;;  %v6618_v18 = vld [vmem:[#allocation8 + $0x294] sm:$0xf0]  ;;  %v5758_v46 = vor.u32 %v6635_v41, %v5755_v30  ;;  %v6552_v54 = vld [vmem:[#allocation8 + $0x8c] sm:$0xf]  ;;  %v5427_v11 = vld [vmem:[#allocation8 + $0x98] sm:$0xf0] }
 0x198   :  { %3653 = vmatpush.bf16.msrb.mxu1 %v5854_v29  ;;  %v5682_v43 = vor.u32 %v6618_v18, %v5681_v15  ;;  %v6566_v29 = vld [vmem:[#allocation8 + $0xf4] sm:$0xf0]  ;;  %v5457_v18 = vld [vmem:[#allocation8 + $0xc8] sm:$0xf]  ;;  %v5430_v20 = vor.u32 %v6552_v54, %v5427_v11  ;;  %v5603_v54 = vld [vmem:[#allocation8 + $0x1f8] sm:$0xf0] }
 0x199   :  { %3671 = vmatpush.bf16.msrb.mxu2 %v5902_v31  ;;  %v5857_v31 = vld [vmem:[#allocation8 + $0x3e8] sm:$0xf]  ;;  %v6538_v30 = vld [vmem:[#allocation8 + $0x14] sm:$0xf0] }
 0x19a   :  { %3684 = vmatpush.bf16.msrb.mxu3 %v6030_v55  ;;  %v5858_v13 = vor.u32 %v6662_v6, %v5857_v31  ;;  %v5803_v55 = vld [vmem:[#allocation8 + $0x390] sm:$0xf0]  ;;  %v5774_v31 = vor.u32 %v6639_v17, %v5771_v26  ;;  %v6642_v6 = vld [vmem:[#allocation8 + $0x354] sm:$0xf0]  ;;  %v5393_v26 = vld [vmem:[#allocation8 + $0x48] sm:$0xf] }
 0x19b   :  { %3646 = vmatpush.bf16.msrb.mxu0 %v5630_v10  ;;  %v5806_v61 = vor.u32 %v6647_v53, %v5803_v55  ;;  %v5745_v55 = vld [vmem:[#allocation8 + $0x308] sm:$0xf] }
 0x19c   :  { %3654 = vmatpush.bf16.msrb.mxu1 %v5838_v40  ;;  %v6562_v40 = vld [vmem:[#allocation8 + $0xd4] sm:$0xf0]  ;;  %v5953_v11 = vld [vmem:[#allocation8 + $0x4a8] sm:$0xf] }
 0x19d   :  { %3672 = vmatpush.bf16.msrb.mxu2 %v5886_v45  ;;  %v5458_v48 = vor.u32 %v6562_v40, %v5457_v18 }
 0x19e   :  { %3685 = vmatpush.bf16.msrb.mxu3 %v6014_v49 }
 0x19f   :  { %3647 = vmatpush.bf16.msrb.mxu0 %v5614_v1  ;;  %v2255_v45 = vpop.f32.mrf.mxu0 }
 0x1a0   :  { %v2256_v25 = vadd.f32 %v2255_v45, %v2243_v42  ;;  %v2268_v10 = vpop.f32.mrf.mxu1  ;;  %3655 = vmatpush.bf16.msrb.mxu1 %v5822_v9  ;;  %v6560_v45 = vld [vmem:[#allocation8 + $0xcc] sm:$0xf]  ;;  %v5762_v9 = vor.u32 %v6638_v44, %v5761_v35  ;;  %v5363_v44 = vld [vmem:[#allocation8 + $0x18] sm:$0xf0] }
 0x1a1   :  { %3673 = vmatpush.bf16.msrb.mxu2 %v5870_v62  ;;  %v6650_v62 = vld [vmem:[#allocation8 + $0x394] sm:$0xf0]  ;;  %v6536_v35 = vld [vmem:[#allocation8 + $0xc] sm:$0xf] }
 0x1a2   :  { %3686 = vmatpush.bf16.msrb.mxu3 %v5998_v28  ;;  %v2269_v50 = vadd.f32 %v2268_v10, %v2256_v25  ;;  %v5473_v28 = vld [vmem:[#allocation8 + $0xe8] sm:$0xf]  ;;  %v6631_v10 = vld [vmem:[#allocation8 + $0x304] sm:$0xf] }
 0x1a3   :  { %v5474_v39 = vor.u32 %v6566_v29, %v5473_v28  ;;  %v5441_v25 = vld [vmem:[#allocation8 + $0xa8] sm:$0xf]  ;;  %v5395_v28 = vld [vmem:[#allocation8 + $0x58] sm:$0xf0] }
 0x1a4   :  { %v2354_v0 = vpack.c.bf16 %v2269_v50, %v2269_v50  ;;  %3656 = vmatpush.bf16.msrb.mxu1 %v5806_v61  ;;  %v5462_v50 = vor.u32 %v6560_v45, %v5459_v19  ;;  %v5985_v45 = vld [vmem:[#allocation8 + $0x4e8] sm:$0xf]  ;;  %v6694_v19 = vld [vmem:[#allocation8 + $0x4f4] sm:$0xf0] }
 0x1a5   :  { %3718 = vmatpush.bf16.msra.mxu2 %v5730_v47  ;;  %v5810_v47 = vor.u32 %v6650_v62, %v5809_v57  ;;  %v6634_v57 = vld [vmem:[#allocation8 + $0x314] sm:$0xf0]  ;;  %v435_v62 = vperm.slane %v7159_v52, 5  ;;  %v5411_v52 = vld [vmem:[#allocation8 + $0x78] sm:$0xf0] }
 0x1a6   :  { %3731 = vmatpush.bf16.msra.mxu3 %v5858_v13  ;;  %v2360_v1 = vunpack.c.l.bf16 %v2354_v0  ;;  %v5475_v13 = vld [vmem:[#allocation8 + $0xf8] sm:$0xf0]  ;;  %v5746_v61 = vor.u32 %v6634_v57, %v5745_v55  ;;  %v5414_v17 = vor.u32 %v6548_v21, %v5411_v52  ;;  %v5969_v57 = vld [vmem:[#allocation8 + $0x4c8] sm:$0xf] }
 0x1a7   :  { %v7191_v3 = vpop.f32.mrf.mxu2  ;;  %v2257_v49 = vpop.f32.mrf.mxu0  ;;  %v5585_v52 = vld [vmem:[#allocation8 + $0x1c8] sm:$0xf] }
 0x1a8   :  { %v7193_v14 = vpop.f32.mrf.mxu3  ;;  %6782 = vtanh.f32 %v2360_v1  ;;  %v2270_v22 = vpop.f32.mrf.mxu1  ;;  %3657 = vmatpush.bf16.msrb.mxu1 %v5790_v63  ;;  %v5425_v1 = vld [vmem:[#allocation8 + $0x88] sm:$0xf]  ;;  %v2282_v12 = vadd.f32 %v7191_v3, %v435_v62  ;;  %v6550_v63 = vld [vmem:[#allocation8 + $0x74] sm:$0xf0]  ;;  %v6544_v3 = vld [vmem:[#allocation8 + $0x4c] sm:$0xf] }
 0x1a9   :  { %3719 = vmatpush.bf16.msra.mxu2 %v5714_v24  ;;  %v5617_v24 = vld [vmem:[#allocation8 + $0x208] sm:$0xf] }
 0x1aa   :  { %3732 = vmatpush.bf16.msra.mxu3 %v5842_v32  ;;  %v5618_v38 = vor.u32 %v6602_v36, %v5617_v24  ;;  %v5478_v32 = vor.u32 %v6564_v33, %v5475_v13  ;;  %v5409_v49 = vld [vmem:[#allocation8 + $0x68] sm:$0xf]  ;;  %v2295_v22 = vadd.f32 %v7193_v14, %v2282_v12  ;;  %v5398_v14 = vor.u32 %v6544_v3, %v5395_v28  ;;  %v6542_v33 = vld [vmem:[#allocation8 + $0x34] sm:$0xf0]  ;;  %v6680_v28 = vld [vmem:[#allocation8 + $0x48c] sm:$0xf] }
 0x1ab   :  { %v5410_v36 = vor.u32 %v6550_v63, %v5409_v49  ;;  %v6686_v12 = vld [vmem:[#allocation8 + $0x4b4] sm:$0xf0] }
 0x1ac   :  { %3658 = vmatpush.bf16.msrb.mxu1 %v5774_v31  ;;  %v6682_v3 = vld [vmem:[#allocation8 + $0x494] sm:$0xf0] }
 0x1ad   :  { %3720 = vmatpush.bf16.msra.mxu2 %v5698_v34  ;;  %v5778_v34 = vor.u32 %v6642_v6, %v5777_v27  ;;  %v6546_v27 = vld [vmem:[#allocation8 + $0x54] sm:$0xf0]  ;;  %v5377_v6 = vld [vmem:[#allocation8 + $0x28] sm:$0xf] }
 0x1ae   :  { %3733 = vmatpush.bf16.msra.mxu3 %v5826_v56  ;;  %v6783_v37 = vpop.eup %6782  ;;  %v5739_v56 = vld [vmem:[#allocation8 + $0x310] sm:$0xf0]  ;;  %v5394_v29 = vor.u32 %v6546_v27, %v5393_v26  ;;  %v5378_v40 = vor.u32 %v6542_v33, %v5377_v6  ;;  %v7208_v26 = vld [vmem:[#allocation10] sm:$0xf]  ;;  %v5937_v27 = vld [vmem:[#allocation8 + $0x488] sm:$0xf] }
 0x1af   :  { %v2283_v15 = vpop.f32.mrf.mxu2  ;;  %v7195_v42 = vpack.c.bf16 %v6783_v37, %v6783_v37  ;;  %v5742_v53 = vor.u32 %v6631_v10, %v5739_v56  ;;  %v6540_v37 = vld [vmem:[#allocation8 + $0x2c] sm:$0xf]  ;;  %v5366_v56 = vor.u32 %v6536_v35, %v5363_v44  ;;  %v5569_v6 = vld [vmem:[#allocation8 + $0x1a8] sm:$0xf]  ;;  %v6590_v33 = vld [vmem:[#allocation8 + $0x1b4] sm:$0xf0] }
 0x1b0   :  { %3659 = vmatpush.bf16.msrb.mxu1 %v5758_v46  ;;  %v5553_v44 = vld [vmem:[#allocation8 + $0x188] sm:$0xf] }
 0x1b1   :  { %3721 = vmatpush.bf16.msra.mxu2 %v5682_v43  ;;  %v2296_v43 = vpop.f32.mrf.mxu3  ;;  %3596 = vmatmul.bf16.vlgmr.msra.gmra.mxu0 %v7195_v42 }
 0x1b2   :  { %3734 = vmatpush.bf16.msra.mxu3 %v5810_v47  ;;  %3674 = vmatmul.bf16.vlgmr.msrb.gmra.mxu2 %v7195_v42  ;;  %v5446_v47 = vor.u32 %v6556_v58, %v5443_v60  ;;  %v5361_v43 = vld [vmem:[#allocation8 + $0x8] sm:$0xf]  ;;  %v6690_v58 = vld [vmem:[#allocation8 + $0x4d4] sm:$0xf0]  ;;  %v6688_v60 = vld [vmem:[#allocation8 + $0x4cc] sm:$0xf] }
 0x1b3   :  { %3692 = vmatpush.bf16.msra.mxu0 %v5474_v39  ;;  %v5970_v62 = vor.u32 %v6690_v58, %v5969_v57  ;;  %v5537_v57 = vld [vmem:[#allocation8 + $0x168] sm:$0xf]  ;;  %v6582_v58 = vld [vmem:[#allocation8 + $0x174] sm:$0xf0] }
 0x1b4   :  { %3660 = vmatpush.bf16.msrb.mxu1 %v5742_v53 }
 0x1b5   :  { %3722 = vmatpush.bf16.msra.mxu2 %v5666_v59  ;;  %v6558_v59 = vld [vmem:[#allocation8 + $0xb4] sm:$0xf0] }
 0x1b6   :  { %3735 = vmatpush.bf16.msra.mxu3 %v5794_v23  ;;  %v5442_v0 = vor.u32 %v6558_v59, %v5441_v25  ;;  %v5362_v25 = vor.u32 %v6538_v30, %v5361_v43  ;;  %v5570_v30 = vor.u32 %v6590_v33, %v5569_v6  ;;  %v5505_v6 = vld [vmem:[#allocation8 + $0x128] sm:$0xf] }
 0x1b7   :  { %3693 = vmatpush.bf16.msra.mxu0 %v5458_v48  ;;  %v5987_v48 = vld [vmem:[#allocation8 + $0x4f8] sm:$0xf0] }
 0x1b9   :  { %3723 = vmatpush.bf16.msra.mxu2 %v5650_v2  ;;  %v6554_v2 = vld [vmem:[#allocation8 + $0x94] sm:$0xf0] }
 0x1ba   :  { %3736 = vmatpush.bf16.msra.mxu3 %v5778_v34  ;;  %v5426_v4 = vor.u32 %v6554_v2, %v5425_v1  ;;  %v6596_v2 = vld [vmem:[#allocation8 + $0x1ec] sm:$0xf] }
 0x1bb   :  { %3694 = vmatpush.bf16.msra.mxu0 %v5442_v0  ;;  %v5601_v0 = vld [vmem:[#allocation8 + $0x1e8] sm:$0xf]  ;;  %v5606_v21 = vor.u32 %v6596_v2, %v5603_v54  ;;  %v6670_v2 = vld [vmem:[#allocation8 + $0x434] sm:$0xf0]  ;;  %v6668_v54 = vld [vmem:[#allocation8 + $0x42c] sm:$0xf] }
 0x1bd   :  { %3724 = vmatpush.bf16.msra.mxu2 %v5634_v51 }
 0x1be   :  { %3737 = vmatpush.bf16.msra.mxu3 %v5762_v9  ;;  %v6692_v9 = vld [vmem:[#allocation8 + $0x4ec] sm:$0xf] }
 0x1bf   :  { %v2307_v23 = vpop.f32.mrf.mxu0  ;;  %3695 = vmatpush.bf16.msra.mxu0 %v5426_v4  ;;  %v5990_v55 = vor.u32 %v6692_v9, %v5987_v48  ;;  %v6684_v4 = vld [vmem:[#allocation8 + $0x4ac] sm:$0xf]  ;;  %v5555_v48 = vld [vmem:[#allocation8 + $0x198] sm:$0xf0] }
 0x1c0   :  { %v2320_v24 = vpop.f32.mrf.mxu1  ;;  %v2308_v51 = vadd.f32 %v2307_v23, %v2295_v22  ;;  %v6594_v22 = vld [vmem:[#allocation8 + $0x1d4] sm:$0xf0]  ;;  %v6592_v23 = vld [vmem:[#allocation8 + $0x1cc] sm:$0xf] }
 0x1c1   :  { %3725 = vmatpush.bf16.msra.mxu2 %v5618_v38  ;;  %3648 = vmatmul.bf16.vlgmr.msrb.gmra.mxu0 %v7162_v16  ;;  %v5379_v38 = vld [vmem:[#allocation8 + $0x38] sm:$0xf0]  ;;  %v6584_v9 = vld [vmem:[#allocation8 + $0x18c] sm:$0xf] }
 0x1c2   :  { %3738 = vmatpush.bf16.msra.mxu3 %v5746_v61  ;;  %v2321_v31 = vadd.f32 %v2320_v24, %v2308_v51  ;;  %v5971_v61 = vld [vmem:[#allocation8 + $0x4d8] sm:$0xf0] }
 0x1c3   :  { %3696 = vmatpush.bf16.msra.mxu0 %v5410_v36  ;;  %v5974_v1 = vor.u32 %v6688_v60, %v5971_v61  ;;  %v5954_v36 = vor.u32 %v6686_v12, %v5953_v11  ;;  %v5891_v11 = vld [vmem:[#allocation8 + $0x438] sm:$0xf0] }
 0x1c4   :  { %3726 = vmatmul.bf16.vlgmr.msra.gmra.mxu2 %v7162_v16 }
 0x1c5   :  { %3770 = vmatpush.bf16.msrb.mxu2 %v5478_v32  ;;  %v5382_v32 = vor.u32 %v6540_v37, %v5379_v38  ;;  %v6588_v37 = vld [vmem:[#allocation8 + $0x1ac] sm:$0xf]  ;;  %v5571_v38 = vld [vmem:[#allocation8 + $0x1b8] sm:$0xf0] }
 0x1c6   :  { %v5574_v35 = vor.u32 %v6588_v37, %v5571_v38  ;;  %v6572_v37 = vld [vmem:[#allocation8 + $0x12c] sm:$0xf]  ;;  %v5507_v38 = vld [vmem:[#allocation8 + $0x138] sm:$0xf0] }
 0x1c7   :  { %v2333_v13 = vpop.f32.mrf.mxu2  ;;  %v2309_v15 = vpop.f32.mrf.mxu0  ;;  %3697 = vmatpush.bf16.msra.mxu0 %v5394_v29  ;;  %v5939_v29 = vld [vmem:[#allocation8 + $0x498] sm:$0xf0] }
 0x1c8   :  { %v2346_v34 = vpop.f32.mrf.mxu3  ;;  %v2334_v39 = vadd.f32 %v2333_v13, %v2321_v31  ;;  %v2322_v18 = vpop.f32.mrf.mxu1  ;;  %v5938_v13 = vor.u32 %v6682_v3, %v5937_v27  ;;  %v6678_v15 = vld [vmem:[#allocation8 + $0x474] sm:$0xf0]  ;;  %v6664_v3 = vld [vmem:[#allocation8 + $0x40c] sm:$0xf] }
 0x1c9   :  { %3771 = vmatpush.bf16.msrb.mxu2 %v5462_v50  ;;  %v5986_v50 = vor.u32 %v6694_v19, %v5985_v45  ;;  %v6676_v18 = vld [vmem:[#allocation8 + $0x46c] sm:$0xf]  ;;  %v6586_v45 = vld [vmem:[#allocation8 + $0x194] sm:$0xf0] }
 0x1ca   :  { %v2347_v41 = vadd.f32 %v2346_v34, %v2334_v39  ;;  %v5942_v34 = vor.u32 %v6680_v28, %v5939_v29  ;;  %v5921_v39 = vld [vmem:[#allocation8 + $0x468] sm:$0xf]  ;;  %v6666_v27 = vld [vmem:[#allocation8 + $0x414] sm:$0xf0]  ;;  %v5875_v28 = vld [vmem:[#allocation8 + $0x418] sm:$0xf0] }
 0x1cb   :  { %3698 = vmatpush.bf16.msra.mxu0 %v5378_v40  ;;  %v5923_v40 = vld [vmem:[#allocation8 + $0x478] sm:$0xf0]  ;;  %v5922_v19 = vor.u32 %v6678_v15, %v5921_v39  ;;  %v6628_v29 = vld [vmem:[#allocation8 + $0x2ec] sm:$0xf] }
 0x1cc   :  { %v2355_v46 = vpack.c.bf16 %v2347_v41, %v2347_v41 }
 0x1cd   :  { %3772 = vmatpush.bf16.msrb.mxu2 %v5446_v47  ;;  %v6598_v47 = vld [vmem:[#allocation8 + $0x1f4] sm:$0xf0] }
 0x1ce   :  { %v2361_v10 = vunpack.c.l.bf16 %v2355_v46  ;;  %v5602_v63 = vor.u32 %v6598_v47, %v5601_v0  ;;  %v5926_v46 = vor.u32 %v6676_v18, %v5923_v40  ;;  %v5539_v0 = vld [vmem:[#allocation8 + $0x178] sm:$0xf0]  ;;  %v5889_v47 = vld [vmem:[#allocation8 + $0x428] sm:$0xf]  ;;  %v6624_v18 = vld [vmem:[#allocation8 + $0x2cc] sm:$0xf] }
 0x1cf   :  { %v2335_v59 = vpop.f32.mrf.mxu2  ;;  %3699 = vmatpush.bf16.msra.mxu0 %v5362_v25  ;;  %v5905_v25 = vld [vmem:[#allocation8 + $0x448] sm:$0xf]  ;;  %v5715_v40 = vld [vmem:[#allocation8 + $0x2d8] sm:$0xf0] }
 0x1d0   :  { %v2348_v53 = vpop.f32.mrf.mxu3  ;;  %6784 = vtanh.f32 %v2361_v10  ;;  %v5907_v59 = vld [vmem:[#allocation8 + $0x458] sm:$0xf0] }
 0x1d1   :  { %3773 = vmatpush.bf16.msrb.mxu2 %v5430_v20  ;;  %v5955_v20 = vld [vmem:[#allocation8 + $0x4b8] sm:$0xf0]  ;;  %v5554_v53 = vor.u32 %v6586_v45, %v5553_v44  ;;  %v6113_v45 = vld [vmem:[#allocation8 + $0x5e8] sm:$0xf] }
 0x1d2   :  { %3700 = vmatmul.bf16.vlgmr.msra.gmra.mxu0 %v7164_v5  ;;  %v5958_v51 = vor.u32 %v6684_v4, %v5955_v20  ;;  %v5491_v44 = vld [vmem:[#allocation8 + $0x118] sm:$0xf0] }
 0x1d3   :  { %3744 = vmatpush.bf16.msrb.mxu0 %v5986_v50  ;;  %v6672_v50 = vld [vmem:[#allocation8 + $0x44c] sm:$0xf] }
 0x1d4   :  { %v5910_v61 = vor.u32 %v6672_v50, %v5907_v59 }
 0x1d5   :  { %3774 = vmatpush.bf16.msrb.mxu2 %v5414_v17  ;;  %v5587_v17 = vld [vmem:[#allocation8 + $0x1d8] sm:$0xf0] }
 0x1d6   :  { %v6785_v49 = vpop.eup %6784  ;;  %v5590_v31 = vor.u32 %v6592_v23, %v5587_v17  ;;  %v5894_v23 = vor.u32 %v6668_v54, %v5891_v11  ;;  %v5873_v17 = vld [vmem:[#allocation8 + $0x408] sm:$0xf]  ;;  %v6716_v11 = vld [vmem:[#allocation8 + $0x5ac] sm:$0xf] }
 0x1d7   :  { %3745 = vmatpush.bf16.msrb.mxu0 %v5970_v62  ;;  %v7206_v24 = vpack.c.bf16 %v6785_v49, %v6785_v49  ;;  %v6580_v62 = vld [vmem:[#allocation8 + $0x16c] sm:$0xf]  ;;  %v5538_v49 = vor.u32 %v6582_v58, %v5537_v57  ;;  %v5874_v33 = vor.u32 %v6666_v27, %v5873_v17  ;;  %v6722_v58 = vld [vmem:[#allocation8 + $0x5d4] sm:$0xf0]  ;;  %v5651_v27 = vld [vmem:[#allocation8 + $0x258] sm:$0xf0] }
 0x1d8   :  { %v6608_v17 = vld [vmem:[#allocation8 + $0x24c] sm:$0xf] }
 0x1d9   :  { %3775 = vmatpush.bf16.msrb.mxu2 %v5398_v14  ;;  %3609 = vmatmul.bf16.vlgmr.msra.gmra.mxu1 %v7206_v24  ;;  %v2568_v14 = vperm.slane %v7208_v26, 0 }
 0x1da   :  { %3687 = vmatmul.bf16.vlgmr.msrb.gmra.mxu3 %v7206_v24  ;;  %3705 = vmatpush.bf16.msra.mxu1 %v5602_v63  ;;  %v5542_v63 = vor.u32 %v6580_v62, %v5539_v0  ;;  %v6616_v62 = vld [vmem:[#allocation8 + $0x28c] sm:$0xf]  ;;  %v5683_v0 = vld [vmem:[#allocation8 + $0x298] sm:$0xf0] }
 0x1db   :  { %3783 = vmatpush.bf16.msrb.mxu3 %v5606_v21  ;;  %3746 = vmatpush.bf16.msrb.mxu0 %v5954_v36  ;;  %v5521_v21 = vld [vmem:[#allocation8 + $0x148] sm:$0xf]  ;;  %v6576_v36 = vld [vmem:[#allocation8 + $0x14c] sm:$0xf]  ;;  %v5686_v54 = vor.u32 %v6616_v62, %v5683_v0 }
 0x1dd   :  { %3776 = vmatpush.bf16.msrb.mxu2 %v5382_v32 }
 0x1df   :  { %v3545_v41 = vpop.f32.mrf.mxu0  ;;  %3784 = vmatpush.bf16.msrb.mxu3 %v5590_v31  ;;  %3747 = vmatpush.bf16.msrb.mxu0 %v5938_v13  ;;  %v5878_v13 = vor.u32 %v6664_v3, %v5875_v28 }
 0x1e0   :  { %v3546_v32 = vadd.f32 %v3545_v41, %v2568_v14  ;;  %v3558_v43 = vpop.f32.mrf.mxu1 }
 0x1e1   :  { %3777 = vmatpush.bf16.msrb.mxu2 %v5366_v56  ;;  %v6674_v56 = vld [vmem:[#allocation8 + $0x454] sm:$0xf0] }
 0x1e2   :  { %v3559_v10 = vadd.f32 %v3558_v43, %v3546_v32  ;;  %v5906_v60 = vor.u32 %v6674_v56, %v5905_v25  ;;  %v5510_v32 = vor.u32 %v6572_v37, %v5507_v38  ;;  %v5489_v43 = vld [vmem:[#allocation8 + $0x108] sm:$0xf]  ;;  %v6620_v25 = vld [vmem:[#allocation8 + $0x2ac] sm:$0xf] }
 0x1e3   :  { %3785 = vmatpush.bf16.msrb.mxu3 %v5574_v35  ;;  %3748 = vmatpush.bf16.msrb.mxu0 %v5922_v19  ;;  %v6568_v35 = vld [vmem:[#allocation8 + $0x10c] sm:$0xf]  ;;  %v5718_v19 = vor.u32 %v6624_v18, %v5715_v40  ;;  %v6706_v40 = vld [vmem:[#allocation8 + $0x554] sm:$0xf0] }
 0x1e4   :  { %3778 = vmatmul.bf16.vlgmr.msrb.gmra.mxu2 %v7164_v5  ;;  %v5586_v5 = vor.u32 %v6594_v22, %v5585_v52  ;;  %v6578_v52 = vld [vmem:[#allocation8 + $0x154] sm:$0xf0]  ;;  %v5890_v22 = vor.u32 %v6670_v2, %v5889_v47  ;;  %v5494_v50 = vor.u32 %v6568_v35, %v5491_v44  ;;  %v6081_v2 = vld [vmem:[#allocation8 + $0x5a8] sm:$0xf] }
 0x1e5   :  { %3822 = vmatpush.bf16.msra.mxu2 %v5990_v55  ;;  %v5558_v55 = vor.u32 %v6584_v9, %v5555_v48  ;;  %v5522_v31 = vor.u32 %v6578_v52, %v5521_v21  ;;  %v6724_v9 = vld [vmem:[#allocation8 + $0x5ec] sm:$0xf]  ;;  %v6115_v48 = vld [vmem:[#allocation8 + $0x5f8] sm:$0xf0]  ;;  %v6065_v52 = vld [vmem:[#allocation8 + $0x588] sm:$0xf] }
 0x1e6   :  { %3706 = vmatpush.bf16.msra.mxu1 %v5586_v5  ;;  %v5731_v5 = vld [vmem:[#allocation8 + $0x2f8] sm:$0xf0] }
 0x1e7   :  { %v3547_v4 = vpop.f32.mrf.mxu0  ;;  %3786 = vmatpush.bf16.msrb.mxu3 %v5558_v55  ;;  %3749 = vmatpush.bf16.msrb.mxu0 %v5906_v60  ;;  %v5734_v15 = vor.u32 %v6628_v29, %v5731_v5  ;;  %v6097_v55 = vld [vmem:[#allocation8 + $0x5c8] sm:$0xf]  ;;  %v6720_v60 = vld [vmem:[#allocation8 + $0x5cc] sm:$0xf]  ;;  %v6710_v5 = vld [vmem:[#allocation8 + $0x574] sm:$0xf0] }
 0x1e8   :  { %v3560_v20 = vpop.f32.mrf.mxu1  ;;  %v6098_v47 = vor.u32 %v6722_v58, %v6097_v55  ;;  %v6083_v4 = vld [vmem:[#allocation8 + $0x5b8] sm:$0xf0]  ;;  %v6049_v29 = vld [vmem:[#allocation8 + $0x568] sm:$0xf]  ;;  %v6696_v55 = vld [vmem:[#allocation8 + $0x50c] sm:$0xf] }
 0x1e9   :  { %3823 = vmatpush.bf16.msra.mxu2 %v5974_v1  ;;  %v3571_v1 = vpop.f32.mrf.mxu2  ;;  %3661 = vmatmul.bf16.vlgmr.msrb.gmra.mxu1 %v7173_v8  ;;  %v6612_v20 = vld [vmem:[#allocation8 + $0x26c] sm:$0xf]  ;;  %v6086_v21 = vor.u32 %v6716_v11, %v6083_v4  ;;  %v6050_v38 = vor.u32 %v6710_v5, %v6049_v29  ;;  %v6731_v5 = vld [vmem:[#allocation11 + $0x20] sm:$0xff] }
 0x1ea   :  { %3707 = vmatpush.bf16.msra.mxu1 %v5570_v30  ;;  %v7213_v12 = vadd.f32 %v3571_v1, %v3559_v10  ;;  %3739 = vmatmul.bf16.vlgmr.msra.gmra.mxu3 %v7173_v8  ;;  %v6570_v30 = vld [vmem:[#allocation8 + $0x114] sm:$0xf0]  ;;  %v5699_v10 = vld [vmem:[#allocation8 + $0x2b8] sm:$0xf0]  ;;  %v6660_v58 = vld [vmem:[#allocation8 + $0x3ec] sm:$0xf] }
 0x1eb   :  { %3787 = vmatpush.bf16.msrb.mxu3 %v5542_v63  ;;  %3750 = vmatpush.bf16.msrb.mxu0 %v5890_v22  ;;  %v5490_v56 = vor.u32 %v6570_v30, %v5489_v43  ;;  %v5702_v57 = vor.u32 %v6620_v25, %v5699_v10  ;;  %v6600_v43 = vld [vmem:[#allocation8 + $0x20c] sm:$0xf]  ;;  %v5619_v30 = vld [vmem:[#allocation8 + $0x218] sm:$0xf0]  ;;  %v2569_v10 = vperm.slane %v7208_v26, 1 }
 0x1ec   :  { %v6652_v4 = vld [vmem:[#allocation8 + $0x3ac] sm:$0xf] }
 0x1ed   :  { %3824 = vmatpush.bf16.msra.mxu2 %v5958_v51  ;;  %v5523_v51 = vld [vmem:[#allocation8 + $0x158] sm:$0xf0]  ;;  %v6636_v29 = vld [vmem:[#allocation8 + $0x32c] sm:$0xf] }
 0x1ee   :  { %3708 = vmatpush.bf16.msra.mxu1 %v5554_v53  ;;  %v5526_v14 = vor.u32 %v6576_v36, %v5523_v51  ;;  %v6118_v53 = vor.u32 %v6724_v9, %v6115_v48  ;;  %v6712_v36 = vld [vmem:[#allocation8 + $0x58c] sm:$0xf]  ;;  %v6067_v51 = vld [vmem:[#allocation8 + $0x598] sm:$0xf0] }
 0x1ef   :  { %3751 = vmatpush.bf16.msrb.mxu0 %v5874_v33  ;;  %v6070_v28 = vor.u32 %v6712_v36, %v6067_v51  ;;  %v6019_v9 = vld [vmem:[#allocation8 + $0x538] sm:$0xf0]  ;;  %v6733_v51 = vld [vmem:[#allocation11 + $0x30] sm:$0xff] }
 0x1f0   :  { %3788 = vmatpush.bf16.msrb.mxu3 %v5526_v14  ;;  %v6051_v14 = vld [vmem:[#allocation8 + $0x578] sm:$0xf0] }
 0x1f1   :  { %3825 = vmatpush.bf16.msra.mxu2 %v5942_v34  ;;  %v6574_v34 = vld [vmem:[#allocation8 + $0x134] sm:$0xf0]  ;;  %v3573_v39 = vpop.f32.mrf.mxu2  ;;  %v5795_v36 = vld [vmem:[#allocation8 + $0x378] sm:$0xf0] }
 0x1f2   :  { %3709 = vmatpush.bf16.msra.mxu1 %v5538_v49  ;;  %v5506_v41 = vor.u32 %v6574_v34, %v5505_v6  ;;  %3752 = vmatmul.bf16.vlgmr.msrb.gmra.mxu0 %v7195_v42  ;;  %v5667_v49 = vld [vmem:[#allocation8 + $0x278] sm:$0xf0] }
 0x1f3   :  { %3796 = vmatpush.bf16.msra.mxu0 %v5734_v15  ;;  %v5670_v22 = vor.u32 %v6612_v20, %v5667_v49  ;;  %v5635_v34 = vld [vmem:[#allocation8 + $0x238] sm:$0xf0]  ;;  %v6033_v15 = vld [vmem:[#allocation8 + $0x548] sm:$0xf] }
 0x1f4   :  { %3789 = vmatpush.bf16.msrb.mxu3 %v5510_v32  ;;  %v6035_v32 = vld [vmem:[#allocation8 + $0x558] sm:$0xf0]  ;;  %v6034_v35 = vor.u32 %v6706_v40, %v6033_v15  ;;  %v6728_v15 = vld [vmem:[#allocation11 + $0x8] sm:$0xff] }
 0x1f5   :  { %3826 = vmatpush.bf16.msra.mxu2 %v5926_v46  ;;  %v6726_v46 = vld [vmem:[#allocation8 + $0x5f4] sm:$0xf0]  ;;  %v5827_v20 = vld [vmem:[#allocation8 + $0x3b8] sm:$0xf0] }
 0x1f6   :  { %3710 = vmatpush.bf16.msra.mxu1 %v5522_v31  ;;  %v6114_v59 = vor.u32 %v6726_v46, %v6113_v45  ;;  %v6708_v31 = vld [vmem:[#allocation8 + $0x56c] sm:$0xf]  ;;  %v6017_v45 = vld [vmem:[#allocation8 + $0x528] sm:$0xf]  ;;  %v5830_v49 = vor.u32 %v6652_v4, %v5827_v20  ;;  %v6746_v4 = vld [vmem:[#allocation11 + $0x98] sm:$0xff] }
 0x1f7   :  { %3797 = vmatpush.bf16.msra.mxu0 %v5718_v19  ;;  %v6054_v39 = vor.u32 %v6708_v31, %v6051_v14  ;;  %v6702_v19 = vld [vmem:[#allocation8 + $0x534] sm:$0xf0]  ;;  %v6700_v46 = vld [vmem:[#allocation8 + $0x52c] sm:$0xf] }
 0x1f8   :  { %3790 = vmatpush.bf16.msrb.mxu3 %v5494_v50  ;;  %v6022_v50 = vor.u32 %v6700_v46, %v6019_v9  ;;  %v6632_v14 = vld [vmem:[#allocation8 + $0x30c] sm:$0xf]  ;;  %v6735_v9 = vld [vmem:[#allocation11 + $0x40] sm:$0xff] }
 0x1f9   :  { %3827 = vmatpush.bf16.msra.mxu2 %v5910_v61  ;;  %v6099_v61 = vld [vmem:[#allocation8 + $0x5d8] sm:$0xf0]  ;;  %v6736_v46 = vld [vmem:[#allocation11 + $0x48] sm:$0xff] }
 0x1fa   :  { %3711 = vmatpush.bf16.msra.mxu1 %v5506_v41  ;;  %v6102_v1 = vor.u32 %v6720_v60, %v6099_v61  ;;  %v6704_v41 = vld [vmem:[#allocation8 + $0x54c] sm:$0xf]  ;;  %v5859_v60 = vld [vmem:[#allocation8 + $0x3f8] sm:$0xf0] }
 0x1fb   :  { %3798 = vmatpush.bf16.msra.mxu0 %v5702_v57  ;;  %3791 = vmatmul.bf16.vlgmr.msrb.gmra.mxu3 %v7166_v7  ;;  %v6038_v44 = vor.u32 %v6704_v41, %v6035_v32  ;;  %v6003_v57 = vld [vmem:[#allocation8 + $0x518] sm:$0xf0]  ;;  %v6727_v32 = vld [vmem:[#allocation11] sm:$0xff] }
 0x1fc   :  { %3835 = vmatpush.bf16.msra.mxu3 %v6118_v53  ;;  %v3584_v33 = vpop.f32.mrf.mxu3  ;;  %v6698_v53 = vld [vmem:[#allocation8 + $0x514] sm:$0xf0]  ;;  %v6006_v62 = vor.u32 %v6696_v55, %v6003_v57  ;;  %v6750_v57 = vld [vmem:[#allocation11 + $0xb8] sm:$0xff] }
 0x1fd   :  { %3828 = vmatpush.bf16.msra.mxu2 %v5894_v23  ;;  %v6714_v23 = vld [vmem:[#allocation8 + $0x594] sm:$0xf0]  ;;  %v7222_v37 = vadd.f32 %v3584_v33, %v7213_v12  ;;  %v5622_v12 = vor.u32 %v6600_v43, %v5619_v30  ;;  %v6730_v33 = vld [vmem:[#allocation11 + $0x18] sm:$0xff]  ;;  %v6740_v43 = vld [vmem:[#allocation11 + $0x68] sm:$0xff] }
 0x1fe   :  { %3712 = vmatpush.bf16.msra.mxu1 %v5490_v56  ;;  %v6066_v3 = vor.u32 %v6714_v23, %v6065_v52  ;;  %v6018_v56 = vor.u32 %v6702_v19, %v6017_v45  ;;  %v6734_v52 = vld [vmem:[#allocation11 + $0x38] sm:$0xff]  ;;  %v6644_v23 = vld [vmem:[#allocation8 + $0x36c] sm:$0xf]  ;;  %v6739_v30 = vld [vmem:[#allocation11 + $0x60] sm:$0xff] }
 0x1ff   :  { %3799 = vmatpush.bf16.msra.mxu0 %v5686_v54  ;;  %v5843_v54 = vld [vmem:[#allocation8 + $0x3d8] sm:$0xf0] }
 0x200   :  { %3836 = vmatpush.bf16.msra.mxu3 %v6102_v1 }
 0x201   :  { %3829 = vmatpush.bf16.msra.mxu2 %v5878_v13  ;;  %3713 = vmatmul.bf16.vlgmr.msra.gmra.mxu1 %v7166_v7  ;;  %v5654_v7 = vor.u32 %v6608_v17, %v5651_v27  ;;  %v6604_v13 = vld [vmem:[#allocation8 + $0x22c] sm:$0xf]  ;;  %v5798_v17 = vor.u32 %v6644_v23, %v5795_v36 }
 0x202   :  { %3757 = vmatpush.bf16.msrb.mxu1 %v6114_v59  ;;  %v5638_v18 = vor.u32 %v6604_v13, %v5635_v34  ;;  %v6001_v59 = vld [vmem:[#allocation8 + $0x508] sm:$0xf]  ;;  %v6640_v27 = vld [vmem:[#allocation8 + $0x34c] sm:$0xf]  ;;  %v6729_v34 = vld [vmem:[#allocation11 + $0x10] sm:$0xff] }
 0x203   :  { %3800 = vmatpush.bf16.msra.mxu0 %v5670_v22  ;;  %v6002_v61 = vor.u32 %v6698_v53, %v6001_v59  ;;  %v6744_v36 = vld [vmem:[#allocation11 + $0x88] sm:$0xff] }
 0x204   :  { %3830 = vmatmul.bf16.vlgmr.msra.gmra.mxu2 %v7195_v42  ;;  %v6718_v42 = vld [vmem:[#allocation8 + $0x5b4] sm:$0xf0]  ;;  %3837 = vmatpush.bf16.msra.mxu3 %v6086_v21  ;;  %v3586_v25 = vpop.f32.mrf.mxu3  ;;  %v5811_v21 = vld [vmem:[#allocation8 + $0x398] sm:$0xf0] }
 0x205   :  { %v6082_v63 = vor.u32 %v6718_v42, %v6081_v2  ;;  %v6656_v2 = vld [vmem:[#allocation8 + $0x3cc] sm:$0xf]  ;;  %4142 = vmatpush.bf16.msrb.mxu2 %v6750_v57 }
 0x206   :  { %3758 = vmatpush.bf16.msrb.mxu1 %v6098_v47  ;;  %v5862_v47 = vor.u32 %v6660_v58, %v5859_v60  ;;  %v5846_v11 = vor.u32 %v6656_v2, %v5843_v54  ;;  %v6747_v2 = vld [vmem:[#allocation11 + $0xa0] sm:$0xff] }
 0x207   :  { %v3623_v6 = vpop.f32.mrf.mxu2  ;;  %3801 = vmatpush.bf16.msra.mxu0 %v5654_v7  ;;  %v5763_v7 = vld [vmem:[#allocation8 + $0x338] sm:$0xf0] }
 0x208   :  { %3838 = vmatpush.bf16.msra.mxu3 %v6070_v28  ;;  %v3624_v0 = vadd.f32 %v3623_v6, %v2569_v10  ;;  %v6732_v28 = vld [vmem:[#allocation11 + $0x28] sm:$0xff]  ;;  %v5766_v31 = vor.u32 %v6636_v29, %v5763_v7  ;;  %v5747_v6 = vld [vmem:[#allocation8 + $0x318] sm:$0xf0]  ;;  %v6757_v29 = vld [vmem:[#allocation11 + $0xf0] sm:$0xff] }
 0x209   :  { %v5750_v13 = vor.u32 %v6632_v14, %v5747_v6  ;;  %v6756_v14 = vld [vmem:[#allocation11 + $0xe8] sm:$0xff] }
 0x20a   :  { %3759 = vmatpush.bf16.msrb.mxu1 %v6082_v63 }
 0x20b   :  { %3802 = vmatpush.bf16.msra.mxu0 %v5638_v18  ;;  %v6741_v18 = vld [vmem:[#allocation11 + $0x70] sm:$0xff] }
 0x20c   :  { %3839 = vmatpush.bf16.msra.mxu3 %v6054_v39  ;;  %v3636_v1 = vpop.f32.mrf.mxu3 }
 0x20d   :  { %v7226_v42 = vadd.f32 %v3636_v1, %v3624_v0  ;;  %v6748_v0 = vld [vmem:[#allocation11 + $0xa8] sm:$0xff] }
 0x20e   :  { %3760 = vmatpush.bf16.msrb.mxu1 %v6066_v3  ;;  %v5779_v3 = vld [vmem:[#allocation8 + $0x358] sm:$0xf0] }
 0x20f   :  { %v3625_v48 = vpop.f32.mrf.mxu2  ;;  %3803 = vmatpush.bf16.msra.mxu0 %v5622_v12  ;;  %v6737_v12 = vld [vmem:[#allocation11 + $0x50] sm:$0xff] }
 0x210   :  { %3840 = vmatpush.bf16.msra.mxu3 %v6038_v44  ;;  %v6738_v44 = vld [vmem:[#allocation11 + $0x58] sm:$0xff] }
 0x212   :  { %3761 = vmatpush.bf16.msrb.mxu1 %v6050_v38  ;;  %3804 = vmatmul.bf16.vlgmr.msra.gmra.mxu0 %v7162_v16  ;;  %v6648_v16 = vld [vmem:[#allocation8 + $0x38c] sm:$0xf]  ;;  %v6742_v38 = vld [vmem:[#allocation11 + $0x78] sm:$0xff] }
 0x213   :  { %4116 = vmatpush.bf16.msrb.mxu0 %v6734_v52  ;;  %v5814_v22 = vor.u32 %v6648_v16, %v5811_v21  ;;  %v6745_v21 = vld [vmem:[#allocation11 + $0x90] sm:$0xff] }
 0x214   :  { %3841 = vmatpush.bf16.msra.mxu3 %v6022_v50  ;;  %v3638_v63 = vpop.f32.mrf.mxu3 }
 0x216   :  { %3762 = vmatpush.bf16.msrb.mxu1 %v6034_v35 }
 0x217   :  { %4117 = vmatpush.bf16.msrb.mxu0 %v6733_v51 }
 0x218   :  { %3842 = vmatpush.bf16.msra.mxu3 %v6006_v62 }
 0x21a   :  { %3763 = vmatpush.bf16.msrb.mxu1 %v6018_v56 }
 0x21b   :  { %3843 = vmatmul.bf16.vlgmr.msra.gmra.mxu3 %v7206_v24  ;;  %4118 = vmatpush.bf16.msrb.mxu0 %v6732_v28  ;;  %v6758_v28 = vld [vmem:[#allocation11 + $0xf8] sm:$0xff] }
 0x21c   :  { %4155 = vmatpush.bf16.msrb.mxu3 %v6758_v28 }
 0x21e   :  { %3764 = vmatpush.bf16.msrb.mxu1 %v6002_v61  ;;  %v6749_v61 = vld [vmem:[#allocation11 + $0xb0] sm:$0xff] }
 0x21f   :  { %4119 = vmatpush.bf16.msrb.mxu0 %v6731_v5  ;;  %4143 = vmatpush.bf16.msrb.mxu2 %v6749_v61 }
 0x220   :  { %4156 = vmatpush.bf16.msrb.mxu3 %v6757_v29 }
 0x221   :  { %3765 = vmatmul.bf16.vlgmr.msrb.gmra.mxu1 %v7206_v24  ;;  %v5782_v24 = vor.u32 %v6640_v27, %v5779_v3 }
 0x222   :  { %3809 = vmatpush.bf16.msra.mxu1 %v5862_v47 }
 0x223   :  { %4120 = vmatpush.bf16.msrb.mxu0 %v6730_v33  ;;  %4144 = vmatpush.bf16.msrb.mxu2 %v6748_v0  ;;  %v6773_v0 = vld [vmem:[#allocation13] ss:$0 sm:$0xff] }
 0x224   :  { %4157 = vmatpush.bf16.msrb.mxu3 %v6756_v14 }
 0x226   :  { %3810 = vmatpush.bf16.msra.mxu1 %v5846_v11 }
 0x227   :  { %4121 = vmatpush.bf16.msrb.mxu0 %v6729_v34  ;;  %4145 = vmatpush.bf16.msrb.mxu2 %v6747_v2 }
 0x22a   :  { %3811 = vmatpush.bf16.msra.mxu1 %v5830_v49 }
 0x22b   :  { %4122 = vmatpush.bf16.msrb.mxu0 %v6728_v15  ;;  %4146 = vmatpush.bf16.msrb.mxu2 %v6746_v4 }
 0x22e   :  { %3812 = vmatpush.bf16.msra.mxu1 %v5814_v22  ;;  %v3597_v39 = vpop.f32.mrf.mxu0 }
 0x22f   :  { %4123 = vmatpush.bf16.msrb.mxu0 %v6727_v32  ;;  %v3598_v10 = vadd.f32 %v3597_v39, %v7222_v37  ;;  %4147 = vmatpush.bf16.msrb.mxu2 %v6745_v21  ;;  %v6752_v32 = vld [vmem:[#allocation11 + $0xc8] sm:$0xff] }
 0x232   :  { %3813 = vmatpush.bf16.msra.mxu1 %v5798_v17  ;;  %v6743_v17 = vld [vmem:[#allocation11 + $0x80] sm:$0xff] }
 0x233   :  { %4148 = vmatpush.bf16.msrb.mxu2 %v6744_v36 }
 0x235   :  { %v3675_v40 = vpop.f32.mrf.mxu2 }
 0x236   :  { %3814 = vmatpush.bf16.msra.mxu1 %v5782_v24  ;;  %v3599_v41 = vpop.f32.mrf.mxu0 }
 0x237   :  { %4149 = vmatpush.bf16.msrb.mxu2 %v6743_v17 }
 0x23a   :  { %3815 = vmatpush.bf16.msra.mxu1 %v5766_v31  ;;  %v2570_v31 = vperm.slane %v7208_v26, 2 }
 0x23d   :  { %v3677_v35 = vpop.f32.mrf.mxu2 }
 0x23e   :  { %3816 = vmatpush.bf16.msra.mxu1 %v5750_v13  ;;  %v3649_v45 = vpop.f32.mrf.mxu0  ;;  %v6755_v13 = vld [vmem:[#allocation11 + $0xe0] sm:$0xff] }
 0x23f   :  { %v3650_v37 = vadd.f32 %v3649_v45, %v7226_v42  ;;  %4158 = vmatpush.bf16.msrb.mxu3 %v6755_v13  ;;  %v6751_v45 = vld [vmem:[#allocation11 + $0xc0] sm:$0xff] }
 0x241   :  { %3817 = vmatmul.bf16.vlgmr.msra.gmra.mxu1 %v7173_v8 }
 0x242   :  { %4129 = vmatpush.bf16.msrb.mxu1 %v6742_v38  ;;  %v6754_v38 = vld [vmem:[#allocation11 + $0xd8] sm:$0xff] }
 0x243   :  { %4159 = vmatpush.bf16.msrb.mxu3 %v6754_v38 }
 0x246   :  { %4130 = vmatpush.bf16.msrb.mxu1 %v6741_v18  ;;  %v3651_v8 = vpop.f32.mrf.mxu0 }
 0x247   :  { %v7231_v19 = vpop.f32.mrf.mxu2 }
 0x24a   :  { %4131 = vmatpush.bf16.msrb.mxu1 %v6740_v43 }
 0x24e   :  { %4132 = vmatpush.bf16.msrb.mxu1 %v6739_v30 }
 0x24f   :  { %v3729_v48 = vpop.f32.mrf.mxu2  ;;  %v3701_v25 = vpop.f32.mrf.mxu0 }
 0x250   :  { %v3702_v6 = vadd.f32 %v3701_v25, %v2570_v31 }
 0x252   :  { %4133 = vmatpush.bf16.msrb.mxu1 %v6738_v44 }
 0x256   :  { %4134 = vmatpush.bf16.msrb.mxu1 %v6737_v12  ;;  %v3610_v56 = vpop.f32.mrf.mxu1 }
 0x257   :  { %v3611_v50 = vadd.f32 %v3610_v56, %v3598_v10  ;;  %v3703_v55 = vpop.f32.mrf.mxu0 }
 0x259   :  { %v3848_v53 = vmax.f32 %v3611_v50, 0.0 }
 0x25a   :  { %4135 = vmatpush.bf16.msrb.mxu1 %v6736_v46 }
 0x25b   :  { %v3852_v58 = vpack.c.bf16 %v3848_v53, %v3848_v53 }
 0x25d   :  { %v3688_v60 = vpop.f32.mrf.mxu3  ;;  %4124 = vmatmul.bf16.vlgmr.msrb.gmra.mxu0 %v3852_v58 }
 0x25e   :  { %4136 = vmatpush.bf16.msrb.mxu1 %v6735_v9  ;;  %v3612_v62 = vpop.f32.mrf.mxu1 }
 0x265   :  { %v3690_v1 = vpop.f32.mrf.mxu3 }
 0x266   :  { %v3662_v54 = vpop.f32.mrf.mxu1 }
 0x267   :  { %v7234_v59 = vpop.f32.mrf.mxu2  ;;  %v3663_v11 = vadd.f32 %v3662_v54, %v3650_v37 }
 0x269   :  { %v3676_v20 = vadd.f32 %v3675_v40, %v3663_v11  ;;  %v6753_v40 = vld [vmem:[#allocation11 + $0xd0] sm:$0xff] }
 0x26a   :  { %4160 = vmatpush.bf16.msrb.mxu3 %v6753_v40 }
 0x26b   :  { %v3689_v49 = vadd.f32 %v3688_v60, %v3676_v20 }
 0x26d   :  { %v3740_v63 = vpop.f32.mrf.mxu3  ;;  %v3849_v16 = vmax.f32 %v3689_v49, 0.0 }
 0x26e   :  { %v3664_v52 = vpop.f32.mrf.mxu1  ;;  %4161 = vmatpush.bf16.msrb.mxu3 %v6752_v32 }
 0x26f   :  { %v3781_v47 = vpop.f32.mrf.mxu2  ;;  %v3853_v22 = vpack.c.bf16 %v3849_v16, %v3849_v16  ;;  %v3753_v23 = vpop.f32.mrf.mxu0 }
 0x271   :  { %4137 = vmatmul.bf16.vlgmr.msrb.gmra.mxu1 %v3853_v22 }
 0x272   :  { %4162 = vmatpush.bf16.msrb.mxu3 %v6751_v45 }
 0x275   :  { %v3742_v51 = vpop.f32.mrf.mxu3 }
 0x277   :  { %v3755_v3 = vpop.f32.mrf.mxu0 }
 0x27e   :  { %v3714_v27 = vpop.f32.mrf.mxu1  ;;  %v3792_v24 = vpop.f32.mrf.mxu3 }
 0x27f   :  { %v3715_v34 = vadd.f32 %v3714_v27, %v3702_v6 }
 0x281   :  { %v3728_v39 = vadd.f32 %v7231_v19, %v3715_v34  ;;  %v2571_v19 = vperm.slane %v7208_v26, 3 }
 0x283   :  { %v3741_v18 = vadd.f32 %v3740_v63, %v3728_v39  ;;  %v3780_v48 = vadd.f32 %v7234_v59, %v2571_v19 }
 0x285   :  { %v3754_v41 = vadd.f32 %v3753_v23, %v3741_v18  ;;  %v3793_v25 = vadd.f32 %v3792_v24, %v3780_v48 }
 0x286   :  { %v3716_v5 = vpop.f32.mrf.mxu1  ;;  %v3794_v33 = vpop.f32.mrf.mxu3 }
 0x287   :  { %v3831_v42 = vpop.f32.mrf.mxu2 }
 0x28f   :  { %v3833_v7 = vpop.f32.mrf.mxu2  ;;  %v3805_v15 = vpop.f32.mrf.mxu0 }
 0x290   :  { %v3806_v10 = vadd.f32 %v3805_v15, %v3793_v25 }
 0x297   :  { %v3807_v35 = vpop.f32.mrf.mxu0 }
 0x29e   :  { %v3766_v43 = vpop.f32.mrf.mxu1  ;;  %v3844_v8 = vpop.f32.mrf.mxu3 }
 0x29f   :  { %v3767_v30 = vadd.f32 %v3766_v43, %v3754_v41 }
 0x2a1   :  { %v3850_v44 = vmax.f32 %v3767_v30, 0.0 }
 0x2a3   :  { %v3854_v12 = vpack.c.bf16 %v3850_v44, %v3850_v44 }
 0x2a5   :  { %4150 = vmatmul.bf16.vlgmr.msrb.gmra.mxu2 %v3854_v12 }
 0x2a6   :  { %v3768_v46 = vpop.f32.mrf.mxu1  ;;  %v3846_v9 = vpop.f32.mrf.mxu3 }
 0x2be   :  { %v3818_v56 = vpop.f32.mrf.mxu1 }
 0x2bf   :  { %v3819_v50 = vadd.f32 %v3818_v56, %v3806_v10 }
 0x2c1   :  { %v3832_v53 = vadd.f32 %v3831_v42, %v3819_v50 }
 0x2c3   :  { %v3845_v55 = vadd.f32 %v3844_v8, %v3832_v53 }
 0x2c5   :  { %v3851_v57 = vmax.f32 %v3845_v55, 0.0 }
 0x2c6   :  { %v3820_v58 = vpop.f32.mrf.mxu1 }
 0x2c7   :  { %v3855_v60 = vpack.c.bf16 %v3851_v57, %v3851_v57 }
 0x2c9   :  { %4163 = vmatmul.bf16.vlgmr.msrb.gmra.mxu3 %v3855_v60 }
 0x2da   :  { %v4125_v61 = vpop.f32.mrf.mxu0 }
 0x2db   :  { %v4126_v47 = vadd.f32 %v6773_v0, %v4125_v61 }
 0x2e2   :  { %v4127_v62 = vpop.f32.mrf.mxu0 }
 0x2ee   :  { %v4138_v1 = vpop.f32.mrf.mxu1 }
 0x2ef   :  { %v4139_v2 = vadd.f32 %v4138_v1, %v4126_v47 }
 0x2f6   :  { %v4140_v37 = vpop.f32.mrf.mxu1 }
 0x328   :  { %v4151_v26 = vpop.f32.mrf.mxu2 }
 0x329   :  { %v4152_v59 = vadd.f32 %v4151_v26, %v4139_v2 }
 0x330   :  { %v4153_v54 = vpop.f32.mrf.mxu2 }
 0x34c   :  { %v4164_v11 = vpop.f32.mrf.mxu3 }
 0x34d   :  { %v4165_v4 = vadd.f32 %v4164_v11, %v4152_v59 }
 0x34f   :  { %4168 = vmax.xlane.f32.xlu0 %v4165_v4 }
 0x354   :  { %v4166_v20 = vpop.f32.mrf.mxu3 }
 0x3c2   :  { %v4169_v49 = vpop.xlane.xlu0 %4168 }
 0x3c3   :  { %v4170_v63 = vsub.f32 %v4165_v4, %v4169_v49 }
 0x3c5   :  { %v4171_v16 = vmul.f32 1.442695, %v4170_v63 }
 0x3c7   :  { %6786 = vpow2.f32 %v4171_v16 }
 0x3cd   :  { %v6787_v21 = vpop.eup %6786 }
 0x3ce   :  { %4173 = vadd.xlane.f32.xlu0 %v6787_v21 }
 0x441   :  { %v4174_v52 = vpop.xlane.xlu0 %4173 }
 0x442   :  { %6788 = vlog2.f32 %v4174_v52 }
 0x448   :  { %v6789_v22 = vpop.eup %6788 }
 0x449   :  { %v4176_v23 = vmul.f32 0.6931472, %v6789_v22 }
 0x44b   :  { %v4177_v36 = vsub.f32 %v4170_v63, %v4176_v23 }
 0x44d   :  { %4178 = vst [vmem:[#allocation14] sm:$0xff] %v4177_v36 }
 0x44e   :  { %4189 = dma.vmem_to_hbm [thread:$0]  %s4185_s6, 128, %s4187_s15, [#allocation4]  }
 0x44f   :  { %6991 = dma.done.wait [#allocation4], 128  }
 0x450   :  { %6992 = vsyncadd [#allocation4], 4294967168 }
 0x451   :  { %4194 = vsyncpa [#allocation3], 1 }
 0x452   :  { %4195 = vsyncpa [#allocation6], 1 }
 0x453   :  { %4196 = vsyncpa [#allocation9], 1 }
 0x454   :  { %4197 = vsyncpa [#allocation12], 1 }
 0x455   :  { %4198 = vsyncpa [#allocation4], 1 }

</bundles_post_ra>
